<compile_context>
chip_gen: v7x
topology: tpu7x:2x2x1
jax: 0.10.0
libtpu: 0.0.40
codegen_flags: <defaults>
</compile_context>

<pallas_src>
import functools

import jax
import jax.numpy as jnp
from jax.experimental import pallas as pl


# ---------------- small, ViT-shaped config ----------------
class Cfg:
    hidden_size = 32
    image_size = 16
    patch_size = 4
    num_channels = 3
    num_attention_heads = 4
    intermediate_size = 64
    num_hidden_layers = 2
    num_labels = 10
    layer_norm_eps = 1e-12


def _round_up(x, m):
    return (x + m - 1) // m * m


# ---------------- in-kernel helpers ----------------
def _layernorm(h, w, b, eps):
    mu = jnp.mean(h, axis=-1, keepdims=True)
    var = jnp.mean(jnp.square(h - mu), axis=-1, keepdims=True)
    return (h - mu) * jax.lax.rsqrt(var + eps) * w + b


# ---------------- the single fused kernel ----------------
def vit_kernel(*refs, num_heads, num_layers, eps, s_real):
    # inputs: tok, patch_w, patch_b, cls, pos, 16 refs per layer, ln_f_w, ln_f_b,
    #         head_w, head_b ; output: logits
    tok_ref, pw_ref, pb_ref, cls_ref, pos_ref = refs[:5]
    layer_refs = refs[5:5 + 16 * num_layers]
    lnf_w_ref, lnf_b_ref, head_w_ref, head_b_ref, out_ref = refs[5 + 16 * num_layers:]

    tok = tok_ref[...]                        # (B, S_pad, CPP); row 0 / pad rows = 0
    B, S, CPP = tok.shape
    D = pw_ref.shape[1]
    BS = B * S
    hd = D // num_heads
    scale = float(hd) ** -0.5

    # ---- embeddings: patch projection + CLS token + position embeddings ----
    proj = jnp.dot(tok.reshape(BS, CPP), pw_ref[...],
                   preferred_element_type=jnp.float32) + pb_ref[...]
    proj = proj.reshape(B, S, D)
    row_idx = jax.lax.broadcasted_iota(jnp.int32, (B, S, D), 1)
    emb = jnp.where(row_idx == 0, cls_ref[...][None, :, :], proj)   # row 0 -> CLS
    h = (emb + pos_ref[...][None, :, :]).reshape(BS, D)             # (B*S, D)

    # additive key-padding mask, shared by every layer / head
    key_idx = jax.lax.broadcasted_iota(jnp.int32, (S, S), 1)
    key_bias = jnp.where(key_idx < s_real, 0.0, -1e30).astype(jnp.float32)[None]

    # ---- encoder layers (statically unrolled, weights VMEM-resident) ----
    for l in range(num_layers):
        (ln1w, ln1b, wq, bq, wk, bk, wv, bv, wo, bo,
         ln2w, ln2b, wi, bi, wo2, bo2) = layer_refs[16 * l:16 * (l + 1)]

        x = h                                                        # (BS, D)
        hn = _layernorm(x, ln1w[...], ln1b[...], eps)

        q = (jnp.dot(hn, wq[...], preferred_element_type=jnp.float32) + bq[...]) * scale
        k = jnp.dot(hn, wk[...], preferred_element_type=jnp.float32) + bk[...]
        v = jnp.dot(hn, wv[...], preferred_element_type=jnp.float32) + bv[...]
        qb = q.reshape(B, S, D)
        kb = k.reshape(B, S, D)
        vb = v.reshape(B, S, D)

        wo_full = wo[...]
        attn_proj = jnp.zeros((BS, D), jnp.float32)
        for hh in range(num_heads):                                  # static unroll
            sl = slice(hh * hd, (hh + 1) * hd)
            scores = jnp.einsum('bqd,bkd->bqk', qb[:, :, sl], kb[:, :, sl],
                                preferred_element_type=jnp.float32) + key_bias
            probs = jax.nn.softmax(scores, axis=-1)
            ctx = jnp.einsum('bqk,bkd->bqd', probs, vb[:, :, sl],
                             preferred_element_type=jnp.float32)     # (B, S, hd)
            # fold this head's output projection -> no lane-axis concat / stores
            attn_proj = attn_proj + jnp.dot(ctx.reshape(BS, hd), wo_full[sl, :],
                                            preferred_element_type=jnp.float32)
        attn_out = attn_proj + bo[...]
        res2 = attn_out + x

        h2 = _layernorm(res2, ln2w[...], ln2b[...], eps)
        inter = jnp.dot(h2, wi[...], preferred_element_type=jnp.float32) + bi[...]
        # TODO(synk): PyTorch default GELU is exact (erf); using tanh-approx GELU in-kernel.
        inter = jax.nn.gelu(inter, approximate=True)
        mlp = jnp.dot(inter, wo2[...], preferred_element_type=jnp.float32) + bo2[...]
        h = mlp + res2

    # ---- final layernorm on CLS token + classifier head (fused) ----
    cls_h = h.reshape(B, S, D)[:, 0, :]                              # (B, D)
    cls_h = _layernorm(cls_h, lnf_w_ref[...], lnf_b_ref[...], eps)
    out_ref[...] = jnp.dot(cls_h, head_w_ref[...],
                           preferred_element_type=jnp.float32) + head_b_ref[...]


# ---------------- glue (plain XLA, negligible cost) ----------------
def extract_patches(x, patch):
    # x: (B, C, H, W) NCHW -> (B, N, C*P*P), row-major (h, w) patch order,
    # matching Conv2d(stride=kernel) + 'b c h w -> b (h w) c'.
    B, C, H, W = x.shape
    Hn, Wn = H // patch, W // patch
    x = x.reshape(B, C, Hn, patch, Wn, patch)
    x = x.transpose(0, 2, 4, 1, 3, 5)
    return x.reshape(B, Hn * Wn, C * patch * patch)


def vit_forward(x, params, cfg):
    B = x.shape[0]
    D = cfg.hidden_size
    P = cfg.patch_size
    N = (cfg.image_size // P) ** 2
    S = N + 1
    S_pad = _round_up(S, 8)                       # sublane-aligned sequence length
    CPP = cfg.num_channels * P * P

    patches = extract_patches(x, P)               # (B, N, CPP)
    # token slab: row 0 reserved for CLS (zeros here), rows 1..N patches, rest 0-pad
    tok = jnp.zeros((B, S_pad, CPP), jnp.float32).at[:, 1:N + 1, :].set(patches)
    pos_pad = jnp.zeros((S_pad, D), jnp.float32).at[:S, :].set(params["pos"])

    kern = functools.partial(
        vit_kernel,
        num_heads=cfg.num_attention_heads,
        num_layers=cfg.num_hidden_layers,
        eps=cfg.layer_norm_eps,
        s_real=S,
    )

    layer_args = []
    for lyr in params["layers"]:
        layer_args += [lyr["ln1_w"], lyr["ln1_b"], lyr["wq"], lyr["bq"],
                       lyr["wk"], lyr["bk"], lyr["wv"], lyr["bv"],
                       lyr["wo"], lyr["bo"], lyr["ln2_w"], lyr["ln2_b"],
                       lyr["wi"], lyr["bi"], lyr["wo2"], lyr["bo2"]]

    # single grid-less pallas_call: every operand is one whole-array VMEM block
    logits = pl.pallas_call(
        kern,
        out_shape=jax.ShapeDtypeStruct((B, cfg.num_labels), jnp.float32),
    )(tok, params["patch_w"], params["patch_b"], params["cls"], pos_pad,
      *layer_args,
      params["ln_f_w"], params["ln_f_b"], params["cls_w"], params["cls_b"])
    return logits


# ---------------- parameters ----------------
def init_params(key, cfg):
    D, C, P = cfg.hidden_size, cfg.num_channels, cfg.patch_size
    I, L = cfg.intermediate_size, cfg.num_labels
    N = (cfg.image_size // P) ** 2
    keys = jax.random.split(key, 64)
    ki = iter(keys)

    def dense(kk, din, dout):
        # stored as (in, out): PyTorch Linear weight (out, in) transposed
        return (jax.random.normal(kk, (din, dout), jnp.float32) * 0.02,
                jnp.zeros((1, dout), jnp.float32))

    params = {
        "patch_w": jax.random.normal(next(ki), (C * P * P, D), jnp.float32) * 0.02,
        "patch_b": jnp.zeros((1, D), jnp.float32),
        "cls": jax.random.normal(next(ki), (1, D), jnp.float32),
        "pos": jax.random.normal(next(ki), (N + 1, D), jnp.float32),
    }
    layers = []
    for _ in range(cfg.num_hidden_layers):
        lyr = {"ln1_w": jnp.ones((1, D), jnp.float32), "ln1_b": jnp.zeros((1, D), jnp.float32),
               "ln2_w": jnp.ones((1, D), jnp.float32), "ln2_b": jnp.zeros((1, D), jnp.float32)}
        lyr["wq"], lyr["bq"] = dense(next(ki), D, D)
        lyr["wk"], lyr["bk"] = dense(next(ki), D, D)
        lyr["wv"], lyr["bv"] = dense(next(ki), D, D)
        lyr["wo"], lyr["bo"] = dense(next(ki), D, D)
        lyr["wi"], lyr["bi"] = dense(next(ki), D, I)
        lyr["wo2"], lyr["bo2"] = dense(next(ki), I, D)
        layers.append(lyr)
    params["layers"] = layers
    params["ln_f_w"] = jnp.ones((1, D), jnp.float32)
    params["ln_f_b"] = jnp.zeros((1, D), jnp.float32)
    params["cls_w"], params["cls_b"] = dense(next(ki), D, L)
    return params


if __name__ == "__main__":
    cfg = Cfg()
    key = jax.random.PRNGKey(0)
    pkey, xkey = jax.random.split(key)
    params = init_params(pkey, cfg)

    x = jax.random.normal(
        xkey, (2, cfg.num_channels, cfg.image_size, cfg.image_size), jnp.float32)

    logits = jax.jit(lambda xx: vit_forward(xx, params, cfg))(x)
    jax.block_until_ready(logits)

    assert logits.shape == (2, cfg.num_labels), logits.shape
    assert bool(jnp.all(jnp.isfinite(logits)))
    print("KERNEL_OK")
</pallas_src>

<mosaic_0001>
module attributes {stable_mosaic.version = 11 : i64} {
  func.func @vit_kernel(%arg0: memref<2x24x48xf32, #tpu.memory_space<vmem>>, %arg1: memref<48x32xf32, #tpu.memory_space<vmem>>, %arg2: memref<1x32xf32, #tpu.memory_space<vmem>>, %arg3: memref<1x32xf32, #tpu.memory_space<vmem>>, %arg4: memref<24x32xf32, #tpu.memory_space<vmem>>, %arg5: memref<1x32xf32, #tpu.memory_space<vmem>>, %arg6: memref<1x32xf32, #tpu.memory_space<vmem>>, %arg7: memref<32x32xf32, #tpu.memory_space<vmem>>, %arg8: memref<1x32xf32, #tpu.memory_space<vmem>>, %arg9: memref<32x32xf32, #tpu.memory_space<vmem>>, %arg10: memref<1x32xf32, #tpu.memory_space<vmem>>, %arg11: memref<32x32xf32, #tpu.memory_space<vmem>>, %arg12: memref<1x32xf32, #tpu.memory_space<vmem>>, %arg13: memref<32x32xf32, #tpu.memory_space<vmem>>, %arg14: memref<1x32xf32, #tpu.memory_space<vmem>>, %arg15: memref<1x32xf32, #tpu.memory_space<vmem>>, %arg16: memref<1x32xf32, #tpu.memory_space<vmem>>, %arg17: memref<32x64xf32, #tpu.memory_space<vmem>>, %arg18: memref<1x64xf32, #tpu.memory_space<vmem>>, %arg19: memref<64x32xf32, #tpu.memory_space<vmem>>, %arg20: memref<1x32xf32, #tpu.memory_space<vmem>>, %arg21: memref<1x32xf32, #tpu.memory_space<vmem>>, %arg22: memref<1x32xf32, #tpu.memory_space<vmem>>, %arg23: memref<32x32xf32, #tpu.memory_space<vmem>>, %arg24: memref<1x32xf32, #tpu.memory_space<vmem>>, %arg25: memref<32x32xf32, #tpu.memory_space<vmem>>, %arg26: memref<1x32xf32, #tpu.memory_space<vmem>>, %arg27: memref<32x32xf32, #tpu.memory_space<vmem>>, %arg28: memref<1x32xf32, #tpu.memory_space<vmem>>, %arg29: memref<32x32xf32, #tpu.memory_space<vmem>>, %arg30: memref<1x32xf32, #tpu.memory_space<vmem>>, %arg31: memref<1x32xf32, #tpu.memory_space<vmem>>, %arg32: memref<1x32xf32, #tpu.memory_space<vmem>>, %arg33: memref<32x64xf32, #tpu.memory_space<vmem>>, %arg34: memref<1x64xf32, #tpu.memory_space<vmem>>, %arg35: memref<64x32xf32, #tpu.memory_space<vmem>>, %arg36: memref<1x32xf32, #tpu.memory_space<vmem>>, %arg37: memref<1x32xf32, #tpu.memory_space<vmem>>, %arg38: memref<1x32xf32, #tpu.memory_space<vmem>>, %arg39: memref<32x10xf32, #tpu.memory_space<vmem>>, %arg40: memref<1x10xf32, #tpu.memory_space<vmem>>, %arg41: memref<2x10xf32, #tpu.memory_space<vmem>>) attributes {dimension_semantics = [], scalar_prefetch = 0 : i64, scratch_operands = 0 : i64, tpu.core_type = #tpu.core_type<tc>} {
    %c0 = arith.constant 0 : index
    %c0_0 = arith.constant 0 : index
    %c0_1 = arith.constant 0 : index
    %0 = vector.load %arg0[%c0, %c0_0, %c0_1] : memref<2x24x48xf32, #tpu.memory_space<vmem>>, vector<2x24x48xf32>
    %1 = vector.shape_cast %0 : vector<2x24x48xf32> to vector<48x48xf32>
    %c0_2 = arith.constant 0 : index
    %c0_3 = arith.constant 0 : index
    %2 = vector.load %arg1[%c0_2, %c0_3] : memref<48x32xf32, #tpu.memory_space<vmem>>, vector<48x32xf32>
    %cst = arith.constant dense<0.000000e+00> : vector<48x32xf32>
    %3 = tpu.matmul %1, %2, %cst {dimension_numbers = #tpu.dot_dimension_numbers<[1], [0], [0], [1], [0, 0, 1, 1], [], []>} : vector<48x48xf32>, vector<48x32xf32>, vector<48x32xf32> -> vector<48x32xf32>
    %c0_4 = arith.constant 0 : index
    %c0_5 = arith.constant 0 : index
    %4 = vector.load %arg2[%c0_4, %c0_5] : memref<1x32xf32, #tpu.memory_space<vmem>>, vector<1x32xf32>
    %5 = vector.broadcast %4 : vector<1x32xf32> to vector<48x32xf32>
    %6 = arith.addf %3, %5 : vector<48x32xf32>
    %7 = vector.shape_cast %6 : vector<48x32xf32> to vector<2x24x32xf32>
    %8 = tpu.iota {dimensions = array<i32: 1>} : vector<2x24x32xi32>
    %c0_i32 = arith.constant 0 : i32
    %9 = vector.broadcast %c0_i32 : i32 to vector<2x24x32xi32>
    %10 = arith.cmpi eq, %8, %9 : vector<2x24x32xi32>
    %c0_6 = arith.constant 0 : index
    %c0_7 = arith.constant 0 : index
    %11 = vector.load %arg3[%c0_6, %c0_7] : memref<1x32xf32, #tpu.memory_space<vmem>>, vector<1x32xf32>
    %12 = vector.shape_cast %11 : vector<1x32xf32> to vector<1x1x32xf32>
    %13 = vector.shape_cast %12 : vector<1x1x32xf32> to vector<1x1x32xf32>
    %14 = vector.broadcast %13 : vector<1x1x32xf32> to vector<2x24x32xf32>
    %15 = arith.select %10, %14, %7 : vector<2x24x32xi1>, vector<2x24x32xf32>
    %c0_8 = arith.constant 0 : index
    %c0_9 = arith.constant 0 : index
    %16 = vector.load %arg4[%c0_8, %c0_9] : memref<24x32xf32, #tpu.memory_space<vmem>>, vector<24x32xf32>
    %17 = vector.shape_cast %16 : vector<24x32xf32> to vector<1x24x32xf32>
    %18 = vector.broadcast %17 : vector<1x24x32xf32> to vector<2x24x32xf32>
    %19 = arith.addf %15, %18 : vector<2x24x32xf32>
    %20 = vector.shape_cast %19 : vector<2x24x32xf32> to vector<48x32xf32>
    %21 = tpu.iota {dimensions = array<i32: 1>} : vector<24x24xi32>
    %c17_i32 = arith.constant 17 : i32
    %22 = vector.broadcast %c17_i32 : i32 to vector<24x24xi32>
    %23 = arith.cmpi slt, %21, %22 : vector<24x24xi32>
    %cst_10 = arith.constant 0.000000e+00 : f32
    %cst_11 = arith.constant -1.000000e+30 : f32
    %24 = vector.broadcast %cst_10 : f32 to vector<24x24xf32>
    %25 = vector.broadcast %cst_11 : f32 to vector<24x24xf32>
    %26 = arith.select %23, %24, %25 : vector<24x24xi1>, vector<24x24xf32>
    %27 = vector.shape_cast %26 : vector<24x24xf32> to vector<1x24x24xf32>
    %c0_12 = arith.constant 0 : index
    %c0_13 = arith.constant 0 : index
    %28 = vector.load %arg5[%c0_12, %c0_13] : memref<1x32xf32, #tpu.memory_space<vmem>>, vector<1x32xf32>
    %c0_14 = arith.constant 0 : index
    %c0_15 = arith.constant 0 : index
    %29 = vector.load %arg6[%c0_14, %c0_15] : memref<1x32xf32, #tpu.memory_space<vmem>>, vector<1x32xf32>
    %cst_16 = arith.constant dense<0.000000e+00> : vector<48xf32>
    %30 = vector.multi_reduction <add>, %20, %cst_16 [1] : vector<48x32xf32> to vector<48xf32>
    %31 = vector.shape_cast %30 : vector<48xf32> to vector<48x1xf32>
    %cst_17 = arith.constant 3.200000e+01 : f32
    %32 = vector.broadcast %cst_17 : f32 to vector<48x1xf32>
    %33 = arith.divf %31, %32 : vector<48x1xf32>
    %34 = vector.broadcast %33 : vector<48x1xf32> to vector<48x32xf32>
    %35 = arith.subf %20, %34 : vector<48x32xf32>
    %36 = arith.mulf %35, %35 : vector<48x32xf32>
    %cst_18 = arith.constant dense<0.000000e+00> : vector<48xf32>
    %37 = vector.multi_reduction <add>, %36, %cst_18 [1] : vector<48x32xf32> to vector<48xf32>
    %38 = vector.shape_cast %37 : vector<48xf32> to vector<48x1xf32>
    %cst_19 = arith.constant 3.200000e+01 : f32
    %39 = vector.broadcast %cst_19 : f32 to vector<48x1xf32>
    %40 = arith.divf %38, %39 : vector<48x1xf32>
    %41 = vector.broadcast %33 : vector<48x1xf32> to vector<48x32xf32>
    %42 = arith.subf %20, %41 : vector<48x32xf32>
    %cst_20 = arith.constant 9.99999996E-13 : f32
    %43 = vector.broadcast %cst_20 : f32 to vector<48x1xf32>
    %44 = arith.addf %40, %43 : vector<48x1xf32>
    %45 = math.rsqrt %44 : vector<48x1xf32>
    %46 = vector.broadcast %45 : vector<48x1xf32> to vector<48x32xf32>
    %47 = arith.mulf %42, %46 : vector<48x32xf32>
    %48 = vector.broadcast %28 : vector<1x32xf32> to vector<48x32xf32>
    %49 = arith.mulf %47, %48 : vector<48x32xf32>
    %50 = vector.broadcast %29 : vector<1x32xf32> to vector<48x32xf32>
    %51 = arith.addf %49, %50 : vector<48x32xf32>
    %c0_21 = arith.constant 0 : index
    %c0_22 = arith.constant 0 : index
    %52 = vector.load %arg7[%c0_21, %c0_22] : memref<32x32xf32, #tpu.memory_space<vmem>>, vector<32x32xf32>
    %cst_23 = arith.constant dense<0.000000e+00> : vector<48x32xf32>
    %53 = tpu.matmul %51, %52, %cst_23 {dimension_numbers = #tpu.dot_dimension_numbers<[1], [0], [0], [1], [0, 0, 1, 1], [], []>} : vector<48x32xf32>, vector<32x32xf32>, vector<48x32xf32> -> vector<48x32xf32>
    %c0_24 = arith.constant 0 : index
    %c0_25 = arith.constant 0 : index
    %54 = vector.load %arg8[%c0_24, %c0_25] : memref<1x32xf32, #tpu.memory_space<vmem>>, vector<1x32xf32>
    %55 = vector.broadcast %54 : vector<1x32xf32> to vector<48x32xf32>
    %56 = arith.addf %53, %55 : vector<48x32xf32>
    %cst_26 = arith.constant 0.353553385 : f32
    %57 = vector.broadcast %cst_26 : f32 to vector<48x32xf32>
    %58 = arith.mulf %56, %57 : vector<48x32xf32>
    %c0_27 = arith.constant 0 : index
    %c0_28 = arith.constant 0 : index
    %59 = vector.load %arg9[%c0_27, %c0_28] : memref<32x32xf32, #tpu.memory_space<vmem>>, vector<32x32xf32>
    %cst_29 = arith.constant dense<0.000000e+00> : vector<48x32xf32>
    %60 = tpu.matmul %51, %59, %cst_29 {dimension_numbers = #tpu.dot_dimension_numbers<[1], [0], [0], [1], [0, 0, 1, 1], [], []>} : vector<48x32xf32>, vector<32x32xf32>, vector<48x32xf32> -> vector<48x32xf32>
    %c0_30 = arith.constant 0 : index
    %c0_31 = arith.constant 0 : index
    %61 = vector.load %arg10[%c0_30, %c0_31] : memref<1x32xf32, #tpu.memory_space<vmem>>, vector<1x32xf32>
    %62 = vector.broadcast %61 : vector<1x32xf32> to vector<48x32xf32>
    %63 = arith.addf %60, %62 : vector<48x32xf32>
    %c0_32 = arith.constant 0 : index
    %c0_33 = arith.constant 0 : index
    %64 = vector.load %arg11[%c0_32, %c0_33] : memref<32x32xf32, #tpu.memory_space<vmem>>, vector<32x32xf32>
    %cst_34 = arith.constant dense<0.000000e+00> : vector<48x32xf32>
    %65 = tpu.matmul %51, %64, %cst_34 {dimension_numbers = #tpu.dot_dimension_numbers<[1], [0], [0], [1], [0, 0, 1, 1], [], []>} : vector<48x32xf32>, vector<32x32xf32>, vector<48x32xf32> -> vector<48x32xf32>
    %c0_35 = arith.constant 0 : index
    %c0_36 = arith.constant 0 : index
    %66 = vector.load %arg12[%c0_35, %c0_36] : memref<1x32xf32, #tpu.memory_space<vmem>>, vector<1x32xf32>
    %67 = vector.broadcast %66 : vector<1x32xf32> to vector<48x32xf32>
    %68 = arith.addf %65, %67 : vector<48x32xf32>
    %69 = vector.shape_cast %58 : vector<48x32xf32> to vector<2x24x32xf32>
    %70 = vector.shape_cast %63 : vector<48x32xf32> to vector<2x24x32xf32>
    %71 = vector.shape_cast %68 : vector<48x32xf32> to vector<2x24x32xf32>
    %c0_37 = arith.constant 0 : index
    %c0_38 = arith.constant 0 : index
    %72 = vector.load %arg13[%c0_37, %c0_38] : memref<32x32xf32, #tpu.memory_space<vmem>>, vector<32x32xf32>
    %cst_39 = arith.constant 0.000000e+00 : f32
    %73 = vector.broadcast %cst_39 : f32 to vector<48x32xf32>
    %74 = vector.extract_strided_slice %69 {offsets = [0, 0, 0], sizes = [2, 24, 8], strides = [1, 1, 1]} : vector<2x24x32xf32> to vector<2x24x8xf32>
    %75 = vector.extract_strided_slice %70 {offsets = [0, 0, 0], sizes = [2, 24, 8], strides = [1, 1, 1]} : vector<2x24x32xf32> to vector<2x24x8xf32>
    "tpu.trace_start"() <{level = 10 : i32, message = "bqd,bkd->bqk"}> : () -> ()
    %cst_40 = arith.constant dense<0.000000e+00> : vector<2x24x24xf32>
    %76 = tpu.matmul %74, %75, %cst_40 {dimension_numbers = #tpu.dot_dimension_numbers<[2], [2], [1], [1], [0, 0, 0, 1, 1, 1], [0], [0]>} : vector<2x24x8xf32>, vector<2x24x8xf32>, vector<2x24x24xf32> -> vector<2x24x24xf32>
    "tpu.trace_stop"() : () -> ()
    %77 = vector.broadcast %27 : vector<1x24x24xf32> to vector<2x24x24xf32>
    %78 = arith.addf %76, %77 : vector<2x24x24xf32>
    %cst_41 = arith.constant dense<0xFF800000> : vector<2x24xf32>
    %79 = vector.multi_reduction <maximumf>, %78, %cst_41 [2] : vector<2x24x24xf32> to vector<2x24xf32>
    %cst_42 = arith.constant 0xFF800000 : f32
    %80 = vector.broadcast %cst_42 : f32 to vector<2x24xf32>
    %81 = arith.maximumf %80, %79 : vector<2x24xf32>
    %82 = vector.shape_cast %81 : vector<2x24xf32> to vector<2x24x1xf32>
    %83 = vector.broadcast %82 : vector<2x24x1xf32> to vector<2x24x24xf32>
    %84 = arith.subf %78, %83 : vector<2x24x24xf32>
    %85 = math.exp %84 : vector<2x24x24xf32>
    %cst_43 = arith.constant dense<0.000000e+00> : vector<2x24xf32>
    %86 = vector.multi_reduction <add>, %85, %cst_43 [2] : vector<2x24x24xf32> to vector<2x24xf32>
    %87 = vector.shape_cast %86 : vector<2x24xf32> to vector<2x24x1xf32>
    %88 = vector.broadcast %87 : vector<2x24x1xf32> to vector<2x24x24xf32>
    %89 = arith.divf %85, %88 : vector<2x24x24xf32>
    %90 = vector.extract_strided_slice %71 {offsets = [0, 0, 0], sizes = [2, 24, 8], strides = [1, 1, 1]} : vector<2x24x32xf32> to vector<2x24x8xf32>
    "tpu.trace_start"() <{level = 10 : i32, message = "bqk,bkd->bqd"}> : () -> ()
    %cst_44 = arith.constant dense<0.000000e+00> : vector<2x24x8xf32>
    %91 = tpu.matmul %89, %90, %cst_44 {dimension_numbers = #tpu.dot_dimension_numbers<[2], [1], [1], [2], [0, 0, 0, 1, 1, 2], [0], [0]>} : vector<2x24x24xf32>, vector<2x24x8xf32>, vector<2x24x8xf32> -> vector<2x24x8xf32>
    "tpu.trace_stop"() : () -> ()
    %92 = vector.shape_cast %91 : vector<2x24x8xf32> to vector<48x8xf32>
    %93 = vector.extract_strided_slice %72 {offsets = [0, 0], sizes = [8, 32], strides = [1, 1]} : vector<32x32xf32> to vector<8x32xf32>
    %cst_45 = arith.constant dense<0.000000e+00> : vector<48x32xf32>
    %94 = tpu.matmul %92, %93, %cst_45 {dimension_numbers = #tpu.dot_dimension_numbers<[1], [0], [0], [1], [0, 0, 1, 1], [], []>} : vector<48x8xf32>, vector<8x32xf32>, vector<48x32xf32> -> vector<48x32xf32>
    %95 = arith.addf %73, %94 : vector<48x32xf32>
    %96 = vector.extract_strided_slice %69 {offsets = [0, 0, 8], sizes = [2, 24, 8], strides = [1, 1, 1]} : vector<2x24x32xf32> to vector<2x24x8xf32>
    %97 = vector.extract_strided_slice %70 {offsets = [0, 0, 8], sizes = [2, 24, 8], strides = [1, 1, 1]} : vector<2x24x32xf32> to vector<2x24x8xf32>
    "tpu.trace_start"() <{level = 10 : i32, message = "bqd,bkd->bqk"}> : () -> ()
    %cst_46 = arith.constant dense<0.000000e+00> : vector<2x24x24xf32>
    %98 = tpu.matmul %96, %97, %cst_46 {dimension_numbers = #tpu.dot_dimension_numbers<[2], [2], [1], [1], [0, 0, 0, 1, 1, 1], [0], [0]>} : vector<2x24x8xf32>, vector<2x24x8xf32>, vector<2x24x24xf32> -> vector<2x24x24xf32>
    "tpu.trace_stop"() : () -> ()
    %99 = vector.broadcast %27 : vector<1x24x24xf32> to vector<2x24x24xf32>
    %100 = arith.addf %98, %99 : vector<2x24x24xf32>
    %cst_47 = arith.constant dense<0xFF800000> : vector<2x24xf32>
    %101 = vector.multi_reduction <maximumf>, %100, %cst_47 [2] : vector<2x24x24xf32> to vector<2x24xf32>
    %cst_48 = arith.constant 0xFF800000 : f32
    %102 = vector.broadcast %cst_48 : f32 to vector<2x24xf32>
    %103 = arith.maximumf %102, %101 : vector<2x24xf32>
    %104 = vector.shape_cast %103 : vector<2x24xf32> to vector<2x24x1xf32>
    %105 = vector.broadcast %104 : vector<2x24x1xf32> to vector<2x24x24xf32>
    %106 = arith.subf %100, %105 : vector<2x24x24xf32>
    %107 = math.exp %106 : vector<2x24x24xf32>
    %cst_49 = arith.constant dense<0.000000e+00> : vector<2x24xf32>
    %108 = vector.multi_reduction <add>, %107, %cst_49 [2] : vector<2x24x24xf32> to vector<2x24xf32>
    %109 = vector.shape_cast %108 : vector<2x24xf32> to vector<2x24x1xf32>
    %110 = vector.broadcast %109 : vector<2x24x1xf32> to vector<2x24x24xf32>
    %111 = arith.divf %107, %110 : vector<2x24x24xf32>
    %112 = vector.extract_strided_slice %71 {offsets = [0, 0, 8], sizes = [2, 24, 8], strides = [1, 1, 1]} : vector<2x24x32xf32> to vector<2x24x8xf32>
    "tpu.trace_start"() <{level = 10 : i32, message = "bqk,bkd->bqd"}> : () -> ()
    %cst_50 = arith.constant dense<0.000000e+00> : vector<2x24x8xf32>
    %113 = tpu.matmul %111, %112, %cst_50 {dimension_numbers = #tpu.dot_dimension_numbers<[2], [1], [1], [2], [0, 0, 0, 1, 1, 2], [0], [0]>} : vector<2x24x24xf32>, vector<2x24x8xf32>, vector<2x24x8xf32> -> vector<2x24x8xf32>
    "tpu.trace_stop"() : () -> ()
    %114 = vector.shape_cast %113 : vector<2x24x8xf32> to vector<48x8xf32>
    %115 = vector.extract_strided_slice %72 {offsets = [8, 0], sizes = [8, 32], strides = [1, 1]} : vector<32x32xf32> to vector<8x32xf32>
    %cst_51 = arith.constant dense<0.000000e+00> : vector<48x32xf32>
    %116 = tpu.matmul %114, %115, %cst_51 {dimension_numbers = #tpu.dot_dimension_numbers<[1], [0], [0], [1], [0, 0, 1, 1], [], []>} : vector<48x8xf32>, vector<8x32xf32>, vector<48x32xf32> -> vector<48x32xf32>
    %117 = arith.addf %95, %116 : vector<48x32xf32>
    %118 = vector.extract_strided_slice %69 {offsets = [0, 0, 16], sizes = [2, 24, 8], strides = [1, 1, 1]} : vector<2x24x32xf32> to vector<2x24x8xf32>
    %119 = vector.extract_strided_slice %70 {offsets = [0, 0, 16], sizes = [2, 24, 8], strides = [1, 1, 1]} : vector<2x24x32xf32> to vector<2x24x8xf32>
    "tpu.trace_start"() <{level = 10 : i32, message = "bqd,bkd->bqk"}> : () -> ()
    %cst_52 = arith.constant dense<0.000000e+00> : vector<2x24x24xf32>
    %120 = tpu.matmul %118, %119, %cst_52 {dimension_numbers = #tpu.dot_dimension_numbers<[2], [2], [1], [1], [0, 0, 0, 1, 1, 1], [0], [0]>} : vector<2x24x8xf32>, vector<2x24x8xf32>, vector<2x24x24xf32> -> vector<2x24x24xf32>
    "tpu.trace_stop"() : () -> ()
    %121 = vector.broadcast %27 : vector<1x24x24xf32> to vector<2x24x24xf32>
    %122 = arith.addf %120, %121 : vector<2x24x24xf32>
    %cst_53 = arith.constant dense<0xFF800000> : vector<2x24xf32>
    %123 = vector.multi_reduction <maximumf>, %122, %cst_53 [2] : vector<2x24x24xf32> to vector<2x24xf32>
    %cst_54 = arith.constant 0xFF800000 : f32
    %124 = vector.broadcast %cst_54 : f32 to vector<2x24xf32>
    %125 = arith.maximumf %124, %123 : vector<2x24xf32>
    %126 = vector.shape_cast %125 : vector<2x24xf32> to vector<2x24x1xf32>
    %127 = vector.broadcast %126 : vector<2x24x1xf32> to vector<2x24x24xf32>
    %128 = arith.subf %122, %127 : vector<2x24x24xf32>
    %129 = math.exp %128 : vector<2x24x24xf32>
    %cst_55 = arith.constant dense<0.000000e+00> : vector<2x24xf32>
    %130 = vector.multi_reduction <add>, %129, %cst_55 [2] : vector<2x24x24xf32> to vector<2x24xf32>
    %131 = vector.shape_cast %130 : vector<2x24xf32> to vector<2x24x1xf32>
    %132 = vector.broadcast %131 : vector<2x24x1xf32> to vector<2x24x24xf32>
    %133 = arith.divf %129, %132 : vector<2x24x24xf32>
    %134 = vector.extract_strided_slice %71 {offsets = [0, 0, 16], sizes = [2, 24, 8], strides = [1, 1, 1]} : vector<2x24x32xf32> to vector<2x24x8xf32>
    "tpu.trace_start"() <{level = 10 : i32, message = "bqk,bkd->bqd"}> : () -> ()
    %cst_56 = arith.constant dense<0.000000e+00> : vector<2x24x8xf32>
    %135 = tpu.matmul %133, %134, %cst_56 {dimension_numbers = #tpu.dot_dimension_numbers<[2], [1], [1], [2], [0, 0, 0, 1, 1, 2], [0], [0]>} : vector<2x24x24xf32>, vector<2x24x8xf32>, vector<2x24x8xf32> -> vector<2x24x8xf32>
    "tpu.trace_stop"() : () -> ()
    %136 = vector.shape_cast %135 : vector<2x24x8xf32> to vector<48x8xf32>
    %137 = vector.extract_strided_slice %72 {offsets = [16, 0], sizes = [8, 32], strides = [1, 1]} : vector<32x32xf32> to vector<8x32xf32>
    %cst_57 = arith.constant dense<0.000000e+00> : vector<48x32xf32>
    %138 = tpu.matmul %136, %137, %cst_57 {dimension_numbers = #tpu.dot_dimension_numbers<[1], [0], [0], [1], [0, 0, 1, 1], [], []>} : vector<48x8xf32>, vector<8x32xf32>, vector<48x32xf32> -> vector<48x32xf32>
    %139 = arith.addf %117, %138 : vector<48x32xf32>
    %140 = vector.extract_strided_slice %69 {offsets = [0, 0, 24], sizes = [2, 24, 8], strides = [1, 1, 1]} : vector<2x24x32xf32> to vector<2x24x8xf32>
    %141 = vector.extract_strided_slice %70 {offsets = [0, 0, 24], sizes = [2, 24, 8], strides = [1, 1, 1]} : vector<2x24x32xf32> to vector<2x24x8xf32>
    "tpu.trace_start"() <{level = 10 : i32, message = "bqd,bkd->bqk"}> : () -> ()
    %cst_58 = arith.constant dense<0.000000e+00> : vector<2x24x24xf32>
    %142 = tpu.matmul %140, %141, %cst_58 {dimension_numbers = #tpu.dot_dimension_numbers<[2], [2], [1], [1], [0, 0, 0, 1, 1, 1], [0], [0]>} : vector<2x24x8xf32>, vector<2x24x8xf32>, vector<2x24x24xf32> -> vector<2x24x24xf32>
    "tpu.trace_stop"() : () -> ()
    %143 = vector.broadcast %27 : vector<1x24x24xf32> to vector<2x24x24xf32>
    %144 = arith.addf %142, %143 : vector<2x24x24xf32>
    %cst_59 = arith.constant dense<0xFF800000> : vector<2x24xf32>
    %145 = vector.multi_reduction <maximumf>, %144, %cst_59 [2] : vector<2x24x24xf32> to vector<2x24xf32>
    %cst_60 = arith.constant 0xFF800000 : f32
    %146 = vector.broadcast %cst_60 : f32 to vector<2x24xf32>
    %147 = arith.maximumf %146, %145 : vector<2x24xf32>
    %148 = vector.shape_cast %147 : vector<2x24xf32> to vector<2x24x1xf32>
    %149 = vector.broadcast %148 : vector<2x24x1xf32> to vector<2x24x24xf32>
    %150 = arith.subf %144, %149 : vector<2x24x24xf32>
    %151 = math.exp %150 : vector<2x24x24xf32>
    %cst_61 = arith.constant dense<0.000000e+00> : vector<2x24xf32>
    %152 = vector.multi_reduction <add>, %151, %cst_61 [2] : vector<2x24x24xf32> to vector<2x24xf32>
    %153 = vector.shape_cast %152 : vector<2x24xf32> to vector<2x24x1xf32>
    %154 = vector.broadcast %153 : vector<2x24x1xf32> to vector<2x24x24xf32>
    %155 = arith.divf %151, %154 : vector<2x24x24xf32>
    %156 = vector.extract_strided_slice %71 {offsets = [0, 0, 24], sizes = [2, 24, 8], strides = [1, 1, 1]} : vector<2x24x32xf32> to vector<2x24x8xf32>
    "tpu.trace_start"() <{level = 10 : i32, message = "bqk,bkd->bqd"}> : () -> ()
    %cst_62 = arith.constant dense<0.000000e+00> : vector<2x24x8xf32>
    %157 = tpu.matmul %155, %156, %cst_62 {dimension_numbers = #tpu.dot_dimension_numbers<[2], [1], [1], [2], [0, 0, 0, 1, 1, 2], [0], [0]>} : vector<2x24x24xf32>, vector<2x24x8xf32>, vector<2x24x8xf32> -> vector<2x24x8xf32>
    "tpu.trace_stop"() : () -> ()
    %158 = vector.shape_cast %157 : vector<2x24x8xf32> to vector<48x8xf32>
    %159 = vector.extract_strided_slice %72 {offsets = [24, 0], sizes = [8, 32], strides = [1, 1]} : vector<32x32xf32> to vector<8x32xf32>
    %cst_63 = arith.constant dense<0.000000e+00> : vector<48x32xf32>
    %160 = tpu.matmul %158, %159, %cst_63 {dimension_numbers = #tpu.dot_dimension_numbers<[1], [0], [0], [1], [0, 0, 1, 1], [], []>} : vector<48x8xf32>, vector<8x32xf32>, vector<48x32xf32> -> vector<48x32xf32>
    %161 = arith.addf %139, %160 : vector<48x32xf32>
    %c0_64 = arith.constant 0 : index
    %c0_65 = arith.constant 0 : index
    %162 = vector.load %arg14[%c0_64, %c0_65] : memref<1x32xf32, #tpu.memory_space<vmem>>, vector<1x32xf32>
    %163 = vector.broadcast %162 : vector<1x32xf32> to vector<48x32xf32>
    %164 = arith.addf %161, %163 : vector<48x32xf32>
    %165 = arith.addf %164, %20 : vector<48x32xf32>
    %c0_66 = arith.constant 0 : index
    %c0_67 = arith.constant 0 : index
    %166 = vector.load %arg15[%c0_66, %c0_67] : memref<1x32xf32, #tpu.memory_space<vmem>>, vector<1x32xf32>
    %c0_68 = arith.constant 0 : index
    %c0_69 = arith.constant 0 : index
    %167 = vector.load %arg16[%c0_68, %c0_69] : memref<1x32xf32, #tpu.memory_space<vmem>>, vector<1x32xf32>
    %cst_70 = arith.constant dense<0.000000e+00> : vector<48xf32>
    %168 = vector.multi_reduction <add>, %165, %cst_70 [1] : vector<48x32xf32> to vector<48xf32>
    %169 = vector.shape_cast %168 : vector<48xf32> to vector<48x1xf32>
    %cst_71 = arith.constant 3.200000e+01 : f32
    %170 = vector.broadcast %cst_71 : f32 to vector<48x1xf32>
    %171 = arith.divf %169, %170 : vector<48x1xf32>
    %172 = vector.broadcast %171 : vector<48x1xf32> to vector<48x32xf32>
    %173 = arith.subf %165, %172 : vector<48x32xf32>
    %174 = arith.mulf %173, %173 : vector<48x32xf32>
    %cst_72 = arith.constant dense<0.000000e+00> : vector<48xf32>
    %175 = vector.multi_reduction <add>, %174, %cst_72 [1] : vector<48x32xf32> to vector<48xf32>
    %176 = vector.shape_cast %175 : vector<48xf32> to vector<48x1xf32>
    %cst_73 = arith.constant 3.200000e+01 : f32
    %177 = vector.broadcast %cst_73 : f32 to vector<48x1xf32>
    %178 = arith.divf %176, %177 : vector<48x1xf32>
    %179 = vector.broadcast %171 : vector<48x1xf32> to vector<48x32xf32>
    %180 = arith.subf %165, %179 : vector<48x32xf32>
    %cst_74 = arith.constant 9.99999996E-13 : f32
    %181 = vector.broadcast %cst_74 : f32 to vector<48x1xf32>
    %182 = arith.addf %178, %181 : vector<48x1xf32>
    %183 = math.rsqrt %182 : vector<48x1xf32>
    %184 = vector.broadcast %183 : vector<48x1xf32> to vector<48x32xf32>
    %185 = arith.mulf %180, %184 : vector<48x32xf32>
    %186 = vector.broadcast %166 : vector<1x32xf32> to vector<48x32xf32>
    %187 = arith.mulf %185, %186 : vector<48x32xf32>
    %188 = vector.broadcast %167 : vector<1x32xf32> to vector<48x32xf32>
    %189 = arith.addf %187, %188 : vector<48x32xf32>
    %c0_75 = arith.constant 0 : index
    %c0_76 = arith.constant 0 : index
    %190 = vector.load %arg17[%c0_75, %c0_76] : memref<32x64xf32, #tpu.memory_space<vmem>>, vector<32x64xf32>
    %cst_77 = arith.constant dense<0.000000e+00> : vector<48x64xf32>
    %191 = tpu.matmul %189, %190, %cst_77 {dimension_numbers = #tpu.dot_dimension_numbers<[1], [0], [0], [1], [0, 0, 1, 1], [], []>} : vector<48x32xf32>, vector<32x64xf32>, vector<48x64xf32> -> vector<48x64xf32>
    %c0_78 = arith.constant 0 : index
    %c0_79 = arith.constant 0 : index
    %192 = vector.load %arg18[%c0_78, %c0_79] : memref<1x64xf32, #tpu.memory_space<vmem>>, vector<1x64xf32>
    %193 = vector.broadcast %192 : vector<1x64xf32> to vector<48x64xf32>
    %194 = arith.addf %191, %193 : vector<48x64xf32>
    %195 = arith.mulf %194, %194 : vector<48x64xf32>
    %196 = arith.mulf %194, %195 : vector<48x64xf32>
    %cst_80 = arith.constant 4.471500e-02 : f32
    %197 = vector.broadcast %cst_80 : f32 to vector<48x64xf32>
    %198 = arith.mulf %197, %196 : vector<48x64xf32>
    %199 = arith.addf %194, %198 : vector<48x64xf32>
    %cst_81 = arith.constant 0.797884583 : f32
    %200 = vector.broadcast %cst_81 : f32 to vector<48x64xf32>
    %201 = arith.mulf %200, %199 : vector<48x64xf32>
    %202 = math.tanh %201 : vector<48x64xf32>
    %cst_82 = arith.constant 1.000000e+00 : f32
    %203 = vector.broadcast %cst_82 : f32 to vector<48x64xf32>
    %204 = arith.addf %203, %202 : vector<48x64xf32>
    %cst_83 = arith.constant 5.000000e-01 : f32
    %205 = vector.broadcast %cst_83 : f32 to vector<48x64xf32>
    %206 = arith.mulf %205, %204 : vector<48x64xf32>
    %207 = arith.mulf %194, %206 : vector<48x64xf32>
    %c0_84 = arith.constant 0 : index
    %c0_85 = arith.constant 0 : index
    %208 = vector.load %arg19[%c0_84, %c0_85] : memref<64x32xf32, #tpu.memory_space<vmem>>, vector<64x32xf32>
    %cst_86 = arith.constant dense<0.000000e+00> : vector<48x32xf32>
    %209 = tpu.matmul %207, %208, %cst_86 {dimension_numbers = #tpu.dot_dimension_numbers<[1], [0], [0], [1], [0, 0, 1, 1], [], []>} : vector<48x64xf32>, vector<64x32xf32>, vector<48x32xf32> -> vector<48x32xf32>
    %c0_87 = arith.constant 0 : index
    %c0_88 = arith.constant 0 : index
    %210 = vector.load %arg20[%c0_87, %c0_88] : memref<1x32xf32, #tpu.memory_space<vmem>>, vector<1x32xf32>
    %211 = vector.broadcast %210 : vector<1x32xf32> to vector<48x32xf32>
    %212 = arith.addf %209, %211 : vector<48x32xf32>
    %213 = arith.addf %212, %165 : vector<48x32xf32>
    %c0_89 = arith.constant 0 : index
    %c0_90 = arith.constant 0 : index
    %214 = vector.load %arg21[%c0_89, %c0_90] : memref<1x32xf32, #tpu.memory_space<vmem>>, vector<1x32xf32>
    %c0_91 = arith.constant 0 : index
    %c0_92 = arith.constant 0 : index
    %215 = vector.load %arg22[%c0_91, %c0_92] : memref<1x32xf32, #tpu.memory_space<vmem>>, vector<1x32xf32>
    %cst_93 = arith.constant dense<0.000000e+00> : vector<48xf32>
    %216 = vector.multi_reduction <add>, %213, %cst_93 [1] : vector<48x32xf32> to vector<48xf32>
    %217 = vector.shape_cast %216 : vector<48xf32> to vector<48x1xf32>
    %cst_94 = arith.constant 3.200000e+01 : f32
    %218 = vector.broadcast %cst_94 : f32 to vector<48x1xf32>
    %219 = arith.divf %217, %218 : vector<48x1xf32>
    %220 = vector.broadcast %219 : vector<48x1xf32> to vector<48x32xf32>
    %221 = arith.subf %213, %220 : vector<48x32xf32>
    %222 = arith.mulf %221, %221 : vector<48x32xf32>
    %cst_95 = arith.constant dense<0.000000e+00> : vector<48xf32>
    %223 = vector.multi_reduction <add>, %222, %cst_95 [1] : vector<48x32xf32> to vector<48xf32>
    %224 = vector.shape_cast %223 : vector<48xf32> to vector<48x1xf32>
    %cst_96 = arith.constant 3.200000e+01 : f32
    %225 = vector.broadcast %cst_96 : f32 to vector<48x1xf32>
    %226 = arith.divf %224, %225 : vector<48x1xf32>
    %227 = vector.broadcast %219 : vector<48x1xf32> to vector<48x32xf32>
    %228 = arith.subf %213, %227 : vector<48x32xf32>
    %cst_97 = arith.constant 9.99999996E-13 : f32
    %229 = vector.broadcast %cst_97 : f32 to vector<48x1xf32>
    %230 = arith.addf %226, %229 : vector<48x1xf32>
    %231 = math.rsqrt %230 : vector<48x1xf32>
    %232 = vector.broadcast %231 : vector<48x1xf32> to vector<48x32xf32>
    %233 = arith.mulf %228, %232 : vector<48x32xf32>
    %234 = vector.broadcast %214 : vector<1x32xf32> to vector<48x32xf32>
    %235 = arith.mulf %233, %234 : vector<48x32xf32>
    %236 = vector.broadcast %215 : vector<1x32xf32> to vector<48x32xf32>
    %237 = arith.addf %235, %236 : vector<48x32xf32>
    %c0_98 = arith.constant 0 : index
    %c0_99 = arith.constant 0 : index
    %238 = vector.load %arg23[%c0_98, %c0_99] : memref<32x32xf32, #tpu.memory_space<vmem>>, vector<32x32xf32>
    %cst_100 = arith.constant dense<0.000000e+00> : vector<48x32xf32>
    %239 = tpu.matmul %237, %238, %cst_100 {dimension_numbers = #tpu.dot_dimension_numbers<[1], [0], [0], [1], [0, 0, 1, 1], [], []>} : vector<48x32xf32>, vector<32x32xf32>, vector<48x32xf32> -> vector<48x32xf32>
    %c0_101 = arith.constant 0 : index
    %c0_102 = arith.constant 0 : index
    %240 = vector.load %arg24[%c0_101, %c0_102] : memref<1x32xf32, #tpu.memory_space<vmem>>, vector<1x32xf32>
    %241 = vector.broadcast %240 : vector<1x32xf32> to vector<48x32xf32>
    %242 = arith.addf %239, %241 : vector<48x32xf32>
    %cst_103 = arith.constant 0.353553385 : f32
    %243 = vector.broadcast %cst_103 : f32 to vector<48x32xf32>
    %244 = arith.mulf %242, %243 : vector<48x32xf32>
    %c0_104 = arith.constant 0 : index
    %c0_105 = arith.constant 0 : index
    %245 = vector.load %arg25[%c0_104, %c0_105] : memref<32x32xf32, #tpu.memory_space<vmem>>, vector<32x32xf32>
    %cst_106 = arith.constant dense<0.000000e+00> : vector<48x32xf32>
    %246 = tpu.matmul %237, %245, %cst_106 {dimension_numbers = #tpu.dot_dimension_numbers<[1], [0], [0], [1], [0, 0, 1, 1], [], []>} : vector<48x32xf32>, vector<32x32xf32>, vector<48x32xf32> -> vector<48x32xf32>
    %c0_107 = arith.constant 0 : index
    %c0_108 = arith.constant 0 : index
    %247 = vector.load %arg26[%c0_107, %c0_108] : memref<1x32xf32, #tpu.memory_space<vmem>>, vector<1x32xf32>
    %248 = vector.broadcast %247 : vector<1x32xf32> to vector<48x32xf32>
    %249 = arith.addf %246, %248 : vector<48x32xf32>
    %c0_109 = arith.constant 0 : index
    %c0_110 = arith.constant 0 : index
    %250 = vector.load %arg27[%c0_109, %c0_110] : memref<32x32xf32, #tpu.memory_space<vmem>>, vector<32x32xf32>
    %cst_111 = arith.constant dense<0.000000e+00> : vector<48x32xf32>
    %251 = tpu.matmul %237, %250, %cst_111 {dimension_numbers = #tpu.dot_dimension_numbers<[1], [0], [0], [1], [0, 0, 1, 1], [], []>} : vector<48x32xf32>, vector<32x32xf32>, vector<48x32xf32> -> vector<48x32xf32>
    %c0_112 = arith.constant 0 : index
    %c0_113 = arith.constant 0 : index
    %252 = vector.load %arg28[%c0_112, %c0_113] : memref<1x32xf32, #tpu.memory_space<vmem>>, vector<1x32xf32>
    %253 = vector.broadcast %252 : vector<1x32xf32> to vector<48x32xf32>
    %254 = arith.addf %251, %253 : vector<48x32xf32>
    %255 = vector.shape_cast %244 : vector<48x32xf32> to vector<2x24x32xf32>
    %256 = vector.shape_cast %249 : vector<48x32xf32> to vector<2x24x32xf32>
    %257 = vector.shape_cast %254 : vector<48x32xf32> to vector<2x24x32xf32>
    %c0_114 = arith.constant 0 : index
    %c0_115 = arith.constant 0 : index
    %258 = vector.load %arg29[%c0_114, %c0_115] : memref<32x32xf32, #tpu.memory_space<vmem>>, vector<32x32xf32>
    %cst_116 = arith.constant 0.000000e+00 : f32
    %259 = vector.broadcast %cst_116 : f32 to vector<48x32xf32>
    %260 = vector.extract_strided_slice %255 {offsets = [0, 0, 0], sizes = [2, 24, 8], strides = [1, 1, 1]} : vector<2x24x32xf32> to vector<2x24x8xf32>
    %261 = vector.extract_strided_slice %256 {offsets = [0, 0, 0], sizes = [2, 24, 8], strides = [1, 1, 1]} : vector<2x24x32xf32> to vector<2x24x8xf32>
    "tpu.trace_start"() <{level = 10 : i32, message = "bqd,bkd->bqk"}> : () -> ()
    %cst_117 = arith.constant dense<0.000000e+00> : vector<2x24x24xf32>
    %262 = tpu.matmul %260, %261, %cst_117 {dimension_numbers = #tpu.dot_dimension_numbers<[2], [2], [1], [1], [0, 0, 0, 1, 1, 1], [0], [0]>} : vector<2x24x8xf32>, vector<2x24x8xf32>, vector<2x24x24xf32> -> vector<2x24x24xf32>
    "tpu.trace_stop"() : () -> ()
    %263 = vector.broadcast %27 : vector<1x24x24xf32> to vector<2x24x24xf32>
    %264 = arith.addf %262, %263 : vector<2x24x24xf32>
    %cst_118 = arith.constant dense<0xFF800000> : vector<2x24xf32>
    %265 = vector.multi_reduction <maximumf>, %264, %cst_118 [2] : vector<2x24x24xf32> to vector<2x24xf32>
    %cst_119 = arith.constant 0xFF800000 : f32
    %266 = vector.broadcast %cst_119 : f32 to vector<2x24xf32>
    %267 = arith.maximumf %266, %265 : vector<2x24xf32>
    %268 = vector.shape_cast %267 : vector<2x24xf32> to vector<2x24x1xf32>
    %269 = vector.broadcast %268 : vector<2x24x1xf32> to vector<2x24x24xf32>
    %270 = arith.subf %264, %269 : vector<2x24x24xf32>
    %271 = math.exp %270 : vector<2x24x24xf32>
    %cst_120 = arith.constant dense<0.000000e+00> : vector<2x24xf32>
    %272 = vector.multi_reduction <add>, %271, %cst_120 [2] : vector<2x24x24xf32> to vector<2x24xf32>
    %273 = vector.shape_cast %272 : vector<2x24xf32> to vector<2x24x1xf32>
    %274 = vector.broadcast %273 : vector<2x24x1xf32> to vector<2x24x24xf32>
    %275 = arith.divf %271, %274 : vector<2x24x24xf32>
    %276 = vector.extract_strided_slice %257 {offsets = [0, 0, 0], sizes = [2, 24, 8], strides = [1, 1, 1]} : vector<2x24x32xf32> to vector<2x24x8xf32>
    "tpu.trace_start"() <{level = 10 : i32, message = "bqk,bkd->bqd"}> : () -> ()
    %cst_121 = arith.constant dense<0.000000e+00> : vector<2x24x8xf32>
    %277 = tpu.matmul %275, %276, %cst_121 {dimension_numbers = #tpu.dot_dimension_numbers<[2], [1], [1], [2], [0, 0, 0, 1, 1, 2], [0], [0]>} : vector<2x24x24xf32>, vector<2x24x8xf32>, vector<2x24x8xf32> -> vector<2x24x8xf32>
    "tpu.trace_stop"() : () -> ()
    %278 = vector.shape_cast %277 : vector<2x24x8xf32> to vector<48x8xf32>
    %279 = vector.extract_strided_slice %258 {offsets = [0, 0], sizes = [8, 32], strides = [1, 1]} : vector<32x32xf32> to vector<8x32xf32>
    %cst_122 = arith.constant dense<0.000000e+00> : vector<48x32xf32>
    %280 = tpu.matmul %278, %279, %cst_122 {dimension_numbers = #tpu.dot_dimension_numbers<[1], [0], [0], [1], [0, 0, 1, 1], [], []>} : vector<48x8xf32>, vector<8x32xf32>, vector<48x32xf32> -> vector<48x32xf32>
    %281 = arith.addf %259, %280 : vector<48x32xf32>
    %282 = vector.extract_strided_slice %255 {offsets = [0, 0, 8], sizes = [2, 24, 8], strides = [1, 1, 1]} : vector<2x24x32xf32> to vector<2x24x8xf32>
    %283 = vector.extract_strided_slice %256 {offsets = [0, 0, 8], sizes = [2, 24, 8], strides = [1, 1, 1]} : vector<2x24x32xf32> to vector<2x24x8xf32>
    "tpu.trace_start"() <{level = 10 : i32, message = "bqd,bkd->bqk"}> : () -> ()
    %cst_123 = arith.constant dense<0.000000e+00> : vector<2x24x24xf32>
    %284 = tpu.matmul %282, %283, %cst_123 {dimension_numbers = #tpu.dot_dimension_numbers<[2], [2], [1], [1], [0, 0, 0, 1, 1, 1], [0], [0]>} : vector<2x24x8xf32>, vector<2x24x8xf32>, vector<2x24x24xf32> -> vector<2x24x24xf32>
    "tpu.trace_stop"() : () -> ()
    %285 = vector.broadcast %27 : vector<1x24x24xf32> to vector<2x24x24xf32>
    %286 = arith.addf %284, %285 : vector<2x24x24xf32>
    %cst_124 = arith.constant dense<0xFF800000> : vector<2x24xf32>
    %287 = vector.multi_reduction <maximumf>, %286, %cst_124 [2] : vector<2x24x24xf32> to vector<2x24xf32>
    %cst_125 = arith.constant 0xFF800000 : f32
    %288 = vector.broadcast %cst_125 : f32 to vector<2x24xf32>
    %289 = arith.maximumf %288, %287 : vector<2x24xf32>
    %290 = vector.shape_cast %289 : vector<2x24xf32> to vector<2x24x1xf32>
    %291 = vector.broadcast %290 : vector<2x24x1xf32> to vector<2x24x24xf32>
    %292 = arith.subf %286, %291 : vector<2x24x24xf32>
    %293 = math.exp %292 : vector<2x24x24xf32>
    %cst_126 = arith.constant dense<0.000000e+00> : vector<2x24xf32>
    %294 = vector.multi_reduction <add>, %293, %cst_126 [2] : vector<2x24x24xf32> to vector<2x24xf32>
    %295 = vector.shape_cast %294 : vector<2x24xf32> to vector<2x24x1xf32>
    %296 = vector.broadcast %295 : vector<2x24x1xf32> to vector<2x24x24xf32>
    %297 = arith.divf %293, %296 : vector<2x24x24xf32>
    %298 = vector.extract_strided_slice %257 {offsets = [0, 0, 8], sizes = [2, 24, 8], strides = [1, 1, 1]} : vector<2x24x32xf32> to vector<2x24x8xf32>
    "tpu.trace_start"() <{level = 10 : i32, message = "bqk,bkd->bqd"}> : () -> ()
    %cst_127 = arith.constant dense<0.000000e+00> : vector<2x24x8xf32>
    %299 = tpu.matmul %297, %298, %cst_127 {dimension_numbers = #tpu.dot_dimension_numbers<[2], [1], [1], [2], [0, 0, 0, 1, 1, 2], [0], [0]>} : vector<2x24x24xf32>, vector<2x24x8xf32>, vector<2x24x8xf32> -> vector<2x24x8xf32>
    "tpu.trace_stop"() : () -> ()
    %300 = vector.shape_cast %299 : vector<2x24x8xf32> to vector<48x8xf32>
    %301 = vector.extract_strided_slice %258 {offsets = [8, 0], sizes = [8, 32], strides = [1, 1]} : vector<32x32xf32> to vector<8x32xf32>
    %cst_128 = arith.constant dense<0.000000e+00> : vector<48x32xf32>
    %302 = tpu.matmul %300, %301, %cst_128 {dimension_numbers = #tpu.dot_dimension_numbers<[1], [0], [0], [1], [0, 0, 1, 1], [], []>} : vector<48x8xf32>, vector<8x32xf32>, vector<48x32xf32> -> vector<48x32xf32>
    %303 = arith.addf %281, %302 : vector<48x32xf32>
    %304 = vector.extract_strided_slice %255 {offsets = [0, 0, 16], sizes = [2, 24, 8], strides = [1, 1, 1]} : vector<2x24x32xf32> to vector<2x24x8xf32>
    %305 = vector.extract_strided_slice %256 {offsets = [0, 0, 16], sizes = [2, 24, 8], strides = [1, 1, 1]} : vector<2x24x32xf32> to vector<2x24x8xf32>
    "tpu.trace_start"() <{level = 10 : i32, message = "bqd,bkd->bqk"}> : () -> ()
    %cst_129 = arith.constant dense<0.000000e+00> : vector<2x24x24xf32>
    %306 = tpu.matmul %304, %305, %cst_129 {dimension_numbers = #tpu.dot_dimension_numbers<[2], [2], [1], [1], [0, 0, 0, 1, 1, 1], [0], [0]>} : vector<2x24x8xf32>, vector<2x24x8xf32>, vector<2x24x24xf32> -> vector<2x24x24xf32>
    "tpu.trace_stop"() : () -> ()
    %307 = vector.broadcast %27 : vector<1x24x24xf32> to vector<2x24x24xf32>
    %308 = arith.addf %306, %307 : vector<2x24x24xf32>
    %cst_130 = arith.constant dense<0xFF800000> : vector<2x24xf32>
    %309 = vector.multi_reduction <maximumf>, %308, %cst_130 [2] : vector<2x24x24xf32> to vector<2x24xf32>
    %cst_131 = arith.constant 0xFF800000 : f32
    %310 = vector.broadcast %cst_131 : f32 to vector<2x24xf32>
    %311 = arith.maximumf %310, %309 : vector<2x24xf32>
    %312 = vector.shape_cast %311 : vector<2x24xf32> to vector<2x24x1xf32>
    %313 = vector.broadcast %312 : vector<2x24x1xf32> to vector<2x24x24xf32>
    %314 = arith.subf %308, %313 : vector<2x24x24xf32>
    %315 = math.exp %314 : vector<2x24x24xf32>
    %cst_132 = arith.constant dense<0.000000e+00> : vector<2x24xf32>
    %316 = vector.multi_reduction <add>, %315, %cst_132 [2] : vector<2x24x24xf32> to vector<2x24xf32>
    %317 = vector.shape_cast %316 : vector<2x24xf32> to vector<2x24x1xf32>
    %318 = vector.broadcast %317 : vector<2x24x1xf32> to vector<2x24x24xf32>
    %319 = arith.divf %315, %318 : vector<2x24x24xf32>
    %320 = vector.extract_strided_slice %257 {offsets = [0, 0, 16], sizes = [2, 24, 8], strides = [1, 1, 1]} : vector<2x24x32xf32> to vector<2x24x8xf32>
    "tpu.trace_start"() <{level = 10 : i32, message = "bqk,bkd->bqd"}> : () -> ()
    %cst_133 = arith.constant dense<0.000000e+00> : vector<2x24x8xf32>
    %321 = tpu.matmul %319, %320, %cst_133 {dimension_numbers = #tpu.dot_dimension_numbers<[2], [1], [1], [2], [0, 0, 0, 1, 1, 2], [0], [0]>} : vector<2x24x24xf32>, vector<2x24x8xf32>, vector<2x24x8xf32> -> vector<2x24x8xf32>
    "tpu.trace_stop"() : () -> ()
    %322 = vector.shape_cast %321 : vector<2x24x8xf32> to vector<48x8xf32>
    %323 = vector.extract_strided_slice %258 {offsets = [16, 0], sizes = [8, 32], strides = [1, 1]} : vector<32x32xf32> to vector<8x32xf32>
    %cst_134 = arith.constant dense<0.000000e+00> : vector<48x32xf32>
    %324 = tpu.matmul %322, %323, %cst_134 {dimension_numbers = #tpu.dot_dimension_numbers<[1], [0], [0], [1], [0, 0, 1, 1], [], []>} : vector<48x8xf32>, vector<8x32xf32>, vector<48x32xf32> -> vector<48x32xf32>
    %325 = arith.addf %303, %324 : vector<48x32xf32>
    %326 = vector.extract_strided_slice %255 {offsets = [0, 0, 24], sizes = [2, 24, 8], strides = [1, 1, 1]} : vector<2x24x32xf32> to vector<2x24x8xf32>
    %327 = vector.extract_strided_slice %256 {offsets = [0, 0, 24], sizes = [2, 24, 8], strides = [1, 1, 1]} : vector<2x24x32xf32> to vector<2x24x8xf32>
    "tpu.trace_start"() <{level = 10 : i32, message = "bqd,bkd->bqk"}> : () -> ()
    %cst_135 = arith.constant dense<0.000000e+00> : vector<2x24x24xf32>
    %328 = tpu.matmul %326, %327, %cst_135 {dimension_numbers = #tpu.dot_dimension_numbers<[2], [2], [1], [1], [0, 0, 0, 1, 1, 1], [0], [0]>} : vector<2x24x8xf32>, vector<2x24x8xf32>, vector<2x24x24xf32> -> vector<2x24x24xf32>
    "tpu.trace_stop"() : () -> ()
    %329 = vector.broadcast %27 : vector<1x24x24xf32> to vector<2x24x24xf32>
    %330 = arith.addf %328, %329 : vector<2x24x24xf32>
    %cst_136 = arith.constant dense<0xFF800000> : vector<2x24xf32>
    %331 = vector.multi_reduction <maximumf>, %330, %cst_136 [2] : vector<2x24x24xf32> to vector<2x24xf32>
    %cst_137 = arith.constant 0xFF800000 : f32
    %332 = vector.broadcast %cst_137 : f32 to vector<2x24xf32>
    %333 = arith.maximumf %332, %331 : vector<2x24xf32>
    %334 = vector.shape_cast %333 : vector<2x24xf32> to vector<2x24x1xf32>
    %335 = vector.broadcast %334 : vector<2x24x1xf32> to vector<2x24x24xf32>
    %336 = arith.subf %330, %335 : vector<2x24x24xf32>
    %337 = math.exp %336 : vector<2x24x24xf32>
    %cst_138 = arith.constant dense<0.000000e+00> : vector<2x24xf32>
    %338 = vector.multi_reduction <add>, %337, %cst_138 [2] : vector<2x24x24xf32> to vector<2x24xf32>
    %339 = vector.shape_cast %338 : vector<2x24xf32> to vector<2x24x1xf32>
    %340 = vector.broadcast %339 : vector<2x24x1xf32> to vector<2x24x24xf32>
    %341 = arith.divf %337, %340 : vector<2x24x24xf32>
    %342 = vector.extract_strided_slice %257 {offsets = [0, 0, 24], sizes = [2, 24, 8], strides = [1, 1, 1]} : vector<2x24x32xf32> to vector<2x24x8xf32>
    "tpu.trace_start"() <{level = 10 : i32, message = "bqk,bkd->bqd"}> : () -> ()
    %cst_139 = arith.constant dense<0.000000e+00> : vector<2x24x8xf32>
    %343 = tpu.matmul %341, %342, %cst_139 {dimension_numbers = #tpu.dot_dimension_numbers<[2], [1], [1], [2], [0, 0, 0, 1, 1, 2], [0], [0]>} : vector<2x24x24xf32>, vector<2x24x8xf32>, vector<2x24x8xf32> -> vector<2x24x8xf32>
    "tpu.trace_stop"() : () -> ()
    %344 = vector.shape_cast %343 : vector<2x24x8xf32> to vector<48x8xf32>
    %345 = vector.extract_strided_slice %258 {offsets = [24, 0], sizes = [8, 32], strides = [1, 1]} : vector<32x32xf32> to vector<8x32xf32>
    %cst_140 = arith.constant dense<0.000000e+00> : vector<48x32xf32>
    %346 = tpu.matmul %344, %345, %cst_140 {dimension_numbers = #tpu.dot_dimension_numbers<[1], [0], [0], [1], [0, 0, 1, 1], [], []>} : vector<48x8xf32>, vector<8x32xf32>, vector<48x32xf32> -> vector<48x32xf32>
    %347 = arith.addf %325, %346 : vector<48x32xf32>
    %c0_141 = arith.constant 0 : index
    %c0_142 = arith.constant 0 : index
    %348 = vector.load %arg30[%c0_141, %c0_142] : memref<1x32xf32, #tpu.memory_space<vmem>>, vector<1x32xf32>
    %349 = vector.broadcast %348 : vector<1x32xf32> to vector<48x32xf32>
    %350 = arith.addf %347, %349 : vector<48x32xf32>
    %351 = arith.addf %350, %213 : vector<48x32xf32>
    %c0_143 = arith.constant 0 : index
    %c0_144 = arith.constant 0 : index
    %352 = vector.load %arg31[%c0_143, %c0_144] : memref<1x32xf32, #tpu.memory_space<vmem>>, vector<1x32xf32>
    %c0_145 = arith.constant 0 : index
    %c0_146 = arith.constant 0 : index
    %353 = vector.load %arg32[%c0_145, %c0_146] : memref<1x32xf32, #tpu.memory_space<vmem>>, vector<1x32xf32>
    %cst_147 = arith.constant dense<0.000000e+00> : vector<48xf32>
    %354 = vector.multi_reduction <add>, %351, %cst_147 [1] : vector<48x32xf32> to vector<48xf32>
    %355 = vector.shape_cast %354 : vector<48xf32> to vector<48x1xf32>
    %cst_148 = arith.constant 3.200000e+01 : f32
    %356 = vector.broadcast %cst_148 : f32 to vector<48x1xf32>
    %357 = arith.divf %355, %356 : vector<48x1xf32>
    %358 = vector.broadcast %357 : vector<48x1xf32> to vector<48x32xf32>
    %359 = arith.subf %351, %358 : vector<48x32xf32>
    %360 = arith.mulf %359, %359 : vector<48x32xf32>
    %cst_149 = arith.constant dense<0.000000e+00> : vector<48xf32>
    %361 = vector.multi_reduction <add>, %360, %cst_149 [1] : vector<48x32xf32> to vector<48xf32>
    %362 = vector.shape_cast %361 : vector<48xf32> to vector<48x1xf32>
    %cst_150 = arith.constant 3.200000e+01 : f32
    %363 = vector.broadcast %cst_150 : f32 to vector<48x1xf32>
    %364 = arith.divf %362, %363 : vector<48x1xf32>
    %365 = vector.broadcast %357 : vector<48x1xf32> to vector<48x32xf32>
    %366 = arith.subf %351, %365 : vector<48x32xf32>
    %cst_151 = arith.constant 9.99999996E-13 : f32
    %367 = vector.broadcast %cst_151 : f32 to vector<48x1xf32>
    %368 = arith.addf %364, %367 : vector<48x1xf32>
    %369 = math.rsqrt %368 : vector<48x1xf32>
    %370 = vector.broadcast %369 : vector<48x1xf32> to vector<48x32xf32>
    %371 = arith.mulf %366, %370 : vector<48x32xf32>
    %372 = vector.broadcast %352 : vector<1x32xf32> to vector<48x32xf32>
    %373 = arith.mulf %371, %372 : vector<48x32xf32>
    %374 = vector.broadcast %353 : vector<1x32xf32> to vector<48x32xf32>
    %375 = arith.addf %373, %374 : vector<48x32xf32>
    %c0_152 = arith.constant 0 : index
    %c0_153 = arith.constant 0 : index
    %376 = vector.load %arg33[%c0_152, %c0_153] : memref<32x64xf32, #tpu.memory_space<vmem>>, vector<32x64xf32>
    %cst_154 = arith.constant dense<0.000000e+00> : vector<48x64xf32>
    %377 = tpu.matmul %375, %376, %cst_154 {dimension_numbers = #tpu.dot_dimension_numbers<[1], [0], [0], [1], [0, 0, 1, 1], [], []>} : vector<48x32xf32>, vector<32x64xf32>, vector<48x64xf32> -> vector<48x64xf32>
    %c0_155 = arith.constant 0 : index
    %c0_156 = arith.constant 0 : index
    %378 = vector.load %arg34[%c0_155, %c0_156] : memref<1x64xf32, #tpu.memory_space<vmem>>, vector<1x64xf32>
    %379 = vector.broadcast %378 : vector<1x64xf32> to vector<48x64xf32>
    %380 = arith.addf %377, %379 : vector<48x64xf32>
    %381 = arith.mulf %380, %380 : vector<48x64xf32>
    %382 = arith.mulf %380, %381 : vector<48x64xf32>
    %cst_157 = arith.constant 4.471500e-02 : f32
    %383 = vector.broadcast %cst_157 : f32 to vector<48x64xf32>
    %384 = arith.mulf %383, %382 : vector<48x64xf32>
    %385 = arith.addf %380, %384 : vector<48x64xf32>
    %cst_158 = arith.constant 0.797884583 : f32
    %386 = vector.broadcast %cst_158 : f32 to vector<48x64xf32>
    %387 = arith.mulf %386, %385 : vector<48x64xf32>
    %388 = math.tanh %387 : vector<48x64xf32>
    %cst_159 = arith.constant 1.000000e+00 : f32
    %389 = vector.broadcast %cst_159 : f32 to vector<48x64xf32>
    %390 = arith.addf %389, %388 : vector<48x64xf32>
    %cst_160 = arith.constant 5.000000e-01 : f32
    %391 = vector.broadcast %cst_160 : f32 to vector<48x64xf32>
    %392 = arith.mulf %391, %390 : vector<48x64xf32>
    %393 = arith.mulf %380, %392 : vector<48x64xf32>
    %c0_161 = arith.constant 0 : index
    %c0_162 = arith.constant 0 : index
    %394 = vector.load %arg35[%c0_161, %c0_162] : memref<64x32xf32, #tpu.memory_space<vmem>>, vector<64x32xf32>
    %cst_163 = arith.constant dense<0.000000e+00> : vector<48x32xf32>
    %395 = tpu.matmul %393, %394, %cst_163 {dimension_numbers = #tpu.dot_dimension_numbers<[1], [0], [0], [1], [0, 0, 1, 1], [], []>} : vector<48x64xf32>, vector<64x32xf32>, vector<48x32xf32> -> vector<48x32xf32>
    %c0_164 = arith.constant 0 : index
    %c0_165 = arith.constant 0 : index
    %396 = vector.load %arg36[%c0_164, %c0_165] : memref<1x32xf32, #tpu.memory_space<vmem>>, vector<1x32xf32>
    %397 = vector.broadcast %396 : vector<1x32xf32> to vector<48x32xf32>
    %398 = arith.addf %395, %397 : vector<48x32xf32>
    %399 = arith.addf %398, %351 : vector<48x32xf32>
    %400 = vector.shape_cast %399 : vector<48x32xf32> to vector<2x24x32xf32>
    %401 = vector.extract_strided_slice %400 {offsets = [0, 0, 0], sizes = [2, 1, 32], strides = [1, 1, 1]} : vector<2x24x32xf32> to vector<2x1x32xf32>
    %402 = vector.shape_cast %401 : vector<2x1x32xf32> to vector<2x32xf32>
    %c0_166 = arith.constant 0 : index
    %c0_167 = arith.constant 0 : index
    %403 = vector.load %arg37[%c0_166, %c0_167] : memref<1x32xf32, #tpu.memory_space<vmem>>, vector<1x32xf32>
    %c0_168 = arith.constant 0 : index
    %c0_169 = arith.constant 0 : index
    %404 = vector.load %arg38[%c0_168, %c0_169] : memref<1x32xf32, #tpu.memory_space<vmem>>, vector<1x32xf32>
    %cst_170 = arith.constant dense<0.000000e+00> : vector<2xf32>
    %405 = vector.multi_reduction <add>, %402, %cst_170 [1] : vector<2x32xf32> to vector<2xf32>
    %406 = vector.shape_cast %405 : vector<2xf32> to vector<2x1xf32>
    %cst_171 = arith.constant 3.200000e+01 : f32
    %407 = vector.broadcast %cst_171 : f32 to vector<2x1xf32>
    %408 = arith.divf %406, %407 : vector<2x1xf32>
    %409 = vector.broadcast %408 : vector<2x1xf32> to vector<2x32xf32>
    %410 = arith.subf %402, %409 : vector<2x32xf32>
    %411 = arith.mulf %410, %410 : vector<2x32xf32>
    %cst_172 = arith.constant dense<0.000000e+00> : vector<2xf32>
    %412 = vector.multi_reduction <add>, %411, %cst_172 [1] : vector<2x32xf32> to vector<2xf32>
    %413 = vector.shape_cast %412 : vector<2xf32> to vector<2x1xf32>
    %cst_173 = arith.constant 3.200000e+01 : f32
    %414 = vector.broadcast %cst_173 : f32 to vector<2x1xf32>
    %415 = arith.divf %413, %414 : vector<2x1xf32>
    %416 = vector.broadcast %408 : vector<2x1xf32> to vector<2x32xf32>
    %417 = arith.subf %402, %416 : vector<2x32xf32>
    %cst_174 = arith.constant 9.99999996E-13 : f32
    %418 = vector.broadcast %cst_174 : f32 to vector<2x1xf32>
    %419 = arith.addf %415, %418 : vector<2x1xf32>
    %420 = math.rsqrt %419 : vector<2x1xf32>
    %421 = vector.broadcast %420 : vector<2x1xf32> to vector<2x32xf32>
    %422 = arith.mulf %417, %421 : vector<2x32xf32>
    %423 = vector.broadcast %403 : vector<1x32xf32> to vector<2x32xf32>
    %424 = arith.mulf %422, %423 : vector<2x32xf32>
    %425 = vector.broadcast %404 : vector<1x32xf32> to vector<2x32xf32>
    %426 = arith.addf %424, %425 : vector<2x32xf32>
    %c0_175 = arith.constant 0 : index
    %c0_176 = arith.constant 0 : index
    %427 = vector.load %arg39[%c0_175, %c0_176] : memref<32x10xf32, #tpu.memory_space<vmem>>, vector<32x10xf32>
    %cst_177 = arith.constant dense<0.000000e+00> : vector<2x10xf32>
    %428 = tpu.matmul %426, %427, %cst_177 {dimension_numbers = #tpu.dot_dimension_numbers<[1], [0], [0], [1], [0, 0, 1, 1], [], []>} : vector<2x32xf32>, vector<32x10xf32>, vector<2x10xf32> -> vector<2x10xf32>
    %c0_178 = arith.constant 0 : index
    %c0_179 = arith.constant 0 : index
    %429 = vector.load %arg40[%c0_178, %c0_179] : memref<1x10xf32, #tpu.memory_space<vmem>>, vector<1x10xf32>
    %430 = vector.broadcast %429 : vector<1x10xf32> to vector<2x10xf32>
    %431 = arith.addf %428, %430 : vector<2x10xf32>
    %c0_180 = arith.constant 0 : index
    %c0_181 = arith.constant 0 : index
    %432 = vector.load %arg41[%c0_180, %c0_181] : memref<2x10xf32, #tpu.memory_space<vmem>>, vector<2x10xf32>
    tpu.vector_store %arg41[%c0_180, %c0_181], %431 {strides = array<i32>} : memref<2x10xf32, #tpu.memory_space<vmem>>, vector<2x10xf32>,
    return
  }
}

</mosaic_0001>

<bundles_post_ra>
// kernel: _lambda_.1
= control target key start
LH: loop header
LB: loop body
LE: loop exit
PB: predicated region body
PF: predicated region fallthrough
CT: control target
= control target key end

     0   :  { %s9106_s6 = smov 1   ;;  %s9107_s10 = smov 2   ;;  %s10806_s0 = inlined_call_operand.smem [shape: u32[42], index: -1, kind: input, shape index: {}] }
   0x1   :  { %s9163_s5 = sld [smem:[%s10806_s0]]   ;;  %s9108_s14 = smov 3  }
   0x2   :  { %s9168_s9 = sld [smem:[%s10806_s0 + %s9106_s6]]   ;;  %s9109_s18 = smov 4  }
   0x3   :  { %s9173_s13 = sld [smem:[%s10806_s0 + %s9107_s10]]   ;;  %s9110_s22 = smov 5  }
   0x4   :  { %s9178_s17 = sld [smem:[%s10806_s0 + %s9108_s14]]   ;;  %s9111_s26 = smov 6  }
   0x5   :  { %s9183_s21 = sld [smem:[%s10806_s0 + %s9109_s18]]   ;;  %s9112_s30 = smov 7  }
   0x6   :  { %s9188_s25 = sld [smem:[%s10806_s0 + %s9110_s22]]   ;;  %s9113_s4 = smov 8  }
   0x7   :  { %s9193_s29 = sld [smem:[%s10806_s0 + %s9111_s26]]   ;;  %s9114_s10 = smov 9  }
   0x8   :  { %s9198_s3 = sld [smem:[%s10806_s0 + %s9112_s30]]   ;;  %s9115_s15 = smov 10  }
   0x9   :  { %s9203_s8 = sld [smem:[%s10806_s0 + %s9113_s4]]   ;;  %s9116_s20 = smov 11  }
   0xa   :  { %s9208_s14 = sld [smem:[%s10806_s0 + %s9114_s10]]   ;;  %s9117_s26 = smov 12  }
   0xb   :  { %s9213_s19 = sld [smem:[%s10806_s0 + %s9115_s15]]   ;;  %s9118_s1 = smov 13  }
   0xc   :  { %s9218_s24 = sld [smem:[%s10806_s0 + %s9116_s20]]   ;;  %s9119_s7 = smov 14  }
   0xd   :  { %s9223_s30 = sld [smem:[%s10806_s0 + %s9117_s26]]   ;;  %s9120_s15 = smov 15  }
   0xe   :  { %s9228_s6 = sld [smem:[%s10806_s0 + %s9118_s1]]   ;;  %s9121_s22 = smov 16  }
   0xf   :  { %s9233_s12 = sld [smem:[%s10806_s0 + %s9119_s7]]   ;;  %s9122_s28 = smov 17  }
  0x10   :  { %s9238_s20 = sld [smem:[%s10806_s0 + %s9120_s15]]   ;;  %s9123_s7 = smov 18  }
  0x11   :  { %s9243_s27 = sld [smem:[%s10806_s0 + %s9121_s22]]   ;;  %s9124_s15 = smov 19  }
  0x12   :  { %s9248_s4 = sld [smem:[%s10806_s0 + %s9122_s28]]   ;;  %s9125_s22 = smov 20  }
  0x13   :  { %s9126_s28 = smov 21  }
  0x15   :  { %10815 = sst [smem:[#allocation5_spill]] %s9233_s12 }
  0x16   :  { %10816 = sst [smem:[#allocation6_spill]] %s9238_s20 }
  0x17   :  { %10817 = sst [smem:[#allocation7_spill]] %s9243_s27 }
  0x18   :  { %10818 = sst [smem:[#allocation8_spill]] %s9248_s4 }
  0x19   :  { %s9253_s12 = sld [smem:[%s10806_s0 + %s9123_s7]]   ;;  %s9127_s7 = smov 22  }
  0x1a   :  { %s9258_s20 = sld [smem:[%s10806_s0 + %s9124_s15]]   ;;  %s9128_s15 = smov 23  }
  0x1b   :  { %s9263_s27 = sld [smem:[%s10806_s0 + %s9125_s22]]   ;;  %s9129_s22 = smov 24  }
  0x1c   :  { %s9268_s4 = sld [smem:[%s10806_s0 + %s9126_s28]]   ;;  %s9130_s28 = smov 25  }
  0x1f   :  { %10819 = sst [smem:[#allocation9_spill]] %s9253_s12 }
  0x20   :  { %10820 = sst [smem:[#allocation10_spill]] %s9258_s20 }
  0x21   :  { %10821 = sst [smem:[#allocation11_spill]] %s9263_s27 }
  0x22   :  { %10822 = sst [smem:[#allocation12_spill]] %s9268_s4 }
  0x23   :  { %s9273_s12 = sld [smem:[%s10806_s0 + %s9127_s7]]   ;;  %s9131_s7 = smov 26  }
  0x24   :  { %s9278_s20 = sld [smem:[%s10806_s0 + %s9128_s15]]   ;;  %s9132_s15 = smov 27  }
  0x25   :  { %s9283_s27 = sld [smem:[%s10806_s0 + %s9129_s22]]   ;;  %s9133_s22 = smov 28  }
  0x26   :  { %s9288_s4 = sld [smem:[%s10806_s0 + %s9130_s28]]   ;;  %s9134_s28 = smov 29  }
  0x29   :  { %10823 = sst [smem:[#allocation13_spill]] %s9273_s12 }
  0x2a   :  { %10824 = sst [smem:[#allocation14_spill]] %s9278_s20 }
  0x2b   :  { %10825 = sst [smem:[#allocation15_spill]] %s9283_s27 }
  0x2c   :  { %10826 = sst [smem:[#allocation16_spill]] %s9288_s4 }
  0x2d   :  { %s9293_s12 = sld [smem:[%s10806_s0 + %s9131_s7]]   ;;  %s9135_s7 = smov 30  }
  0x2e   :  { %s9298_s20 = sld [smem:[%s10806_s0 + %s9132_s15]]   ;;  %s9136_s15 = smov 31  }
  0x2f   :  { %s9303_s27 = sld [smem:[%s10806_s0 + %s9133_s22]]   ;;  %s9137_s22 = smov 32  }
  0x30   :  { %s9308_s4 = sld [smem:[%s10806_s0 + %s9134_s28]]   ;;  %s9138_s28 = smov 33  }
  0x33   :  { %10827 = sst [smem:[#allocation17_spill]] %s9293_s12 }
  0x34   :  { %10828 = sst [smem:[#allocation18_spill]] %s9298_s20 }
  0x35   :  { %10829 = sst [smem:[#allocation19_spill]] %s9303_s27 }
  0x36   :  { %10830 = sst [smem:[#allocation20_spill]] %s9308_s4 }
  0x37   :  { %s9313_s12 = sld [smem:[%s10806_s0 + %s9135_s7]]   ;;  %s9139_s7 = smov 34  }
  0x38   :  { %s9318_s20 = sld [smem:[%s10806_s0 + %s9136_s15]]   ;;  %s9140_s15 = smov 35  }
  0x39   :  { %s9323_s27 = sld [smem:[%s10806_s0 + %s9137_s22]]   ;;  %s9141_s22 = smov 36  }
  0x3a   :  { %s9328_s4 = sld [smem:[%s10806_s0 + %s9138_s28]]   ;;  %s9142_s28 = smov 37  }
  0x3d   :  { %10831 = sst [smem:[#allocation21_spill]] %s9313_s12 }
  0x3e   :  { %10832 = sst [smem:[#allocation22_spill]] %s9318_s20 }
  0x3f   :  { %10833 = sst [smem:[#allocation23_spill]] %s9323_s27 }
  0x40   :  { %10834 = sst [smem:[#allocation24_spill]] %s9328_s4 }
  0x41   :  { %s9333_s12 = sld [smem:[%s10806_s0 + %s9139_s7]]   ;;  %s9143_s7 = smov 38  }
  0x42   :  { %s9338_s20 = sld [smem:[%s10806_s0 + %s9140_s15]]   ;;  %s9144_s15 = smov 39  }
  0x43   :  { %s9343_s27 = sld [smem:[%s10806_s0 + %s9141_s22]]   ;;  %s9145_s22 = smov 40  }
  0x44   :  { %s9348_s4 = sld [smem:[%s10806_s0 + %s9142_s28]]   ;;  %s9146_s28 = smov 41  }
  0x47   :  { %10835 = sst [smem:[#allocation25_spill]] %s9333_s12 }
  0x48   :  { %10836 = sst [smem:[#allocation26_spill]] %s9338_s20 }
  0x49   :  { %10837 = sst [smem:[#allocation27_spill]] %s9343_s27 }
  0x4a   :  { %10838 = sst [smem:[#allocation28_spill]] %s9348_s4 }
  0x4b   :  { %s9353_s12 = sld [smem:[%s10806_s0 + %s9143_s7]]  }
  0x4c   :  { %s9358_s20 = sld [smem:[%s10806_s0 + %s9144_s15]]  }
  0x4d   :  { %s9363_s27 = sld [smem:[%s10806_s0 + %s9145_s22]]  }
  0x4e   :  { %s9368_s4 = sld [smem:[%s10806_s0 + %s9146_s28]]  }
  0x4f   :  { %v177_v0 = vld [vmem:[%s9168_s9] sm:$0xff]  ;;  %v178_v1 = vld [vmem:[%s9168_s9 + $0x8] sm:$0xff]  ;;  %v179_v2 = vld [vmem:[%s9168_s9 + $0x10] sm:$0xff]  ;;  %vm190_vm0 = vcmask 392192  }
  0x50   :  { %v8385_v3 = vpack.c.bf16 %v178_v1, %v177_v0  ;;  %v180_v4 = vld [vmem:[%s9168_s9 + $0x18] sm:$0xff]  ;;  %v181_v6 = vld [vmem:[%s9168_s9 + $0x20] sm:$0xff]  ;;  %v182_v7 = vld [vmem:[%s9168_s9 + $0x28] sm:$0xff] }
  0x51   :  { %v8389_v5 = vpack.c.bf16 %v180_v4, %v179_v2  ;;  %v171_v8 = vld [vmem:[%s9163_s5] sm:$0xff] }
  0x52   :  { %8386 = vmatprep.subr.bf16.mxu0 %v8385_v3  ;;  %7611 = vmatprep.mubr.msk.f32.mxu0 %vm190_vm0, %v171_v8 }
  0x53   :  { %8388 = vmatpush3.bf16.msra.mxu0 %v8385_v3 }
  0x54   :  { %88 = vsyncpa [#allocation3], 0  ;;  %8390 = vmatprep.subr.bf16.mxu0 %v8389_v5  ;;  %v8393_v9 = vpack.c.bf16 %v182_v7, %v181_v6  ;;  %v172_v10 = vld [vmem:[%s9163_s5 + $0x8] sm:$0xff]  ;;  %v173_v11 = vld [vmem:[%s9163_s5 + $0x10] sm:$0xff]  ;;  %v304_v15 = vlaneseq  ;;  %vm339_vm2 = vcmask 261120   ;;  %vm9148_vm3 = vmmov 0  }
  0x55   :  { %v174_v12 = vld [vmem:[%s9163_s5 + $0x18] sm:$0xff]  ;;  %v175_v13 = vld [vmem:[%s9163_s5 + $0x20] sm:$0xff]  ;;  %v176_v14 = vld [vmem:[%s9163_s5 + $0x28] sm:$0xff]  ;;  %vm789_vm4 = vcmask 64512   ;;  %vm986_vm7 = vcmask 195584   ;;  %s9151_s0 = smov 120  }
  0x56   :  { %v305_v16 = vshrl.u32 %v304_v15, 7  ;;  %v6942_v17 = vld [vmem:[%s9173_s13] ss:$0 sm:$0xff]  ;;  %v325_v24 = vld [vmem:[%s9183_s21 + $0x8] sm:$0xff]  ;;  %v326_v29 = vld [vmem:[%s9183_s21 + $0x10] sm:$0xff]  ;;  %s9152_s5 = smov 112  }
  0x57   :  { %8392 = vmatpush3.bf16.msra.mxu0 %v8389_v5  ;;  %v6949_v20 = vld [vmem:[%s9178_s17] ss:$0 sm:$0xff]  ;;  %vm9512_vm5 = vmpackc.low %vm789_vm4, %vm789_vm4  ;;  %s9153_s9 = smov 104   ;;  %s10841_s13 = sld [smem:[#allocation5_spill]]  ;;  %vm3427_vm8 = vcmask 523264   ;;  %vm6749_vm9 = vcmask 1041409  }
  0x58   :  { %8394 = vmatprep.subr.bf16.mxu0 %v8393_v9  ;;  %vm308_vm1 = vcmp.eq.s32.totalorder %v305_v16, 0  ;;  %v324_v22 = vld [vmem:[%s9183_s21] sm:$0xff]  ;;  %v444_v16 = vld [vmem:[%s9198_s3 + $0x8] sm:$0xff]  ;;  %s10842_s17 = sld [smem:[#allocation8_spill]]  ;;  %s10843_s21 = sld [smem:[#allocation6_spill]]  ;;  %vm6752_vm10 = vcmask 254976  }
  0x59   :  { %s10853_s7 = sld [smem:[#allocation17_spill]]  ;;  %s10854_s10 = sld [smem:[#allocation15_spill]]  ;;  %vm6885_vm11 = vcmask 74752  }
  0x5a   :  { %s10855_s11 = sld [smem:[#allocation19_spill]]  ;;  %s10856_s15 = sld [smem:[#allocation20_spill]] }
  0x5b   :  { %8396 = vmatpush3.bf16.msra.mxu0 %v8393_v9  ;;  %s10857_s16 = sld [smem:[#allocation21_spill]]  ;;  %s10858_s18 = sld [smem:[#allocation24_spill]] }
  0x5c   :  { %s10859_s22 = sld [smem:[#allocation22_spill]]  ;;  %s10860_s23 = sld [smem:[#allocation23_spill]] }
  0x5d   :  { %s10861_s26 = sld [smem:[#allocation26_spill]]  ;;  %s10862_s28 = sld [smem:[#allocation25_spill]] }
  0x5e   :  { %7612 = vmatmul.mubr.msk.f32.vlgmr.msra.gmra.mrb[0].mxu0 %vm190_vm0, %v172_v10  ;;  %s10863_s1 = sld [smem:[#allocation27_spill]]  ;;  %s10864_s2 = sld [smem:[#allocation28_spill]] }
  0x5f   :  { %7614 = vmatprep.mubr.msk.f32.mxu0 %vm190_vm0, %v173_v11 }
  0x62   :  { %7615 = vmatmul.mubr.msk.f32.gmra.mrb[2].mxu0 %vm190_vm0, %v174_v12 }
  0x63   :  { %7617 = vmatprep.mubr.msk.f32.mxu0 %vm190_vm0, %v175_v13 }
  0x66   :  { %7618 = vmatmul.mubr.msk.f32.gmra.mrb[4].mxu0 %vm190_vm0, %v176_v14  ;;  %v443_v14 = vld [vmem:[%s9198_s3] sm:$0xff] }
 0x131   :  { %v7613_v18 = vpop.f32.mrb[0].mxu0 }
 0x132   :  { %v275_v19 = vpop.f32.mrb[1].mxu0  ;;  %v281_v23 = vadd.f32 %v7613_v18, %v6942_v17  ;;  %v8397_v18 = vpack.c.bf16 %v444_v16, %v443_v14 }
 0x133   :  { %v276_v21 = vadd.f32 %v6942_v17, %v275_v19  ;;  %v680_v19 = vld [vmem:[%s9218_s24 + $0x8] sm:$0xff] }
 0x134   :  { %v9396_v32 = vadd.f32 %v325_v24, %v281_v23  ;;  %8398 = vmatprep.subr.bf16.mxu1 %v8397_v18 }
 0x135   :  { %v318_v25 = vsel %vm308_vm1, %v6949_v20, %v276_v21  ;;  %v7616_v26 = vpop.f32.mrb[2].mxu0  ;;  %v446_v21 = vld [vmem:[%s9198_s3 + $0x18] sm:$0xff]  ;;  %8400 = vmatpush3.bf16.msra.mxu1 %v8397_v18 }
 0x136   :  { %v291_v27 = vadd.f32 %v7616_v26, %v6942_v17  ;;  %v285_v28 = vpop.f32.mrb[3].mxu0  ;;  %v9394_v30 = vadd.f32 %v324_v22, %v318_v25  ;;  %v343_v42 = vsel %vm339_vm2, %v9396_v32, 0.0  ;;  %v682_v25 = vld [vmem:[%s9218_s24 + $0x18] sm:$0xff] }
 0x137   :  { %v286_v31 = vadd.f32 %v6942_v17, %v285_v28  ;;  %v574_v28 = vld [vmem:[%s9208_s14 + $0x8] sm:$0xff] }
 0x138   :  { %v321_v33 = vsel %vm308_vm1, %v6949_v20, %v291_v27  ;;  %v340_v34 = vsel %vm339_vm2, %v9394_v30, 0.0  ;;  %v445_v20 = vld [vmem:[%s9198_s3 + $0x10] sm:$0xff]  ;;  %v573_v27 = vld [vmem:[%s9208_s14] sm:$0xff]  ;;  %s10846_s3 = sld [smem:[#allocation9_spill]] }
 0x139   :  { %v9400_v35 = vadd.f32 %v326_v29, %v286_v31  ;;  %341 = vadd.xlane.f32.xlu0 %v340_v34  ;;  %v7619_v36 = vpop.f32.mrb[4].mxu0  ;;  %v9404_v41 = vadd.f32 %v324_v22, %v321_v33  ;;  %v8401_v23 = vpack.c.bf16 %v446_v21, %v445_v20  ;;  %v9149_v21 = vmov 0.0  }
 0x13a   :  { %v301_v37 = vadd.f32 %v7619_v36, %v6942_v17  ;;  %v295_v38 = vpop.f32.mrb[5].mxu0 }
 0x13b   :  { %v296_v39 = vadd.f32 %v6942_v17, %v295_v38  ;;  %v346_v40 = vsel %vm339_vm2, %v9400_v35, 0.0  ;;  %v349_v45 = vsel %vm339_vm2, %v9404_v41, 0.0  ;;  %v679_v17 = vld [vmem:[%s9218_s24] sm:$0xff]  ;;  %8402 = vmatprep.subr.bf16.mxu1 %v8401_v23 }
 0x13c   :  { %347 = vadd.xlane.f32.xlu1 %v346_v40  ;;  %v9408_v43 = vadd.f32 %v326_v29, %v301_v37  ;;  %v8413_v22 = vpack.c.bf16 %v680_v19, %v679_v17  ;;  %8404 = vmatpush3.bf16.msra.mxu1 %v8401_v23  ;;  %v8405_v29 = vpack.c.bf16 %v574_v28, %v573_v27 }
 0x13d   :  { %v9410_v44 = vadd.f32 %v325_v24, %v296_v39  ;;  %344 = vadd.xlane.f32.xlu0 %v343_v42  ;;  %v681_v24 = vld [vmem:[%s9218_s24 + $0x10] sm:$0xff]  ;;  %s10850_s24 = sld [smem:[#allocation18_spill]] }
 0x13e   :  { %v355_v47 = vsel %vm339_vm2, %v9408_v43, 0.0  ;;  %8414 = vmatprep.subr.bf16.mxu0 %v8413_v22  ;;  %v8417_v26 = vpack.c.bf16 %v682_v25, %v681_v24  ;;  %8406 = vmatprep.subr.bf16.mxu1 %v8405_v29 }
 0x13f   :  { %v352_v46 = vsel %vm339_vm2, %v9410_v44, 0.0  ;;  %8416 = vmatpush3.bf16.msra.mxu0 %v8413_v22  ;;  %v9499_v22 = vld [vmem:[%s9223_s30] ss:$0 sm:$0xff]  ;;  %s10851_s30 = sld [smem:[#allocation12_spill]] }
 0x140   :  { %350 = vadd.xlane.f32.xlu1 %v349_v45  ;;  %8418 = vmatprep.subr.bf16.mxu0 %v8417_v26 }
 0x141   :  { %353 = vadd.xlane.f32.xlu0 %v352_v46 }
 0x143   :  { %8420 = vmatpush3.bf16.msra.mxu0 %v8417_v26 }
 0x144   :  { %356 = vadd.xlane.f32.xlu1 %v355_v47 }
 0x1c6   :  { %v342_v48 = vpop.xlane.xlu0 %341 }
 0x1c7   :  { %v359_v49 = vmul.f32 0.03125, %v342_v48 }
 0x1c9   :  { %v9419_v50 = vsub.f32 %v9394_v30, %v359_v49  ;;  %v348_v51 = vpop.xlane.xlu1 %347 }
 0x1ca   :  { %v361_v52 = vmul.f32 0.03125, %v348_v51  ;;  %v345_v53 = vpop.xlane.xlu0 %344 }
 0x1cb   :  { %v360_v54 = vmul.f32 0.03125, %v345_v53  ;;  %v371_v55 = vmul.f32 %v9419_v50, %v9419_v50 }
 0x1cc   :  { %v9424_v56 = vsub.f32 %v9400_v35, %v361_v52 }
 0x1cd   :  { %v9427_v57 = vsub.f32 %v9396_v32, %v360_v54  ;;  %v351_v58 = vpop.xlane.xlu1 %350  ;;  %v377_v59 = vsel %vm339_vm2, %v371_v55, 0.0 }
 0x1ce   :  { %v362_v60 = vmul.f32 0.03125, %v351_v58  ;;  %378 = vadd.xlane.f32.xlu0 %v377_v59  ;;  %v354_v61 = vpop.xlane.xlu0 %353  ;;  %v373_v62 = vmul.f32 %v9424_v56, %v9424_v56  ;;  %v6950_v58 = vld [vmem:[%s9188_s25] ss:$0 sm:$0xff]  ;;  %s10844_s25 = sld [smem:[#allocation7_spill]] }
 0x1cf   :  { %v363_v63 = vmul.f32 0.03125, %v354_v61  ;;  %v372_v0 = vmul.f32 %v9427_v57, %v9427_v57 }
 0x1d0   :  { %v9435_v1 = vsub.f32 %v9404_v41, %v362_v60  ;;  %v383_v2 = vsel %vm339_vm2, %v373_v62, 0.0  ;;  %v6951_v60 = vld [vmem:[%s9193_s29] ss:$0 sm:$0xff]  ;;  %s10845_s29 = sld [smem:[#allocation10_spill]] }
 0x1d1   :  { %v9439_v3 = vsub.f32 %v9410_v44, %v363_v63  ;;  %v357_v4 = vpop.xlane.xlu1 %356  ;;  %v380_v5 = vsel %vm339_vm2, %v372_v0, 0.0 }
 0x1d2   :  { %v364_v6 = vmul.f32 0.03125, %v357_v4  ;;  %384 = vadd.xlane.f32.xlu0 %v383_v2  ;;  %381 = vadd.xlane.f32.xlu1 %v380_v5  ;;  %v374_v7 = vmul.f32 %v9435_v1, %v9435_v1 }
 0x1d3   :  { %v375_v8 = vmul.f32 %v9439_v3, %v9439_v3 }
 0x1d4   :  { %v9447_v9 = vsub.f32 %v9408_v43, %v364_v6  ;;  %v386_v10 = vsel %vm339_vm2, %v374_v7, 0.0  ;;  %v575_v6 = vld [vmem:[%s9208_s14 + $0x10] sm:$0xff]  ;;  %v576_v7 = vld [vmem:[%s9208_s14 + $0x18] sm:$0xff]  ;;  %s10848_s14 = sld [smem:[#allocation14_spill]] }
 0x1d5   :  { %v389_v11 = vsel %vm339_vm2, %v375_v8, 0.0  ;;  %v8409_v16 = vpack.c.bf16 %v576_v7, %v575_v6 }
 0x1d6   :  { %387 = vadd.xlane.f32.xlu1 %v386_v10  ;;  %390 = vadd.xlane.f32.xlu0 %v389_v11  ;;  %v376_v12 = vmul.f32 %v9447_v9, %v9447_v9 }
 0x1d8   :  { %v392_v13 = vsel %vm339_vm2, %v376_v12, 0.0 }
 0x1da   :  { %393 = vadd.xlane.f32.xlu1 %v392_v13 }
 0x25b   :  { %v379_v31 = vpop.xlane.xlu0 %378 }
 0x25c   :  { %v395_v33 = vmul.f32 0.03125, %v379_v31 }
 0x25e   :  { %v401_v34 = vadd.f32 1e-12, %v395_v33 }
 0x25f   :  { %v382_v36 = vpop.xlane.xlu1 %381  ;;  %v385_v37 = vpop.xlane.xlu0 %384 }
 0x260   :  { %8816 = vrsqrt.f32 %v401_v34  ;;  %v396_v38 = vmul.f32 0.03125, %v382_v36  ;;  %v397_v39 = vmul.f32 0.03125, %v385_v37 }
 0x262   :  { %v402_v40 = vadd.f32 1e-12, %v396_v38  ;;  %v403_v42 = vadd.f32 1e-12, %v397_v39 }
 0x263   :  { %v388_v45 = vpop.xlane.xlu1 %387  ;;  %v391_v46 = vpop.xlane.xlu0 %390 }
 0x264   :  { %8818 = vrsqrt.f32 %v402_v40  ;;  %v398_v47 = vmul.f32 0.03125, %v388_v45  ;;  %v399_v48 = vmul.f32 0.03125, %v391_v46 }
 0x265   :  { %8820 = vrsqrt.f32 %v403_v42 }
 0x266   :  { %v404_v49 = vadd.f32 1e-12, %v398_v47  ;;  %v405_v51 = vadd.f32 1e-12, %v399_v48  ;;  %v6959_v47 = vld [vmem:[%s9213_s19] ss:$0 sm:$0xff] }
 0x267   :  { %v394_v52 = vpop.xlane.xlu1 %393  ;;  %s10849_s19 = sld [smem:[#allocation16_spill]] }
 0x268   :  { %8822 = vrsqrt.f32 %v404_v49  ;;  %v400_v53 = vmul.f32 0.03125, %v394_v52 }
 0x269   :  { %8824 = vrsqrt.f32 %v405_v51 }
 0x26a   :  { %v8817_v54 = vpop.eup %8816  ;;  %v406_v55 = vadd.f32 1e-12, %v400_v53 }
 0x26b   :  { %v413_v59 = vmul.f32 %v8817_v54, %v9419_v50 }
 0x26c   :  { %8826 = vrsqrt.f32 %v406_v55 }
 0x26d   :  { %v425_v61 = vmul.f32 %v6950_v58, %v413_v59 }
 0x26e   :  { %v8819_v62 = vpop.eup %8818 }
 0x26f   :  { %v8821_v63 = vpop.eup %8820  ;;  %v437_v0 = vadd.f32 %v6951_v60, %v425_v61  ;;  %v414_v2 = vmul.f32 %v8819_v62, %v9427_v57  ;;  %v6952_v62 = vld [vmem:[%s9203_s8] ss:$0 sm:$0xff]  ;;  %s10847_s8 = sld [smem:[#allocation11_spill]] }
 0x270   :  { %v415_v4 = vmul.f32 %v8821_v63, %v9424_v56 }
 0x271   :  { %7628 = vmatprep.mubr.msk.f32.mxu1 %vm339_vm2, %v437_v0  ;;  %7662 = vmatprep.mubr.msk.f32.mxu0 %vm339_vm2, %v437_v0  ;;  %v426_v5 = vmul.f32 %v6950_v58, %v414_v2 }
 0x272   :  { %v8823_v8 = vpop.eup %8822  ;;  %v427_v10 = vmul.f32 %v6950_v58, %v415_v4 }
 0x273   :  { %v8825_v50 = vpop.eup %8824  ;;  %v438_v11 = vadd.f32 %v6951_v60, %v426_v5  ;;  %v416_v12 = vmul.f32 %v8823_v8, %v9435_v1 }
 0x274   :  { %v439_v13 = vadd.f32 %v6951_v60, %v427_v10  ;;  %v417_v14 = vmul.f32 %v8825_v50, %v9439_v3 }
 0x275   :  { %7629 = vmatmul.mubr.msk.f32.vlgmr.msra.gmra.mrb[0].mxu1 %vm339_vm2, %v438_v11  ;;  %7663 = vmatmul.mubr.msk.f32.vlgmr.msra.gmra.mrb[6].mxu0 %vm339_vm2, %v438_v11  ;;  %v428_v56 = vmul.f32 %v6950_v58, %v416_v12 }
 0x276   :  { %v8827_v57 = vpop.eup %8826  ;;  %7631 = vmatprep.mubr.msk.f32.mxu1 %vm339_vm2, %v439_v13  ;;  %7665 = vmatprep.mubr.msk.f32.mxu0 %vm339_vm2, %v439_v13  ;;  %v429_v17 = vmul.f32 %v6950_v58, %v417_v14 }
 0x277   :  { %v440_v18 = vadd.f32 %v6951_v60, %v428_v56  ;;  %8408 = vmatpush3.bf16.msra.mxu1 %v8405_v29  ;;  %v418_v19 = vmul.f32 %v8827_v57, %v9447_v9  ;;  %v9147_v9 = vmov 0.0|0.0  }
 0x278   :  { %v441_v1 = vadd.f32 %v6951_v60, %v429_v17  ;;  %8410 = vmatprep.subr.bf16.mxu1 %v8409_v16  ;;  %8425 = vmatprep.subr.bf16.mxu0 %v9147_v9 }
 0x279   :  { %7632 = vmatmul.mubr.msk.f32.gmra.mrb[2].mxu1 %vm339_vm2, %v440_v18  ;;  %7666 = vmatmul.mubr.msk.f32.gmra.mrb[8].mxu0 %vm339_vm2, %v440_v18  ;;  %v430_v3 = vmul.f32 %v6950_v58, %v418_v19 }
 0x27a   :  { %7634 = vmatprep.mubr.msk.f32.mxu1 %vm339_vm2, %v441_v1  ;;  %7668 = vmatprep.mubr.msk.f32.mxu0 %vm339_vm2, %v441_v1 }
 0x27b   :  { %v442_v20 = vadd.f32 %v6951_v60, %v430_v3  ;;  %8412 = vmatpush3.bf16.msra.mxu1 %v8409_v16 }
 0x27c   :  { %8421 = vmatprep.subr.bf16.mxu1 %v9147_v9 }
 0x27d   :  { %7635 = vmatmul.mubr.msk.f32.gmra.mrb[4].mxu1 %vm339_vm2, %v442_v20  ;;  %7669 = vmatmul.mubr.msk.f32.gmra.mrb[10].mxu0 %vm339_vm2, %v442_v20 }
 0x27e   :  { %7645 = vmatprep.mubr.msk.f32.mxu1 %vm339_vm2, %v437_v0  ;;  %7692 = vmatprep.mubr.msk.f32.mxu0 %vm9148_vm3, %v9149_v21 }
 0x281   :  { %7646 = vmatmul.mubr.msk.f32.vlgmr.msra.gmra.mrb[6].mxu1 %vm339_vm2, %v438_v11 }
 0x282   :  { %7648 = vmatprep.mubr.msk.f32.mxu1 %vm339_vm2, %v439_v13 }
 0x285   :  { %7649 = vmatmul.mubr.msk.f32.gmra.mrb[8].mxu1 %vm339_vm2, %v440_v18 }
 0x286   :  { %7651 = vmatprep.mubr.msk.f32.mxu1 %vm339_vm2, %v441_v1 }
 0x289   :  { %7652 = vmatmul.mubr.msk.f32.gmra.mrb[10].mxu1 %vm339_vm2, %v442_v20 }
 0x28a   :  { %7677 = vmatprep.mubr.msk.f32.mxu1 %vm9148_vm3, %v9149_v21 }
 0x348   :  { %v7630_v23 = vpop.f32.mrb[0].mxu1  ;;  %v7664_v24 = vpop.f32.mrb[6].mxu0 }
 0x349   :  { %v762_v25 = vadd.f32 %v7664_v24, %v9499_v22  ;;  %v538_v26 = vpop.f32.mrb[1].mxu1  ;;  %v756_v27 = vpop.f32.mrb[7].mxu0  ;;  %v544_v10 = vadd.f32 %v7630_v23, %v6952_v62 }
 0x34a   :  { %v757_v28 = vadd.f32 %v9499_v22, %v756_v27  ;;  %v539_v5 = vadd.f32 %v6952_v62, %v538_v26  ;;  %v9150_v26 = vmov -1e+30  }
 0x34b   :  { %v9538_v11 = vmul.f32 0.35355338, %v544_v10 }
 0x34c   :  { %v7633_v29 = vpop.f32.mrb[2].mxu1  ;;  %v7667_v31 = vpop.f32.mrb[8].mxu0  ;;  %v8430_v33 = vpack.c.bf16 %v762_v25, %v757_v28  ;;  %v9503_v34 = vpack.i.bf16 %v762_v25, %v757_v28  ;;  %v9530_v50 = vmul.f32 0.35355338, %v539_v5 }
 0x34d   :  { %v548_v36 = vpop.f32.mrb[3].mxu1  ;;  %v766_v37 = vpop.f32.mrb[9].mxu0  ;;  %v772_v45 = vadd.f32 %v7667_v31, %v9499_v22  ;;  %v554_v12 = vadd.f32 %v7633_v29, %v6952_v62 }
 0x34e   :  { %v549_v13 = vadd.f32 %v6952_v62, %v548_v36  ;;  %v9542_v14 = vadd.f32 %v9499_v22, %v766_v37 }
 0x34f   :  { %v9551_v56 = vmul.f32 0.35355338, %v554_v12 }
 0x350   :  { %v7636_v38 = vpop.f32.mrb[4].mxu1  ;;  %v7670_v39 = vpop.f32.mrb[10].mxu0  ;;  %v9553_v57 = vmul.f32 0.35355338, %v549_v13 }
 0x351   :  { %v558_v40 = vpop.f32.mrb[5].mxu1  ;;  %v776_v42 = vpop.f32.mrb[11].mxu0  ;;  %v564_v18 = vadd.f32 %v7636_v38, %v6952_v62  ;;  %v9571_v1 = vadd.f32 %v7670_v39, %v9499_v22 }
 0x352   :  { %v777_v46 = vadd.f32 %v9499_v22, %v776_v42  ;;  %v559_v17 = vadd.f32 %v6952_v62, %v558_v40  ;;  %v334_v22 = vand.u32 127, %v304_v15 }
 0x353   :  { %v9578_v3 = vmul.f32 0.35355338, %v564_v18 }
 0x354   :  { %v7647_v48 = vpop.f32.mrb[6].mxu1  ;;  %v8433_v49 = vpack.c.bf16 %v777_v46, %v772_v45  ;;  %v9508_v51 = vpack.i.bf16 %v777_v46, %v772_v45  ;;  %v9565_v19 = vmul.f32 0.35355338, %v559_v17  ;;  %vm335_vm6 = vcmp.lt.s32.totalorder %v334_v22, 17 }
 0x355   :  { %v656_v52 = vadd.f32 %v7647_v48, %v6959_v47  ;;  %v650_v53 = vpop.f32.mrb[7].mxu1  ;;  %v9586_v27 = vsel %vm335_vm6, 0.0, %v9150_v26 }
 0x356   :  { %v651_v54 = vadd.f32 %v6959_v47, %v650_v53 }
 0x358   :  { %v8422_v58 = vpack.c.bf16 %v656_v52, %v651_v54  ;;  %v7650_v59 = vpop.f32.mrb[8].mxu1  ;;  %v9516_v60 = vpack.i.bf16 %v656_v52, %v651_v54 }
 0x359   :  { %v660_v61 = vpop.f32.mrb[9].mxu1  ;;  %v666_v2 = vadd.f32 %v7650_v59, %v6959_v47 }
 0x35a   :  { %8424 = vmatpush3.bf16.xpose.msk.msra.mxu1 %vm9512_vm5, %v8422_v58  ;;  %v9522_v6 = vadd.f32 %v6959_v47, %v660_v61 }
 0x35b   :  { %7675 = vmatprep.subr.mxu1 %v9149_v21 }
 0x35c   :  { %v7653_v63 = vpop.f32.mrb[10].mxu1 }
 0x35d   :  { %v670_v0 = vpop.f32.mrb[11].mxu1  ;;  %v9544_v16 = vadd.f32 %v7653_v63, %v6959_v47 }
 0x35e   :  { %v671_v4 = vadd.f32 %v6959_v47, %v670_v0 }
 0x360   :  { %v8426_v7 = vpack.c.bf16 %v671_v4, %v666_v2  ;;  %v9524_v8 = vpack.i.bf16 %v671_v4, %v666_v2 }
 0x362   :  { %7676 = vmatpush3.xpose.msk.msra.mxu1 %vm789_vm4, %v9522_v6  ;;  %8428 = vmatpush3.bf16.xpose.msk.msra.mxu0 %vm9512_vm5, %v8426_v7 }
 0x363   :  { %8429 = vmatprep.subr.bf16.mxu1 %v9147_v9  ;;  %7690 = vmatprep.subr.mxu0 %v9149_v21 }
 0x365   :  { %7678 = vmatmul.mubr.msk.f32.vlgmr.msra.gmra.mrb[12].mxu1 %vm789_vm4, %v9530_v50 }
 0x366   :  { %8431 = vmatpush3.bf16.msra.mxu1 %v8430_v33  ;;  %7680 = vmatprep.mubr.msk.f32.mxu1 %vm9148_vm3, %v9149_v21 }
 0x367   :  { %7705 = vmatprep.subr.mxu1 %v9149_v21 }
 0x369   :  { %7681 = vmatmul.mubr.msk.f32.gmra.mrb[14].mxu1 %vm789_vm4, %v9538_v11 }
 0x36a   :  { %7691 = vmatpush3.xpose.msk.msra.mxu0 %vm789_vm4, %v9544_v16  ;;  %7706 = vmatpush3.msra.mxu1 %v9542_v14 }
 0x36b   :  { %7683 = vmatprep.mubr.msk.f32.mxu1 %vm9148_vm3, %v9149_v21  ;;  %8432 = vmatprep.subr.bf16.mxu0 %v9147_v9 }
 0x36c   :  { %8435 = vmatprep.subr.bf16.mxu1 %v9147_v9 }
 0x36d   :  { %7684 = vmatmul.mubr.msk.f32.gmra.mrb[16].mxu1 %vm789_vm4, %v9553_v57  ;;  %7693 = vmatmul.mubr.msk.f32.vlgmr.msra.gmra.mrb[12].mxu0 %vm789_vm4, %v9551_v56 }
 0x36e   :  { %8434 = vmatpush3.bf16.msra.mxu0 %v8433_v49  ;;  %7695 = vmatprep.mubr.msk.f32.mxu0 %vm9148_vm3, %v9149_v21 }
 0x36f   :  { %7720 = vmatprep.subr.mxu0 %v9149_v21  ;;  %7707 = vmatprep.mubr.msk.f32.mxu1 %vm9148_vm3, %v9149_v21 }
 0x371   :  { %7696 = vmatmul.mubr.msk.f32.gmra.mrb[14].mxu0 %vm789_vm4, %v9565_v19 }
 0x372   :  { %7721 = vmatpush3.msra.mxu0 %v9571_v1  ;;  %7698 = vmatprep.mubr.msk.f32.mxu0 %vm9148_vm3, %v9149_v21 }
 0x373   :  { %8439 = vmatprep.subr.bf16.mxu0 %v9147_v9 }
 0x375   :  { %7699 = vmatmul.mubr.msk.f32.gmra.mrb[16].mxu0 %vm789_vm4, %v9578_v3 }
 0x376   :  { %7722 = vmatprep.mubr.msk.f32.mxu0 %vm9148_vm3, %v9149_v21 }
 0x438   :  { %v874_v20 = vpop.f32.mrb[12].mxu1 }
 0x439   :  { %v7679_v23 = vpop.f32.mrb[13].mxu1  ;;  %v875_v18 = vadd.f32 %v874_v20, %v9586_v27 }
 0x43b   :  { %v987_v22 = vsel %vm986_vm7, %v875_v18, -inf }
 0x43c   :  { %v879_v24 = vpop.f32.mrb[14].mxu1 }
 0x43d   :  { %v7682_v25 = vpop.f32.mrb[15].mxu1  ;;  %v880_v7 = vadd.f32 %v879_v24, %v9586_v27 }
 0x43f   :  { %v990_v13 = vsel %vm986_vm7, %v880_v7, -inf }
 0x440   :  { %v884_v28 = vpop.f32.mrb[16].mxu1  ;;  %v972_v29 = vpop.f32.mrb[12].mxu0 }
 0x441   :  { %v973_v31 = vadd.f32 %v972_v29, %v9586_v27  ;;  %v7685_v33 = vpop.f32.mrb[17].mxu1  ;;  %v7694_v36 = vpop.f32.mrb[13].mxu0  ;;  %v885_v12 = vadd.f32 %v884_v28, %v9586_v27 }
 0x443   :  { %v996_v37 = vsel %vm986_vm7, %v973_v31, -inf  ;;  %v993_v17 = vsel %vm986_vm7, %v885_v12, -inf }
 0x444   :  { %997 = vmax.xlane.f32.xlu0 %v996_v37  ;;  %v977_v38 = vpop.f32.mrb[14].mxu0 }
 0x445   :  { %v978_v15 = vadd.f32 %v977_v38, %v9586_v27  ;;  %v7697_v39 = vpop.f32.mrb[15].mxu0 }
 0x447   :  { %v999_v40 = vsel %vm986_vm7, %v978_v15, -inf }
 0x448   :  { %1000 = vmax.xlane.f32.xlu1 %v999_v40  ;;  %v982_v42 = vpop.f32.mrb[16].mxu0 }
 0x449   :  { %v983_v45 = vadd.f32 %v982_v42, %v9586_v27  ;;  %v7700_v46 = vpop.f32.mrb[17].mxu0 }
 0x44b   :  { %v1002_v47 = vsel %vm986_vm7, %v983_v45, -inf }
 0x44c   :  { %1003 = vmax.xlane.f32.xlu0 %v1002_v47 }
 0x4d1   :  { %v998_v48 = vpop.xlane.xlu0 %997 }
 0x4d2   :  { %v1008_v49 = vsub.f32 %v973_v31, %v998_v48 }
 0x4d4   :  { %v1017_v52 = vmul.f32 1.442695, %v1008_v49 }
 0x4d5   :  { %v1001_v53 = vpop.xlane.xlu1 %1000 }
 0x4d6   :  { %8828 = vpow2.f32 %v1017_v52  ;;  %v1009_v54 = vsub.f32 %v978_v15, %v1001_v53 }
 0x4d8   :  { %v1019_v58 = vmul.f32 1.442695, %v1009_v54 }
 0x4d9   :  { %v1004_v0 = vpop.xlane.xlu0 %1003 }
 0x4da   :  { %8830 = vpow2.f32 %v1019_v58  ;;  %v1010_v2 = vsub.f32 %v983_v45, %v1004_v0 }
 0x4dc   :  { %v1021_v4 = vmul.f32 1.442695, %v1010_v2 }
 0x4de   :  { %8832 = vpow2.f32 %v1021_v4 }
 0x4e0   :  { %v8829_v59 = vpop.eup %8828 }
 0x4e1   :  { %v1032_v61 = vsel %vm986_vm7, %v8829_v59, 0.0 }
 0x4e2   :  { %1033 = vadd.xlane.f32.xlu1 %v1032_v61 }
 0x4e4   :  { %v8831_v62 = vpop.eup %8830 }
 0x4e5   :  { %v1035_v63 = vsel %vm986_vm7, %v8831_v62, 0.0 }
 0x4e6   :  { %1036 = vadd.xlane.f32.xlu0 %v1035_v63 }
 0x4e8   :  { %v8833_v5 = vpop.eup %8832 }
 0x4e9   :  { %v1038_v10 = vsel %vm986_vm7, %v8833_v5, 0.0 }
 0x4f3   :  { %1345 = vrot.lane.b32.xlu1 %v9544_v16, %s9151_s0 }
 0x4f7   :  { %1335 = vrot.lane.b32.xlu1 %v9551_v56, %s9151_s0 }
 0x4fc   :  { %8697 = vrot.lane.b32.xlu0 %v9524_v8, %s9151_s0 }
 0x500   :  { %1339 = vrot.lane.b32.xlu0 %v9578_v3, %s9151_s0 }
 0x51b   :  { %1039 = vadd.xlane.f32.xlu1 %v1038_v10 }
 0x51f   :  { %991 = vmax.xlane.f32.xlu0 %v990_v13 }
 0x523   :  { %994 = vmax.xlane.f32.xlu0 %v993_v17 }
 0x52c   :  { %1337 = vrot.lane.b32.xlu1 %v9565_v19, %s9151_s0 }
 0x550   :  { %988 = vmax.xlane.f32.xlu1 %v987_v22 }
 0x56f   :  { %v1034_v23 = vpop.xlane.xlu1 %1033 }
 0x570   :  { %8834 = vrcp.f32 %v1034_v23 }
 0x573   :  { %v1037_v24 = vpop.xlane.xlu0 %1036  ;;  %v1346_v37 = vpop.permute.xlu1 %1345 }
 0x574   :  { %8836 = vrcp.f32 %v1037_v24 }
 0x577   :  { %v8698_v25 = vpop.permute.xlu0 %8697  ;;  %v1336_v38 = vpop.permute.xlu1 %1335 }
 0x578   :  { %v8700_v26 = vunpack.i.h.bf16 %v8698_v25  ;;  %v8699_v28 = vunpack.i.l.bf16 %v8698_v25 }
 0x57a   :  { %v8835_v29 = vpop.eup %8834  ;;  %v8440_v31 = vpack.c.bf16 %v8700_v26, %v8699_v28 }
 0x57b   :  { %v1048_v33 = vmul.f32 %v8835_v29, %v8829_v59  ;;  %v1340_v15 = vpop.permute.xlu0 %1339 }
 0x57d   :  { %7723 = vmatmul.mubr.msk.f32.vlgmr.msra.gmra.mrb[18].mxu0 %vm986_vm7, %v1048_v33 }
 0x57e   :  { %v8837_v36 = vpop.eup %8836  ;;  %8442 = vmatpush3.bf16.xpose.msk.msra.mxu0 %vm9512_vm5, %v8440_v31  ;;  %7725 = vmatprep.mubr.msk.f32.mxu0 %vm9148_vm3, %v9149_v21 }
 0x57f   :  { %v1050_v20 = vmul.f32 %v8837_v36, %v8831_v62  ;;  %7750 = vmatprep.subr.mxu0 %v9149_v21 }
 0x581   :  { %7726 = vmatmul.mubr.msk.f32.gmra.mrb[20].mxu0 %vm986_vm7, %v1050_v20 }
 0x582   :  { %7728 = vmatprep.mubr.msk.f32.mxu0 %vm9148_vm3, %v9149_v21 }
 0x586   :  { %7751 = vmatpush3.xpose.msk.msra.mxu0 %vm789_vm4, %v1346_v37 }
 0x587   :  { %8446 = vmatprep.subr.bf16.mxu0 %v9147_v9 }
 0x5a8   :  { %v1040_v39 = vpop.xlane.xlu1 %1039 }
 0x5a9   :  { %8838 = vrcp.f32 %v1040_v39 }
 0x5ac   :  { %v992_v40 = vpop.xlane.xlu0 %991  ;;  %v1338_v52 = vpop.permute.xlu1 %1337 }
 0x5ad   :  { %v1006_v42 = vsub.f32 %v880_v7, %v992_v40 }
 0x5af   :  { %v1013_v45 = vmul.f32 1.442695, %v1006_v42 }
 0x5b0   :  { %v995_v53 = vpop.xlane.xlu0 %994 }
 0x5b1   :  { %8840 = vpow2.f32 %v1013_v45  ;;  %v1007_v54 = vsub.f32 %v885_v12, %v995_v53 }
 0x5b3   :  { %v8839_v46 = vpop.eup %8838  ;;  %v1015_v61 = vmul.f32 1.442695, %v1007_v54 }
 0x5b4   :  { %v1052_v47 = vmul.f32 %v8839_v46, %v8833_v5 }
 0x5b6   :  { %7729 = vmatmul.mubr.msk.f32.gmra.mrb[22].mxu0 %vm986_vm7, %v1052_v47 }
 0x5b7   :  { %7752 = vmatprep.mubr.msk.f32.mxu0 %vm9148_vm3, %v9149_v21 }
 0x5ba   :  { %7753 = vmatmul.mubr.msk.f32.vlgmr.msra.gmra.mrb[24].mxu0 %vm789_vm4, %v1336_v38 }
 0x5bb   :  { %v8841_v48 = vpop.eup %8840  ;;  %7755 = vmatprep.mubr.msk.f32.mxu0 %vm9148_vm3, %v9149_v21 }
 0x5bc   :  { %v1026_v49 = vsel %vm986_vm7, %v8841_v48, 0.0 }
 0x5bd   :  { %1027 = vadd.xlane.f32.xlu1 %v1026_v49 }
 0x5be   :  { %7756 = vmatmul.mubr.msk.f32.gmra.mrb[26].mxu0 %vm789_vm4, %v1338_v52 }
 0x5bf   :  { %7758 = vmatprep.mubr.msk.f32.mxu0 %vm9148_vm3, %v9149_v21 }
 0x5c2   :  { %7759 = vmatmul.mubr.msk.f32.gmra.mrb[28].mxu0 %vm789_vm4, %v1340_v15 }
 0x5c3   :  { %7782 = vmatprep.mubr.msk.f32.mxu0 %vm9148_vm3, %v9149_v21 }
 0x5ce   :  { %8702 = vrot.lane.b32.xlu1 %v9516_v60, %s9151_s0 }
 0x5d2   :  { %1231 = vrot.lane.b32.xlu1 %v9530_v50, %s9151_s0 }
 0x5d6   :  { %1233 = vrot.lane.b32.xlu1 %v9538_v11, %s9151_s0 }
 0x5da   :  { %1235 = vrot.lane.b32.xlu1 %v9553_v57, %s9151_s0 }
 0x5dd   :  { %v989_v58 = vpop.xlane.xlu1 %988 }
 0x5de   :  { %v1005_v59 = vsub.f32 %v875_v18, %v989_v58 }
 0x5e0   :  { %v1011_v62 = vmul.f32 1.442695, %v1005_v59 }
 0x5e2   :  { %8842 = vpow2.f32 %v1011_v62 }
 0x5e3   :  { %8844 = vpow2.f32 %v1015_v61 }
 0x5ec   :  { %v8843_v63 = vpop.eup %8842 }
 0x5ed   :  { %v1023_v0 = vsel %vm986_vm7, %v8843_v63, 0.0  ;;  %v8845_v2 = vpop.eup %8844 }
 0x5ee   :  { %1024 = vadd.xlane.f32.xlu0 %v1023_v0  ;;  %v1029_v4 = vsel %vm986_vm7, %v8845_v2, 0.0 }
 0x5f2   :  { %1030 = vadd.xlane.f32.xlu0 %v1029_v4 }
 0x608   :  { %1241 = vrot.lane.b32.xlu0 %v9522_v6, %s9151_s0 }
 0x64a   :  { %v1028_v13 = vpop.xlane.xlu1 %1027 }
 0x64e   :  { %v8703_v22 = vpop.permute.xlu1 %8702 }
 0x64f   :  { %v8705_v23 = vunpack.i.h.bf16 %v8703_v22  ;;  %v8704_v24 = vunpack.i.l.bf16 %v8703_v22 }
 0x650   :  { %v9649_v5 = vpop.f32.mrb[18].mxu0 }
 0x651   :  { %v7724_v7 = vpop.f32.mrb[19].mxu0  ;;  %v8436_v29 = vpack.c.bf16 %v8705_v23, %v8704_v24 }
 0x652   :  { %v1232_v40 = vpop.permute.xlu1 %1231 }
 0x654   :  { %v9651_v10 = vpop.f32.mrb[20].mxu0 }
 0x655   :  { %v7727_v12 = vpop.f32.mrb[21].mxu0 }
 0x656   :  { %v1234_v53 = vpop.permute.xlu1 %1233 }
 0x65a   :  { %v1236_v61 = vpop.permute.xlu1 %1235 }
 0x67b   :  { %v1025_v17 = vpop.xlane.xlu0 %1024 }
 0x67c   :  { %8846 = vrcp.f32 %v1025_v17 }
 0x67d   :  { %8848 = vrcp.f32 %v1028_v13 }
 0x67f   :  { %v1031_v18 = vpop.xlane.xlu0 %1030 }
 0x680   :  { %8850 = vrcp.f32 %v1031_v18 }
 0x683   :  { %v1242_v45 = vpop.permute.xlu0 %1241 }
 0x686   :  { %v8847_v25 = vpop.eup %8846 }
 0x687   :  { %v1042_v26 = vmul.f32 %v8847_v25, %v8843_v63  ;;  %v8849_v28 = vpop.eup %8848 }
 0x688   :  { %v1044_v36 = vmul.f32 %v8849_v28, %v8841_v48 }
 0x689   :  { %7708 = vmatmul.mubr.msk.f32.vlgmr.msra.gmra.mrb[18].mxu1 %vm986_vm7, %v1042_v26  ;;  %v9654_v31 = vpop.f32.mrb[22].mxu0 }
 0x68a   :  { %8438 = vmatpush3.bf16.xpose.msk.msra.mxu1 %vm9512_vm5, %v8436_v29  ;;  %v7730_v33 = vpop.f32.mrb[23].mxu0  ;;  %7710 = vmatprep.mubr.msk.f32.mxu1 %vm9148_vm3, %v9149_v21  ;;  %v8851_v20 = vpop.eup %8850 }
 0x68b   :  { %7735 = vmatprep.subr.mxu1 %v9149_v21  ;;  %v1046_v39 = vmul.f32 %v8851_v20, %v8845_v2 }
 0x68d   :  { %7711 = vmatmul.mubr.msk.f32.gmra.mrb[20].mxu1 %vm986_vm7, %v1044_v36  ;;  %v1425_v37 = vpop.f32.mrb[24].mxu0 }
 0x68e   :  { %v1426_v38 = vadd.f32 %v1425_v37, %v9586_v27  ;;  %v7754_v15 = vpop.f32.mrb[25].mxu0  ;;  %7713 = vmatprep.mubr.msk.f32.mxu1 %vm9148_vm3, %v9149_v21 }
 0x690   :  { %v1448_v42 = vsel %vm986_vm7, %v1426_v38, -inf }
 0x691   :  { %7714 = vmatmul.mubr.msk.f32.gmra.mrb[22].mxu1 %vm986_vm7, %v1046_v39  ;;  %1449 = vmax.xlane.f32.xlu0 %v1448_v42  ;;  %v1430_v46 = vpop.f32.mrb[26].mxu0 }
 0x692   :  { %7736 = vmatpush3.xpose.msk.msra.mxu1 %vm789_vm4, %v1242_v45  ;;  %v1431_v47 = vadd.f32 %v1430_v46, %v9586_v27  ;;  %v7757_v48 = vpop.f32.mrb[27].mxu0  ;;  %7737 = vmatprep.mubr.msk.f32.mxu1 %vm9148_vm3, %v9149_v21 }
 0x693   :  { %8443 = vmatprep.subr.bf16.mxu1 %v9147_v9 }
 0x694   :  { %v1451_v49 = vsel %vm986_vm7, %v1431_v47, -inf }
 0x695   :  { %7738 = vmatmul.mubr.msk.f32.vlgmr.msra.gmra.mrb[24].mxu1 %vm789_vm4, %v1232_v40  ;;  %1452 = vmax.xlane.f32.xlu1 %v1451_v49  ;;  %v1435_v52 = vpop.f32.mrb[28].mxu0 }
 0x696   :  { %v1436_v54 = vadd.f32 %v1435_v52, %v9586_v27  ;;  %v7760_v58 = vpop.f32.mrb[29].mxu0  ;;  %7740 = vmatprep.mubr.msk.f32.mxu1 %vm9148_vm3, %v9149_v21 }
 0x698   :  { %v1454_v59 = vsel %vm986_vm7, %v1436_v54, -inf }
 0x699   :  { %7741 = vmatmul.mubr.msk.f32.gmra.mrb[26].mxu1 %vm789_vm4, %v1234_v53  ;;  %1455 = vmax.xlane.f32.xlu0 %v1454_v59 }
 0x69a   :  { %7743 = vmatprep.mubr.msk.f32.mxu1 %vm9148_vm3, %v9149_v21 }
 0x69d   :  { %7744 = vmatmul.mubr.msk.f32.gmra.mrb[28].mxu1 %vm789_vm4, %v1236_v61 }
 0x69e   :  { %7767 = vmatprep.mubr.msk.f32.mxu1 %vm9148_vm3, %v9149_v21 }
 0x6a6   :  { %1613 = vrot.lane.b32.xlu1 %v9571_v1, %s9151_s0 }
 0x6aa   :  { %8712 = vrot.lane.b32.xlu1 %v9516_v60, %s9152_s5 }
 0x6ae   :  { %1943 = vrot.lane.b32.xlu1 %v9522_v6, %s9152_s5 }
 0x71e   :  { %v1450_v62 = vpop.xlane.xlu0 %1449 }
 0x71f   :  { %v1460_v63 = vsub.f32 %v1426_v38, %v1450_v62 }
 0x721   :  { %v1469_v0 = vmul.f32 1.442695, %v1460_v63 }
 0x722   :  { %v1453_v2 = vpop.xlane.xlu1 %1452 }
 0x723   :  { %8852 = vpow2.f32 %v1469_v0  ;;  %v1461_v4 = vsub.f32 %v1431_v47, %v1453_v2 }
 0x725   :  { %v1471_v7 = vmul.f32 1.442695, %v1461_v4 }
 0x726   :  { %v1456_v12 = vpop.xlane.xlu0 %1455 }
 0x727   :  { %8854 = vpow2.f32 %v1471_v7  ;;  %v1462_v13 = vsub.f32 %v1436_v54, %v1456_v12  ;;  %v1614_v54 = vpop.permute.xlu1 %1613 }
 0x729   :  { %v1473_v17 = vmul.f32 1.442695, %v1462_v13 }
 0x72b   :  { %8856 = vpow2.f32 %v1473_v17  ;;  %v8713_v58 = vpop.permute.xlu1 %8712 }
 0x72d   :  { %v8853_v18 = vpop.eup %8852 }
 0x72e   :  { %v1484_v22 = vsel %vm986_vm7, %v8853_v18, 0.0 }
 0x72f   :  { %1485 = vadd.xlane.f32.xlu0 %v1484_v22  ;;  %v1944_v61 = vpop.permute.xlu1 %1943  ;;  %v8715_v22 = vunpack.i.h.bf16 %v8713_v58 }
 0x731   :  { %v8855_v23 = vpop.eup %8854 }
 0x732   :  { %v1487_v24 = vsel %vm986_vm7, %v8855_v23, 0.0 }
 0x733   :  { %1488 = vadd.xlane.f32.xlu0 %v1487_v24  ;;  %v8714_v24 = vunpack.i.l.bf16 %v8713_v58 }
 0x735   :  { %v9692_v25 = vpop.eup %8856 }
 0x736   :  { %v1490_v26 = vsel %vm986_vm7, %v9692_v25, 0.0 }
 0x737   :  { %1491 = vadd.xlane.f32.xlu1 %v1490_v26 }
 0x748   :  { %1933 = vrot.lane.b32.xlu1 %v9530_v50, %s9152_s5 }
 0x749   :  { %8707 = vrot.lane.b32.xlu0 %v9508_v51, %s9151_s0 }
 0x74c   :  { %1937 = vrot.lane.b32.xlu1 %v9553_v57, %s9152_s5 }
 0x74d   :  { %8717 = vrot.lane.b32.xlu0 %v9524_v8, %s9152_s5 }
 0x750   :  { %2037 = vrot.lane.b32.xlu1 %v9551_v56, %s9152_s5 }
 0x751   :  { %1935 = vrot.lane.b32.xlu0 %v9538_v11, %s9152_s5 }
 0x754   :  { %2041 = vrot.lane.b32.xlu1 %v9578_v3, %s9152_s5 }
 0x755   :  { %2047 = vrot.lane.b32.xlu0 %v9544_v16, %s9152_s5 }
 0x759   :  { %2039 = vrot.lane.b32.xlu0 %v9565_v19, %s9152_s5 }
 0x75c   :  { %v9714_v28 = vpop.f32.mrb[18].mxu1 }
 0x75d   :  { %v7709_v29 = vpop.f32.mrb[19].mxu1 }
 0x760   :  { %v9716_v33 = vpop.f32.mrb[20].mxu1 }
 0x761   :  { %v7712_v36 = vpop.f32.mrb[21].mxu1 }
 0x762   :  { %v8450_v36 = vpack.c.bf16 %v8715_v22, %v8714_v24 }
 0x764   :  { %v9718_v20 = vpop.f32.mrb[22].mxu1 }
 0x765   :  { %v7715_v37 = vpop.f32.mrb[23].mxu1 }
 0x768   :  { %v1321_v38 = vpop.f32.mrb[24].mxu1 }
 0x769   :  { %v7739_v15 = vpop.f32.mrb[25].mxu1  ;;  %v9721_v46 = vadd.f32 %v1321_v38, %v9586_v27 }
 0x76b   :  { %v1439_v49 = vsel %vm986_vm7, %v9721_v46, -inf }
 0x76c   :  { %v1326_v39 = vpop.f32.mrb[26].mxu1 }
 0x76d   :  { %v7742_v40 = vpop.f32.mrb[27].mxu1  ;;  %v9724_v47 = vadd.f32 %v1326_v39, %v9586_v27 }
 0x76f   :  { %v1442_v52 = vsel %vm986_vm7, %v9724_v47, -inf }
 0x770   :  { %v1331_v42 = vpop.f32.mrb[28].mxu1 }
 0x771   :  { %v7745_v45 = vpop.f32.mrb[29].mxu1  ;;  %v9727_v48 = vadd.f32 %v1331_v42, %v9586_v27 }
 0x773   :  { %v1445_v53 = vsel %vm986_vm7, %v9727_v48, -inf }
 0x778   :  { %1440 = vmax.xlane.f32.xlu0 %v1439_v49  ;;  %1443 = vmax.xlane.f32.xlu1 %v1442_v52 }
 0x77c   :  { %1446 = vmax.xlane.f32.xlu0 %v1445_v53 }
 0x7bc   :  { %v1486_v59 = vpop.xlane.xlu0 %1485 }
 0x7bd   :  { %8858 = vrcp.f32 %v1486_v59 }
 0x7c0   :  { %v1489_v62 = vpop.xlane.xlu0 %1488 }
 0x7c1   :  { %8860 = vrcp.f32 %v1489_v62 }
 0x7c4   :  { %v1492_v63 = vpop.xlane.xlu1 %1491  ;;  %v8708_v0 = vpop.permute.xlu0 %8707 }
 0x7c5   :  { %v8710_v2 = vunpack.i.h.bf16 %v8708_v0  ;;  %v8709_v4 = vunpack.i.l.bf16 %v8708_v0  ;;  %8862 = vrcp.f32 %v1492_v63 }
 0x7c7   :  { %v8447_v7 = vpack.c.bf16 %v8710_v2, %v8709_v4  ;;  %v8859_v12 = vpop.eup %8858 }
 0x7c8   :  { %v1500_v13 = vmul.f32 %v8859_v12, %v8853_v18  ;;  %v8718_v37 = vpop.permute.xlu0 %8717  ;;  %v1934_v15 = vpop.permute.xlu1 %1933 }
 0x7c9   :  { %8448 = vmatpush3.bf16.msra.mxu0 %v8447_v7  ;;  %v8719_v38 = vunpack.i.l.bf16 %v8718_v37 }
 0x7ca   :  { %7780 = vmatprep.subr.mxu0 %v9149_v21 }
 0x7cb   :  { %v8861_v17 = vpop.eup %8860 }
 0x7cc   :  { %v1502_v26 = vmul.f32 %v8861_v17, %v8855_v23  ;;  %v8720_v23 = vunpack.i.h.bf16 %v8718_v37  ;;  %v1938_v40 = vpop.permute.xlu1 %1937 }
 0x7cd   :  { %7781 = vmatpush3.msra.mxu0 %v1614_v54 }
 0x7ce   :  { %7783 = vmatmul.mubr.msk.f32.vlgmr.msra.gmra.mrb[30].mxu0 %vm986_vm7, %v1500_v13  ;;  %8449 = vmatprep.subr.bf16.mxu0 %v9147_v9  ;;  %v8454_v39 = vpack.c.bf16 %v8720_v23, %v8719_v38 }
 0x7cf   :  { %7785 = vmatprep.mubr.msk.f32.mxu0 %vm9148_vm3, %v9149_v21  ;;  %v8863_v29 = vpop.eup %8862 }
 0x7d0   :  { %v1504_v18 = vmul.f32 %v8863_v29, %v9692_v25  ;;  %v1936_v25 = vpop.permute.xlu0 %1935  ;;  %v2038_v45 = vpop.permute.xlu1 %2037 }
 0x7d2   :  { %7786 = vmatmul.mubr.msk.f32.gmra.mrb[32].mxu0 %vm986_vm7, %v1502_v26 }
 0x7d3   :  { %7788 = vmatprep.mubr.msk.f32.mxu0 %vm9148_vm3, %v9149_v21 }
 0x7d4   :  { %8452 = vmatpush3.bf16.xpose.msk.msra.mxu0 %vm9512_vm5, %v8450_v36  ;;  %v2048_v42 = vpop.permute.xlu0 %2047  ;;  %v2042_v52 = vpop.permute.xlu1 %2041 }
 0x7d5   :  { %7817 = vmatprep.subr.mxu0 %v9149_v21 }
 0x7d6   :  { %7789 = vmatmul.mubr.msk.f32.gmra.mrb[34].mxu0 %vm986_vm7, %v1504_v18 }
 0x7d7   :  { %7819 = vmatprep.mubr.msk.f32.mxu0 %vm9148_vm3, %v9149_v21 }
 0x7d8   :  { %v2040_v49 = vpop.permute.xlu0 %2039 }
 0x7dc   :  { %7818 = vmatpush3.xpose.msk.msra.mxu0 %vm789_vm4, %v1944_v61 }
 0x7dd   :  { %8453 = vmatprep.subr.bf16.mxu0 %v9147_v9 }
 0x7df   :  { %7820 = vmatmul.mubr.msk.f32.vlgmr.msra.gmra.mrb[36].mxu0 %vm789_vm4, %v1934_v15 }
 0x7e0   :  { %8456 = vmatpush3.bf16.xpose.msk.msra.mxu0 %vm9512_vm5, %v8454_v39  ;;  %7822 = vmatprep.mubr.msk.f32.mxu0 %vm9148_vm3, %v9149_v21 }
 0x7e1   :  { %7832 = vmatprep.subr.mxu0 %v9149_v21 }
 0x7e3   :  { %7823 = vmatmul.mubr.msk.f32.gmra.mrb[38].mxu0 %vm789_vm4, %v1936_v25 }
 0x7e4   :  { %7825 = vmatprep.mubr.msk.f32.mxu0 %vm9148_vm3, %v9149_v21 }
 0x7e7   :  { %7826 = vmatmul.mubr.msk.f32.gmra.mrb[40].mxu0 %vm789_vm4, %v1938_v40 }
 0x7e8   :  { %7833 = vmatpush3.xpose.msk.msra.mxu0 %vm789_vm4, %v2048_v42  ;;  %7834 = vmatprep.mubr.msk.f32.mxu0 %vm9148_vm3, %v9149_v21 }
 0x7e9   :  { %8460 = vmatprep.subr.bf16.mxu0 %v9147_v9 }
 0x7eb   :  { %7835 = vmatmul.mubr.msk.f32.vlgmr.msra.gmra.mrb[42].mxu0 %vm789_vm4, %v2038_v45 }
 0x7ec   :  { %7837 = vmatprep.mubr.msk.f32.mxu0 %vm9148_vm3, %v9149_v21 }
 0x7ef   :  { %7838 = vmatmul.mubr.msk.f32.gmra.mrb[44].mxu0 %vm789_vm4, %v2040_v49 }
 0x7f0   :  { %7840 = vmatprep.mubr.msk.f32.mxu0 %vm9148_vm3, %v9149_v21 }
 0x7f3   :  { %7841 = vmatmul.mubr.msk.f32.gmra.mrb[46].mxu0 %vm789_vm4, %v2042_v52 }
 0x7f4   :  { %7864 = vmatprep.mubr.msk.f32.mxu0 %vm9148_vm3, %v9149_v21 }
 0x805   :  { %v1444_v53 = vpop.xlane.xlu1 %1443  ;;  %v1441_v54 = vpop.xlane.xlu0 %1440 }
 0x806   :  { %v1458_v58 = vsub.f32 %v9724_v47, %v1444_v53  ;;  %v1457_v59 = vsub.f32 %v9721_v46, %v1441_v54 }
 0x808   :  { %v1463_v61 = vmul.f32 1.442695, %v1457_v59  ;;  %v1465_v62 = vmul.f32 1.442695, %v1458_v58 }
 0x809   :  { %v1447_v63 = vpop.xlane.xlu0 %1446 }
 0x80a   :  { %v1459_v0 = vsub.f32 %v9727_v48, %v1447_v63  ;;  %8864 = vpow2.f32 %v1463_v61 }
 0x80b   :  { %8866 = vpow2.f32 %v1465_v62 }
 0x80c   :  { %v1467_v2 = vmul.f32 1.442695, %v1459_v0 }
 0x80e   :  { %8868 = vpow2.f32 %v1467_v2 }
 0x814   :  { %v8865_v4 = vpop.eup %8864 }
 0x815   :  { %v1475_v7 = vsel %vm986_vm7, %v8865_v4, 0.0  ;;  %v8867_v12 = vpop.eup %8866 }
 0x816   :  { %1476 = vadd.xlane.f32.xlu0 %v1475_v7  ;;  %v1478_v47 = vsel %vm986_vm7, %v8867_v12, 0.0 }
 0x818   :  { %v8869_v13 = vpop.eup %8868 }
 0x819   :  { %v1481_v17 = vsel %vm986_vm7, %v8869_v13, 0.0 }
 0x81a   :  { %1482 = vadd.xlane.f32.xlu1 %v1481_v17  ;;  %1479 = vadd.xlane.f32.xlu0 %v1478_v47 }
 0x82b   :  { %1512 = vrot.lane.b32.xlu1 %v9542_v14, %s9151_s0 }
 0x830   :  { %8722 = vrot.lane.b32.xlu0 %v9503_v34, %s9151_s0 }
 0x8a1   :  { %v9785_v46 = vpop.f32.mrb[30].mxu0 }
 0x8a2   :  { %v7784_v48 = vpop.f32.mrb[31].mxu0 }
 0x8a3   :  { %v1477_v22 = vpop.xlane.xlu0 %1476 }
 0x8a4   :  { %8870 = vrcp.f32 %v1477_v22 }
 0x8a5   :  { %v9787_v24 = vpop.f32.mrb[32].mxu0 }
 0x8a6   :  { %v7787_v26 = vpop.f32.mrb[33].mxu0 }
 0x8a7   :  { %v1480_v29 = vpop.xlane.xlu0 %1479  ;;  %v1483_v37 = vpop.xlane.xlu1 %1482 }
 0x8a8   :  { %8872 = vrcp.f32 %v1480_v29 }
 0x8a9   :  { %v9789_v36 = vpop.f32.mrb[34].mxu0  ;;  %8874 = vrcp.f32 %v1483_v37 }
 0x8aa   :  { %v7790_v18 = vpop.f32.mrb[35].mxu0 }
 0x8ab   :  { %v8723_v23 = vpop.permute.xlu0 %8722  ;;  %v1513_v52 = vpop.permute.xlu1 %1512 }
 0x8ac   :  { %v8725_v38 = vunpack.i.h.bf16 %v8723_v23  ;;  %v8724_v15 = vunpack.i.l.bf16 %v8723_v23 }
 0x8ae   :  { %v8444_v39 = vpack.c.bf16 %v8725_v38, %v8724_v15  ;;  %v8871_v25 = vpop.eup %8870 }
 0x8af   :  { %v1494_v49 = vmul.f32 %v8871_v25, %v8865_v4  ;;  %v786_v25 = vld [vmem:[%s9228_s6 + $0x8] sm:$0xff] }
 0x8b0   :  { %8445 = vmatpush3.bf16.msra.mxu1 %v8444_v39 }
 0x8b1   :  { %7765 = vmatprep.subr.mxu1 %v9149_v21 }
 0x8b2   :  { %v2023_v40 = vpop.f32.mrb[36].mxu0  ;;  %v8873_v53 = vpop.eup %8872 }
 0x8b3   :  { %v2024_v42 = vadd.f32 %v2023_v40, %v9586_v27  ;;  %v7821_v45 = vpop.f32.mrb[37].mxu0  ;;  %v1496_v62 = vmul.f32 %v8873_v53, %v8867_v12  ;;  %v8875_v63 = vpop.eup %8874  ;;  %v785_v40 = vld [vmem:[%s9228_s6] sm:$0xff] }
 0x8b4   :  { %7766 = vmatpush3.msra.mxu1 %v1513_v52  ;;  %v1498_v17 = vmul.f32 %v8875_v63, %v8869_v13 }
 0x8b5   :  { %v2141_v54 = vsel %vm986_vm7, %v2024_v42, -inf  ;;  %7768 = vmatmul.mubr.msk.f32.vlgmr.msra.gmra.mrb[30].mxu1 %vm986_vm7, %v1494_v49  ;;  %7791 = vmatprep.subr.mxu1 %v786_v25 }
 0x8b6   :  { %2142 = vmax.xlane.f32.xlu1 %v2141_v54  ;;  %v2028_v58 = vpop.f32.mrb[38].mxu0  ;;  %7770 = vmatprep.mubr.msk.f32.mxu1 %vm9148_vm3, %v9149_v21 }
 0x8b7   :  { %v2029_v59 = vadd.f32 %v2028_v58, %v9586_v27  ;;  %v7824_v61 = vpop.f32.mrb[39].mxu0  ;;  %7792 = vmatpush3.msra.mxu1 %v786_v25 }
 0x8b8   :  { %7802 = vmatprep.subr.mxu1 %v785_v40 }
 0x8b9   :  { %v2144_v0 = vsel %vm986_vm7, %v2029_v59, -inf  ;;  %7771 = vmatmul.mubr.msk.f32.gmra.mrb[32].mxu1 %vm986_vm7, %v1496_v62 }
 0x8ba   :  { %2145 = vmax.xlane.f32.xlu0 %v2144_v0  ;;  %v2033_v2 = vpop.f32.mrb[40].mxu0  ;;  %7773 = vmatprep.mubr.msk.f32.mxu1 %vm9148_vm3, %v9149_v21 }
 0x8bb   :  { %v2034_v4 = vadd.f32 %v2033_v2, %v9586_v27  ;;  %v7827_v7 = vpop.f32.mrb[41].mxu0 }
 0x8bd   :  { %v2147_v47 = vsel %vm986_vm7, %v2034_v4, -inf  ;;  %7774 = vmatmul.mubr.msk.f32.gmra.mrb[34].mxu1 %vm986_vm7, %v1498_v17 }
 0x8be   :  { %2148 = vmax.xlane.f32.xlu1 %v2147_v47  ;;  %v2127_v12 = vpop.f32.mrb[42].mxu0 }
 0x8bf   :  { %v2128_v48 = vadd.f32 %v2127_v12, %v9586_v27  ;;  %v7836_v22 = vpop.f32.mrb[43].mxu0 }
 0x8c1   :  { %v2150_v26 = vsel %vm986_vm7, %v2128_v48, -inf }
 0x8c2   :  { %2151 = vmax.xlane.f32.xlu0 %v2150_v26  ;;  %v2132_v29 = vpop.f32.mrb[44].mxu0 }
 0x8c3   :  { %v2133_v18 = vadd.f32 %v2132_v29, %v9586_v27  ;;  %v7839_v37 = vpop.f32.mrb[45].mxu0 }
 0x8c5   :  { %v2153_v13 = vsel %vm986_vm7, %v2133_v18, -inf }
 0x8c6   :  { %2154 = vmax.xlane.f32.xlu0 %v2153_v13  ;;  %v2137_v23 = vpop.f32.mrb[46].mxu0 }
 0x8c7   :  { %v2138_v38 = vadd.f32 %v2137_v23, %v9586_v27  ;;  %v7842_v15 = vpop.f32.mrb[47].mxu0 }
 0x8c9   :  { %v2156_v39 = vsel %vm986_vm7, %v2138_v38, -inf }
 0x8ca   :  { %2157 = vmax.xlane.f32.xlu1 %v2156_v39 }
 0x943   :  { %v2143_v45 = vpop.xlane.xlu1 %2142 }
 0x944   :  { %v2159_v49 = vsub.f32 %v2024_v42, %v2143_v45 }
 0x946   :  { %v2165_v52 = vmul.f32 1.442695, %v2159_v49 }
 0x947   :  { %v2146_v53 = vpop.xlane.xlu0 %2145 }
 0x948   :  { %8876 = vpow2.f32 %v2165_v52  ;;  %v2160_v54 = vsub.f32 %v2029_v59, %v2146_v53 }
 0x94a   :  { %v2167_v58 = vmul.f32 1.442695, %v2160_v54 }
 0x94b   :  { %v2149_v61 = vpop.xlane.xlu1 %2148 }
 0x94c   :  { %8878 = vpow2.f32 %v2167_v58  ;;  %v2161_v62 = vsub.f32 %v2034_v4, %v2149_v61 }
 0x94e   :  { %v2169_v63 = vmul.f32 1.442695, %v2161_v62 }
 0x94f   :  { %v2152_v0 = vpop.xlane.xlu0 %2151 }
 0x950   :  { %8880 = vpow2.f32 %v2169_v63  ;;  %v2162_v2 = vsub.f32 %v2128_v48, %v2152_v0 }
 0x952   :  { %v9813_v7 = vpop.eup %8876  ;;  %v2171_v17 = vmul.f32 1.442695, %v2162_v2 }
 0x953   :  { %v2155_v47 = vpop.xlane.xlu0 %2154  ;;  %v2177_v12 = vsel %vm986_vm7, %v9813_v7, 0.0 }
 0x954   :  { %8882 = vpow2.f32 %v2171_v17  ;;  %v2163_v42 = vsub.f32 %v2133_v18, %v2155_v47  ;;  %2178 = vadd.xlane.f32.xlu0 %v2177_v12 }
 0x956   :  { %v9817_v22 = vpop.eup %8878  ;;  %v2173_v59 = vmul.f32 1.442695, %v2163_v42 }
 0x957   :  { %v2180_v4 = vsel %vm986_vm7, %v9817_v22, 0.0  ;;  %v2158_v23 = vpop.xlane.xlu1 %2157 }
 0x958   :  { %8884 = vpow2.f32 %v2173_v59  ;;  %2181 = vadd.xlane.f32.xlu1 %v2180_v4  ;;  %v2164_v15 = vsub.f32 %v2138_v38, %v2158_v23 }
 0x95a   :  { %v9821_v26 = vpop.eup %8880  ;;  %v2175_v39 = vmul.f32 1.442695, %v2164_v15 }
 0x95b   :  { %v2183_v48 = vsel %vm986_vm7, %v9821_v26, 0.0 }
 0x95c   :  { %2184 = vadd.xlane.f32.xlu1 %v2183_v48  ;;  %8886 = vpow2.f32 %v2175_v39 }
 0x95e   :  { %v9825_v29 = vpop.eup %8882 }
 0x95f   :  { %v2186_v18 = vsel %vm986_vm7, %v9825_v29, 0.0 }
 0x960   :  { %2187 = vadd.xlane.f32.xlu0 %v2186_v18 }
 0x962   :  { %v9829_v37 = vpop.eup %8884 }
 0x963   :  { %v2189_v13 = vsel %vm986_vm7, %v9829_v37, 0.0 }
 0x964   :  { %2190 = vadd.xlane.f32.xlu0 %v2189_v13 }
 0x96d   :  { %8732 = vrot.lane.b32.xlu1 %v9508_v51, %s9152_s5 }
 0x971   :  { %2211 = vrot.lane.b32.xlu1 %v9542_v14, %s9152_s5 }
 0x97a   :  { %8727 = vrot.lane.b32.xlu0 %v9503_v34, %s9152_s5 }
 0x97e   :  { %8737 = vrot.lane.b32.xlu0 %v9516_v60, %s9153_s9  ;;  %v9852_v60 = vpop.eup %8886 }
 0x982   :  { %2532 = vrot.lane.b32.xlu0 %v9522_v6, %s9153_s9 }
 0x986   :  { %2636 = vrot.lane.b32.xlu0 %v9544_v16, %s9153_s9 }
 0x988   :  { %v1592_v25 = vpop.f32.mrb[30].mxu1 }
 0x989   :  { %v7769_v45 = vpop.f32.mrb[31].mxu1  ;;  %7793 = vmatprep.mubr.msk.f32.mxu1 %vm789_vm4, %v1592_v25 }
 0x98a   :  { %2626 = vrot.lane.b32.xlu0 %v9551_v56, %s9153_s9  ;;  %v2192_v56 = vsel %vm986_vm7, %v9852_v60, 0.0 }
 0x98c   :  { %v1597_v49 = vpop.f32.mrb[32].mxu1 }
 0x98d   :  { %v7772_v52 = vpop.f32.mrb[33].mxu1  ;;  %7794 = vmatmul.mubr.msk.f32.vlgmr.msra.gmra.mrb[36].mxu1 %vm789_vm4, %v1597_v49 }
 0x98e   :  { %2628 = vrot.lane.b32.xlu0 %v9565_v19, %s9153_s9  ;;  %7803 = vmatpush3.msra.mxu1 %v785_v40 }
 0x98f   :  { %8457 = vmatprep.subr.bf16.mxu1 %v9147_v9 }
 0x990   :  { %v1602_v6 = vpop.f32.mrb[34].mxu1 }
 0x991   :  { %v7775_v16 = vpop.f32.mrb[35].mxu1  ;;  %7796 = vmatprep.mubr.msk.f32.mxu1 %vm789_vm4, %v1602_v6 }
 0x992   :  { %7797 = vmatmul.mubr.msk.f32.gmra.mrb[38].mxu1 %vm789_vm4, %v9785_v46 }
 0x993   :  { %7799 = vmatprep.mubr.msk.f32.mxu1 %vm789_vm4, %v9787_v24 }
 0x995   :  { %2193 = vadd.xlane.f32.xlu1 %v2192_v56 }
 0x996   :  { %7800 = vmatmul.mubr.msk.f32.gmra.mrb[40].mxu1 %vm789_vm4, %v9789_v36  ;;  %v787_v36 = vld [vmem:[%s9228_s6 + $0x10] sm:$0xff] }
 0x997   :  { %7804 = vmatprep.mubr.msk.f32.mxu1 %vm789_vm4, %v9714_v28 }
 0x99a   :  { %7805 = vmatmul.mubr.msk.f32.vlgmr.msra.gmra.mrb[36].mxu1 %vm789_vm4, %v9716_v33 }
 0x99b   :  { %7807 = vmatprep.mubr.msk.f32.mxu1 %vm789_vm4, %v9718_v20 }
 0x99e   :  { %7808 = vmatmul.mubr.msk.f32.gmra.mrb[38].mxu1 %vm789_vm4, %v9649_v5 }
 0x99f   :  { %7810 = vmatprep.mubr.msk.f32.mxu1 %vm789_vm4, %v9651_v10 }
 0x9a2   :  { %7811 = vmatmul.mubr.msk.f32.gmra.mrb[40].mxu1 %vm789_vm4, %v9654_v31 }
 0x9a3   :  { %7849 = vmatprep.mubr.msk.f32.mxu1 %vm9148_vm3, %v9149_v21 }
 0x9a6   :  { %2309 = vrot.lane.b32.xlu1 %v9571_v1, %s9152_s5 }
 0x9aa   :  { %8742 = vrot.lane.b32.xlu1 %v9524_v8, %s9153_s9 }
 0x9ae   :  { %2522 = vrot.lane.b32.xlu1 %v9530_v50, %s9153_s9 }
 0x9b2   :  { %2524 = vrot.lane.b32.xlu1 %v9538_v11, %s9153_s9 }
 0x9b6   :  { %2526 = vrot.lane.b32.xlu1 %v9553_v57, %s9153_s9 }
 0x9ba   :  { %2630 = vrot.lane.b32.xlu1 %v9578_v3, %s9153_s9 }
 0x9e1   :  { %v2179_v5 = vpop.xlane.xlu0 %2178 }
 0x9e2   :  { %8888 = vrcp.f32 %v2179_v5 }
 0x9e5   :  { %v2182_v19 = vpop.xlane.xlu1 %2181 }
 0x9e6   :  { %8890 = vrcp.f32 %v2182_v19 }
 0x9e9   :  { %v2185_v10 = vpop.xlane.xlu1 %2184 }
 0x9ea   :  { %8892 = vrcp.f32 %v2185_v10 }
 0x9ec   :  { %v8889_v24 = vpop.eup %8888 }
 0x9ed   :  { %v2188_v31 = vpop.xlane.xlu0 %2187  ;;  %v8733_v28 = vpop.permute.xlu1 %8732  ;;  %v2196_v38 = vmul.f32 %v8889_v24, %v9813_v7 }
 0x9ee   :  { %v8735_v33 = vunpack.i.h.bf16 %v8733_v28  ;;  %v8734_v8 = vunpack.i.l.bf16 %v8733_v28  ;;  %8894 = vrcp.f32 %v2188_v31 }
 0x9f0   :  { %v8461_v20 = vpack.c.bf16 %v8735_v33, %v8734_v8  ;;  %v8891_v53 = vpop.eup %8890 }
 0x9f1   :  { %v2191_v50 = vpop.xlane.xlu0 %2190  ;;  %v2212_v40 = vpop.permute.xlu1 %2211  ;;  %v2198_v54 = vmul.f32 %v8891_v53, %v9817_v22 }
 0x9f2   :  { %8462 = vmatpush3.bf16.msra.mxu0 %v8461_v20  ;;  %8896 = vrcp.f32 %v2191_v50 }
 0x9f3   :  { %7862 = vmatprep.subr.mxu0 %v9149_v21 }
 0x9f4   :  { %v8893_v58 = vpop.eup %8892 }
 0x9f5   :  { %v8728_v11 = vpop.permute.xlu0 %8727  ;;  %v2200_v61 = vmul.f32 %v8893_v58, %v9821_v26 }
 0x9f6   :  { %v8730_v57 = vunpack.i.h.bf16 %v8728_v11  ;;  %v8729_v46 = vunpack.i.l.bf16 %v8728_v11 }
 0x9f8   :  { %v8458_v3 = vpack.c.bf16 %v8730_v57, %v8729_v46  ;;  %v8895_v63 = vpop.eup %8894 }
 0x9f9   :  { %v8738_v0 = vpop.permute.xlu0 %8737  ;;  %v2202_v2 = vmul.f32 %v8895_v63, %v9825_v29 }
 0x9fa   :  { %8459 = vmatpush3.bf16.msra.mxu1 %v8458_v3  ;;  %v8740_v47 = vunpack.i.h.bf16 %v8738_v0  ;;  %v8739_v12 = vunpack.i.l.bf16 %v8738_v0 }
 0x9fb   :  { %7847 = vmatprep.subr.mxu1 %v9149_v21 }
 0x9fc   :  { %v8897_v17 = vpop.eup %8896  ;;  %v8464_v22 = vpack.c.bf16 %v8740_v47, %v8739_v12 }
 0x9fd   :  { %v2204_v42 = vmul.f32 %v8897_v17, %v9829_v37  ;;  %v2533_v29 = vpop.permute.xlu0 %2532 }
 0x9fe   :  { %7848 = vmatpush3.msra.mxu1 %v2212_v40 }
 0x9ff   :  { %7850 = vmatmul.mubr.msk.f32.vlgmr.msra.gmra.mrb[42].mxu1 %vm986_vm7, %v2196_v38  ;;  %7873 = vmatprep.subr.mxu1 %v787_v36 }
 0xa00   :  { %7852 = vmatprep.mubr.msk.f32.mxu1 %vm9148_vm3, %v9149_v21  ;;  %7874 = vmatpush3.msra.mxu1 %v787_v36 }
 0xa01   :  { %8467 = vmatprep.subr.bf16.mxu1 %v9147_v9  ;;  %v2637_v6 = vpop.permute.xlu0 %2636 }
 0xa03   :  { %7853 = vmatmul.mubr.msk.f32.gmra.mrb[44].mxu1 %vm986_vm7, %v2198_v54 }
 0xa04   :  { %7855 = vmatprep.mubr.msk.f32.mxu1 %vm9148_vm3, %v9149_v21 }
 0xa05   :  { %v2627_v28 = vpop.permute.xlu0 %2626 }
 0xa07   :  { %7856 = vmatmul.mubr.msk.f32.gmra.mrb[46].mxu1 %vm986_vm7, %v2200_v61 }
 0xa09   :  { %v2629_v33 = vpop.permute.xlu0 %2628 }
 0xa22   :  { %v2194_v62 = vpop.xlane.xlu1 %2193 }
 0xa23   :  { %8898 = vrcp.f32 %v2194_v62 }
 0xa26   :  { %v2310_v7 = vpop.permute.xlu1 %2309 }
 0xa27   :  { %7863 = vmatpush3.msra.mxu0 %v2310_v7 }
 0xa28   :  { %7865 = vmatmul.mubr.msk.f32.vlgmr.msra.gmra.mrb[48].mxu0 %vm986_vm7, %v2202_v2  ;;  %8463 = vmatprep.subr.bf16.mxu0 %v9147_v9 }
 0xa29   :  { %7867 = vmatprep.mubr.msk.f32.mxu0 %vm9148_vm3, %v9149_v21 }
 0xa2a   :  { %v8743_v4 = vpop.permute.xlu1 %8742 }
 0xa2b   :  { %v8745_v13 = vunpack.i.h.bf16 %v8743_v4  ;;  %v8744_v23 = vunpack.i.l.bf16 %v8743_v4 }
 0xa2c   :  { %7868 = vmatmul.mubr.msk.f32.gmra.mrb[50].mxu0 %vm986_vm7, %v2204_v42 }
 0xa2d   :  { %v8899_v59 = vpop.eup %8898  ;;  %7870 = vmatprep.mubr.msk.f32.mxu0 %vm9148_vm3, %v9149_v21  ;;  %v8468_v25 = vpack.c.bf16 %v8745_v13, %v8744_v23 }
 0xa2e   :  { %8466 = vmatpush3.bf16.xpose.msk.msra.mxu0 %vm9512_vm5, %v8464_v22  ;;  %v2206_v26 = vmul.f32 %v8899_v59, %v9852_v60  ;;  %v2523_v48 = vpop.permute.xlu1 %2522 }
 0xa2f   :  { %7888 = vmatprep.subr.mxu0 %v9149_v21 }
 0xa30   :  { %7871 = vmatmul.mubr.msk.f32.gmra.mrb[52].mxu0 %vm986_vm7, %v2206_v26 }
 0xa31   :  { %7890 = vmatprep.mubr.msk.f32.mxu0 %vm9148_vm3, %v9149_v21 }
 0xa32   :  { %v2525_v18 = vpop.permute.xlu1 %2524 }
 0xa36   :  { %7889 = vmatpush3.xpose.msk.msra.mxu0 %vm789_vm4, %v2533_v29  ;;  %v2527_v37 = vpop.permute.xlu1 %2526 }
 0xa37   :  { %8471 = vmatprep.subr.bf16.mxu0 %v9147_v9 }
 0xa39   :  { %7891 = vmatmul.mubr.msk.f32.vlgmr.msra.gmra.mrb[54].mxu0 %vm789_vm4, %v2523_v48 }
 0xa3a   :  { %7893 = vmatprep.mubr.msk.f32.mxu0 %vm9148_vm3, %v9149_v21  ;;  %v2631_v11 = vpop.permute.xlu1 %2630 }
 0xa3d   :  { %7894 = vmatmul.mubr.msk.f32.gmra.mrb[56].mxu0 %vm789_vm4, %v2525_v18 }
 0xa3e   :  { %7896 = vmatprep.mubr.msk.f32.mxu0 %vm9148_vm3, %v9149_v21 }
 0xa41   :  { %7897 = vmatmul.mubr.msk.f32.gmra.mrb[58].mxu0 %vm789_vm4, %v2527_v37 }
 0xa42   :  { %7920 = vmatprep.mubr.msk.f32.mxu0 %vm9148_vm3, %v9149_v21 }
 0xad2   :  { %v2291_v15 = vpop.f32.mrb[42].mxu1 }
 0xad3   :  { %v7851_v39 = vpop.f32.mrb[43].mxu1  ;;  %7875 = vmatprep.mubr.msk.f32.mxu1 %vm789_vm4, %v2291_v15 }
 0xad6   :  { %v2296_v45 = vpop.f32.mrb[44].mxu1 }
 0xad7   :  { %v7854_v49 = vpop.f32.mrb[45].mxu1  ;;  %7876 = vmatmul.mubr.msk.f32.vlgmr.msra.gmra.mrb[36].mxu1 %vm789_vm4, %v2296_v45 }
 0xad8   :  { %8470 = vmatpush3.bf16.xpose.msk.msra.mxu1 %vm9512_vm5, %v8468_v25 }
 0xad9   :  { %7903 = vmatprep.subr.mxu1 %v9149_v21 }
 0xada   :  { %v2301_v52 = vpop.f32.mrb[46].mxu1 }
 0xadb   :  { %v7857_v60 = vpop.f32.mrb[47].mxu1  ;;  %7878 = vmatprep.mubr.msk.f32.mxu1 %vm789_vm4, %v2301_v52 }
 0xae0   :  { %7904 = vmatpush3.xpose.msk.msra.mxu1 %vm789_vm4, %v2637_v6 }
 0xae1   :  { %8474 = vmatprep.subr.bf16.mxu1 %v9147_v9 }
 0xafb   :  { %v2389_v16 = vpop.f32.mrb[48].mxu0 }
 0xafc   :  { %v7866_v56 = vpop.f32.mrb[49].mxu0  ;;  %7879 = vmatmul.mubr.msk.f32.gmra.mrb[38].mxu1 %vm789_vm4, %v2389_v16 }
 0xaff   :  { %v2394_v19 = vpop.f32.mrb[50].mxu0 }
 0xb00   :  { %v7869_v5 = vpop.f32.mrb[51].mxu0  ;;  %7881 = vmatprep.mubr.msk.f32.mxu1 %vm789_vm4, %v2394_v19 }
 0xb03   :  { %v2399_v10 = vpop.f32.mrb[52].mxu0 }
 0xb04   :  { %v7872_v31 = vpop.f32.mrb[53].mxu0  ;;  %7882 = vmatmul.mubr.msk.f32.gmra.mrb[40].mxu1 %vm789_vm4, %v2399_v10 }
 0xb05   :  { %7905 = vmatprep.mubr.msk.f32.mxu1 %vm9148_vm3, %v9149_v21 }
 0xb08   :  { %7906 = vmatmul.mubr.msk.f32.vlgmr.msra.gmra.mrb[48].mxu1 %vm789_vm4, %v2627_v28 }
 0xb09   :  { %7908 = vmatprep.mubr.msk.f32.mxu1 %vm9148_vm3, %v9149_v21 }
 0xb0c   :  { %v2612_v8 = vpop.f32.mrb[54].mxu0  ;;  %7909 = vmatmul.mubr.msk.f32.gmra.mrb[50].mxu1 %vm789_vm4, %v2629_v33 }
 0xb0d   :  { %v2613_v20 = vadd.f32 %v2612_v8, %v9586_v27  ;;  %v7892_v50 = vpop.f32.mrb[55].mxu0  ;;  %7911 = vmatprep.mubr.msk.f32.mxu1 %vm9148_vm3, %v9149_v21 }
 0xb0f   :  { %v2730_v57 = vsel %vm986_vm7, %v2613_v20, -inf }
 0xb10   :  { %7912 = vmatmul.mubr.msk.f32.gmra.mrb[52].mxu1 %vm789_vm4, %v2631_v11  ;;  %2731 = vmax.xlane.f32.xlu0 %v2730_v57  ;;  %v2617_v46 = vpop.f32.mrb[56].mxu0 }
 0xb11   :  { %v2618_v3 = vadd.f32 %v2617_v46, %v9586_v27  ;;  %v7895_v24 = vpop.f32.mrb[57].mxu0  ;;  %7935 = vmatprep.mubr.msk.f32.mxu1 %vm9148_vm3, %v9149_v21 }
 0xb13   :  { %v2733_v36 = vsel %vm986_vm7, %v2618_v3, -inf }
 0xb14   :  { %2734 = vmax.xlane.f32.xlu1 %v2733_v36  ;;  %v2622_v38 = vpop.f32.mrb[58].mxu0 }
 0xb15   :  { %v2623_v40 = vadd.f32 %v2622_v38, %v9586_v27  ;;  %v7898_v53 = vpop.f32.mrb[59].mxu0 }
 0xb17   :  { %v2736_v54 = vsel %vm986_vm7, %v2623_v40, -inf }
 0xb18   :  { %2737 = vmax.xlane.f32.xlu0 %v2736_v54 }
 0xb9d   :  { %v2732_v58 = vpop.xlane.xlu0 %2731 }
 0xb9e   :  { %v2748_v61 = vsub.f32 %v2613_v20, %v2732_v58 }
 0xba0   :  { %v2754_v63 = vmul.f32 1.442695, %v2748_v61 }
 0xba1   :  { %v2735_v62 = vpop.xlane.xlu1 %2734 }
 0xba2   :  { %v2749_v0 = vsub.f32 %v2618_v3, %v2735_v62  ;;  %8900 = vpow2.f32 %v2754_v63 }
 0xba4   :  { %v2756_v7 = vmul.f32 1.442695, %v2749_v0 }
 0xba5   :  { %v2738_v2 = vpop.xlane.xlu0 %2737 }
 0xba6   :  { %v2750_v17 = vsub.f32 %v2623_v40, %v2738_v2  ;;  %8902 = vpow2.f32 %v2756_v7 }
 0xba8   :  { %v2758_v22 = vmul.f32 1.442695, %v2750_v17 }
 0xbaa   :  { %8904 = vpow2.f32 %v2758_v22 }
 0xbac   :  { %v9962_v18 = vpop.eup %8900 }
 0xbad   :  { %v2766_v39 = vsel %vm986_vm7, %v9962_v18, 0.0 }
 0xbb0   :  { %v9968_v25 = vpop.eup %8902 }
 0xbb1   :  { %v2769_v45 = vsel %vm986_vm7, %v9968_v25, 0.0 }
 0xbb4   :  { %v9972_v49 = vpop.eup %8904 }
 0xbb5   :  { %v2772_v52 = vsel %vm986_vm7, %v9972_v49, 0.0 }
 0xbdb   :  { %v2716_v47 = vpop.f32.mrb[48].mxu1 }
 0xbdc   :  { %v2717_v12 = vadd.f32 %v2716_v47, %v9586_v27  ;;  %v7907_v42 = vpop.f32.mrb[49].mxu1 }
 0xbde   :  { %v2739_v59 = vsel %vm986_vm7, %v2717_v12, -inf }
 0xbdf   :  { %v2721_v4 = vpop.f32.mrb[50].mxu1  ;;  %2740 = vmax.xlane.f32.xlu0 %v2739_v59 }
 0xbe0   :  { %v2722_v26 = vadd.f32 %v2721_v4, %v9586_v27  ;;  %v7910_v48 = vpop.f32.mrb[51].mxu1 }
 0xbe2   :  { %v2742_v29 = vsel %vm986_vm7, %v2722_v26, -inf }
 0xbe3   :  { %v2726_v37 = vpop.f32.mrb[52].mxu1  ;;  %2743 = vmax.xlane.f32.xlu0 %v2742_v29  ;;  %v788_v29 = vld [vmem:[%s9228_s6 + $0x18] sm:$0xff]  ;;  %s10852_s6 = sld [smem:[#allocation13_spill]] }
 0xbe4   :  { %v2727_v13 = vadd.f32 %v2726_v37, %v9586_v27  ;;  %v7913_v23 = vpop.f32.mrb[53].mxu1 }
 0xbe6   :  { %v2745_v15 = vsel %vm986_vm7, %v2727_v13, -inf }
 0xbe7   :  { %2746 = vmax.xlane.f32.xlu1 %v2745_v15  ;;  %2767 = vadd.xlane.f32.xlu0 %v2766_v39 }
 0xbeb   :  { %2770 = vadd.xlane.f32.xlu1 %v2769_v45 }
 0xbef   :  { %2773 = vadd.xlane.f32.xlu1 %v2772_v52 }
 0xc00   :  { %8752 = vrot.lane.b32.xlu1 %v9508_v51, %s9153_s9 }
 0xc04   :  { %2800 = vrot.lane.b32.xlu1 %v9542_v14, %s9153_s9 }
 0xc6c   :  { %v2741_v60 = vpop.xlane.xlu0 %2740 }
 0xc6d   :  { %v2751_v6 = vsub.f32 %v2717_v12, %v2741_v60 }
 0xc6f   :  { %v2760_v16 = vmul.f32 1.442695, %v2751_v6 }
 0xc70   :  { %v2744_v56 = vpop.xlane.xlu0 %2743 }
 0xc71   :  { %8906 = vpow2.f32 %v2760_v16  ;;  %v2752_v19 = vsub.f32 %v2722_v26, %v2744_v56  ;;  %v7069_v16 = vld [vmem:[%s10841_s13] ss:$0 sm:$0xff] }
 0xc73   :  { %v2762_v5 = vmul.f32 1.442695, %v2752_v19 }
 0xc74   :  { %v2747_v10 = vpop.xlane.xlu1 %2746  ;;  %v2768_v38 = vpop.xlane.xlu0 %2767 }
 0xc75   :  { %8908 = vpow2.f32 %v2762_v5  ;;  %v2753_v31 = vsub.f32 %v2727_v13, %v2747_v10 }
 0xc77   :  { %v2764_v28 = vmul.f32 1.442695, %v2753_v31 }
 0xc78   :  { %v2771_v33 = vpop.xlane.xlu1 %2770 }
 0xc79   :  { %8910 = vpow2.f32 %v2764_v28 }
 0xc7b   :  { %v8907_v8 = vpop.eup %8906 }
 0xc7c   :  { %v2774_v20 = vpop.xlane.xlu1 %2773  ;;  %v2775_v51 = vsel %vm986_vm7, %v8907_v8, 0.0 }
 0xc7d   :  { %2776 = vadd.xlane.f32.xlu0 %v2775_v51 }
 0xc7f   :  { %v8909_v50 = vpop.eup %8908 }
 0xc80   :  { %v8753_v14 = vpop.permute.xlu1 %8752  ;;  %v2778_v11 = vsel %vm986_vm7, %v8909_v50, 0.0 }
 0xc81   :  { %v8755_v57 = vunpack.i.h.bf16 %v8753_v14  ;;  %v8754_v46 = vunpack.i.l.bf16 %v8753_v14  ;;  %2779 = vadd.xlane.f32.xlu0 %v2778_v11 }
 0xc83   :  { %v8911_v3 = vpop.eup %8910  ;;  %v8475_v24 = vpack.c.bf16 %v8755_v57, %v8754_v46 }
 0xc84   :  { %v2781_v36 = vsel %vm986_vm7, %v8911_v3, 0.0  ;;  %v2801_v53 = vpop.permute.xlu1 %2800 }
 0xc85   :  { %2782 = vadd.xlane.f32.xlu1 %v2781_v36  ;;  %8476 = vmatpush3.bf16.msra.mxu1 %v8475_v24 }
 0xc86   :  { %7933 = vmatprep.subr.mxu1 %v9149_v21 }
 0xc96   :  { %2898 = vrot.lane.b32.xlu1 %v9571_v1, %s9153_s9 }
 0xc97   :  { %8747 = vrot.lane.b32.xlu0 %v9503_v34, %s9153_s9 }
 0xd0a   :  { %v2777_v40 = vpop.xlane.xlu0 %2776 }
 0xd0b   :  { %8912 = vrcp.f32 %v2777_v40 }
 0xd0c   :  { %8914 = vrcp.f32 %v2768_v38 }
 0xd0e   :  { %v2780_v54 = vpop.xlane.xlu0 %2779 }
 0xd0f   :  { %8916 = vrcp.f32 %v2780_v54 }
 0xd10   :  { %8918 = vrcp.f32 %v2771_v33 }
 0xd12   :  { %v2783_v58 = vpop.xlane.xlu1 %2782  ;;  %v8748_v61 = vpop.permute.xlu0 %8747 }
 0xd13   :  { %8920 = vrcp.f32 %v2783_v58  ;;  %v8750_v62 = vunpack.i.h.bf16 %v8748_v61  ;;  %v8749_v63 = vunpack.i.l.bf16 %v8748_v61 }
 0xd14   :  { %8922 = vrcp.f32 %v2774_v20 }
 0xd15   :  { %v8913_v0 = vpop.eup %8912  ;;  %v8472_v2 = vpack.c.bf16 %v8750_v62, %v8749_v63 }
 0xd16   :  { %v2791_v1 = vmul.f32 %v8913_v0, %v8907_v8  ;;  %v2899_v7 = vpop.permute.xlu1 %2898  ;;  %v8915_v17 = vpop.eup %8914 }
 0xd17   :  { %8473 = vmatpush3.bf16.msra.mxu0 %v8472_v2  ;;  %7934 = vmatpush3.msra.mxu1 %v2899_v7  ;;  %v2785_v47 = vmul.f32 %v8915_v17, %v9962_v18 }
 0xd18   :  { %7936 = vmatmul.mubr.msk.f32.vlgmr.msra.gmra.mrb[54].mxu1 %vm986_vm7, %v2791_v1  ;;  %7918 = vmatprep.subr.mxu0 %v9149_v21 }
 0xd19   :  { %v8917_v34 = vpop.eup %8916  ;;  %7938 = vmatprep.mubr.msk.f32.mxu1 %vm9148_vm3, %v9149_v21  ;;  %7944 = vmatprep.subr.mxu1 %v788_v29 }
 0xd1a   :  { %v2793_v12 = vmul.f32 %v8917_v34, %v8909_v50  ;;  %v8919_v42 = vpop.eup %8918  ;;  %7945 = vmatpush3.msra.mxu1 %v788_v29 }
 0xd1b   :  { %7919 = vmatpush3.msra.mxu0 %v2801_v53  ;;  %v2787_v59 = vmul.f32 %v8919_v42, %v9968_v25 }
 0xd1c   :  { %7921 = vmatmul.mubr.msk.f32.vlgmr.msra.gmra.mrb[60].mxu0 %vm986_vm7, %v2785_v47  ;;  %7939 = vmatmul.mubr.msk.f32.gmra.mrb[56].mxu1 %vm986_vm7, %v2793_v12 }
 0xd1d   :  { %v8921_v22 = vpop.eup %8920  ;;  %7923 = vmatprep.mubr.msk.f32.mxu0 %vm9148_vm3, %v9149_v21  ;;  %7941 = vmatprep.mubr.msk.f32.mxu1 %vm9148_vm3, %v9149_v21 }
 0xd1e   :  { %v2795_v4 = vmul.f32 %v8921_v22, %v8911_v3  ;;  %v8923_v26 = vpop.eup %8922 }
 0xd1f   :  { %v2789_v48 = vmul.f32 %v8923_v26, %v9972_v49 }
 0xd20   :  { %7924 = vmatmul.mubr.msk.f32.gmra.mrb[62].mxu0 %vm986_vm7, %v2787_v59  ;;  %7942 = vmatmul.mubr.msk.f32.gmra.mrb[58].mxu1 %vm986_vm7, %v2795_v4 }
 0xd21   :  { %7926 = vmatprep.mubr.msk.f32.mxu0 %vm9148_vm3, %v9149_v21 }
 0xd24   :  { %7927 = vmatmul.mubr.msk.f32.gmra.mrb[64].mxu0 %vm986_vm7, %v2789_v48 }
 0xdeb   :  { %v2978_v18 = vpop.f32.mrb[54].mxu1 }
 0xdec   :  { %v7937_v37 = vpop.f32.mrb[55].mxu1 }
 0xdef   :  { %v2880_v13 = vpop.f32.mrb[60].mxu0  ;;  %v2983_v23 = vpop.f32.mrb[56].mxu1 }
 0xdf0   :  { %v7922_v15 = vpop.f32.mrb[61].mxu0  ;;  %v7940_v39 = vpop.f32.mrb[57].mxu1  ;;  %7946 = vmatprep.mubr.msk.f32.mxu1 %vm789_vm4, %v2880_v13 }
 0xdf3   :  { %v2885_v25 = vpop.f32.mrb[62].mxu0  ;;  %v2988_v45 = vpop.f32.mrb[58].mxu1 }
 0xdf4   :  { %v7925_v52 = vpop.f32.mrb[63].mxu0  ;;  %v7943_v60 = vpop.f32.mrb[59].mxu1  ;;  %7947 = vmatmul.mubr.msk.f32.vlgmr.msra.gmra.mrb[36].mxu1 %vm789_vm4, %v2885_v25 }
 0xdf5   :  { %v3235_v52 = vld [vmem:[%s10842_s17 + $0x8] sm:$0xff] }
 0xdf7   :  { %v2890_v49 = vpop.f32.mrb[64].mxu0 }
 0xdf8   :  { %v7928_v6 = vpop.f32.mrb[65].mxu0  ;;  %7949 = vmatprep.mubr.msk.f32.mxu1 %vm789_vm4, %v2890_v49  ;;  %v3236_v49 = vld [vmem:[%s10842_s17 + $0x10] sm:$0xff] }
 0xdf9   :  { %7950 = vmatmul.mubr.msk.f32.gmra.mrb[38].mxu1 %vm789_vm4, %v2978_v18  ;;  %v3237_v6 = vld [vmem:[%s10842_s17 + $0x18] sm:$0xff] }
 0xdfa   :  { %7952 = vmatprep.mubr.msk.f32.mxu1 %vm789_vm4, %v2983_v23 }
 0xdfd   :  { %7953 = vmatmul.mubr.msk.f32.gmra.mrb[40].mxu1 %vm789_vm4, %v2988_v45  ;;  %v3234_v45 = vld [vmem:[%s10842_s17] sm:$0xff] }
 0xdfe   :  { %v8477_v60 = vpack.c.bf16 %v3235_v52, %v3234_v45  ;;  %v3415_v45 = vld [vmem:[%s10845_s29 + $0x18] sm:$0xff] }
 0xe00   :  { %8478 = vmatprep.subr.bf16.mxu0 %v8477_v60 }
 0xe01   :  { %8480 = vmatpush3.bf16.msra.mxu0 %v8477_v60  ;;  %v3416_v60 = vld [vmem:[%s10845_s29 + $0x20] sm:$0xff] }
 0xec7   :  { %v7948_v56 = vpop.f32.mrb[36].mxu1 }
 0xec8   :  { %v3119_v19 = vadd.f32 %v7948_v56, %v7069_v16  ;;  %v3076_v5 = vpop.f32.mrb[37].mxu1 }
 0xec9   :  { %v3118_v10 = vadd.f32 %v7069_v16, %v3076_v5 }
 0xeca   :  { %v10015_v31 = vadd.f32 %v3119_v19, %v9396_v32 }
 0xecb   :  { %v10018_v28 = vadd.f32 %v3118_v10, %v9394_v30 }
 0xecc   :  { %v7951_v33 = vpop.f32.mrb[38].mxu1  ;;  %v3135_v8 = vsel %vm339_vm2, %v10015_v31, 0.0 }
 0xecd   :  { %v3121_v20 = vadd.f32 %v7951_v33, %v7069_v16  ;;  %3136 = vadd.xlane.f32.xlu1 %v3135_v8  ;;  %v3086_v51 = vpop.f32.mrb[39].mxu1  ;;  %v3132_v50 = vsel %vm339_vm2, %v10018_v28, 0.0 }
 0xece   :  { %v3120_v14 = vadd.f32 %v7069_v16, %v3086_v51  ;;  %3133 = vadd.xlane.f32.xlu0 %v3132_v50 }
 0xecf   :  { %v10025_v11 = vadd.f32 %v3121_v20, %v9404_v41 }
 0xed0   :  { %v7954_v32 = vpop.f32.mrb[40].mxu1  ;;  %v10028_v57 = vadd.f32 %v3120_v14, %v9400_v35 }
 0xed1   :  { %v3123_v30 = vadd.f32 %v7954_v32, %v7069_v16  ;;  %v3096_v46 = vpop.f32.mrb[41].mxu1  ;;  %v3141_v3 = vsel %vm339_vm2, %v10025_v11, 0.0 }
 0xed2   :  { %v3122_v24 = vadd.f32 %v7069_v16, %v3096_v46  ;;  %3142 = vadd.xlane.f32.xlu0 %v3141_v3  ;;  %v3138_v41 = vsel %vm339_vm2, %v10028_v57, 0.0  ;;  %v8481_v16 = vpack.c.bf16 %v3237_v6, %v3236_v49  ;;  %v3417_v49 = vld [vmem:[%s10845_s29 + $0x28] sm:$0xff] }
 0xed3   :  { %v10033_v36 = vadd.f32 %v3123_v30, %v9408_v43  ;;  %v8493_v6 = vpack.c.bf16 %v3417_v49, %v3416_v60 }
 0xed4   :  { %v10036_v38 = vadd.f32 %v3122_v24, %v9410_v44  ;;  %8482 = vmatprep.subr.bf16.mxu0 %v8481_v16 }
 0xed5   :  { %v3147_v35 = vsel %vm339_vm2, %v10033_v36, 0.0  ;;  %8484 = vmatpush3.bf16.msra.mxu0 %v8481_v16  ;;  %v3418_v16 = vld [vmem:[%s10845_s29 + $0x30] sm:$0xff] }
 0xed6   :  { %3139 = vadd.xlane.f32.xlu0 %v3138_v41  ;;  %3148 = vadd.xlane.f32.xlu1 %v3147_v35  ;;  %v3144_v40 = vsel %vm339_vm2, %v10036_v38, 0.0 }
 0xeda   :  { %3145 = vadd.xlane.f32.xlu0 %v3144_v40 }
 0xf5a   :  { %v3137_v53 = vpop.xlane.xlu1 %3136 }
 0xf5b   :  { %v3151_v54 = vmul.f32 0.03125, %v3137_v53  ;;  %v3134_v58 = vpop.xlane.xlu0 %3133  ;;  %v7070_v53 = vld [vmem:[%s10843_s21] ss:$0 sm:$0xff] }
 0xf5c   :  { %v3150_v43 = vmul.f32 0.03125, %v3134_v58 }
 0xf5d   :  { %v10045_v61 = vsub.f32 %v10015_v31, %v3151_v54 }
 0xf5e   :  { %v10048_v44 = vsub.f32 %v10018_v28, %v3150_v43 }
 0xf5f   :  { %v3143_v62 = vpop.xlane.xlu0 %3142  ;;  %v3163_v63 = vmul.f32 %v10045_v61, %v10045_v61 }
 0xf60   :  { %v3153_v0 = vmul.f32 0.03125, %v3143_v62  ;;  %v3162_v2 = vmul.f32 %v10048_v44, %v10048_v44 }
 0xf61   :  { %v3171_v1 = vsel %vm339_vm2, %v3163_v63, 0.0 }
 0xf62   :  { %v10056_v7 = vsub.f32 %v10025_v11, %v3153_v0  ;;  %3172 = vadd.xlane.f32.xlu1 %v3171_v1  ;;  %v3168_v17 = vsel %vm339_vm2, %v3162_v2, 0.0  ;;  %v7071_v0 = vld [vmem:[%s10844_s25] ss:$0 sm:$0xff] }
 0xf63   :  { %v3140_v34 = vpop.xlane.xlu0 %3139  ;;  %v3149_v47 = vpop.xlane.xlu1 %3148  ;;  %3169 = vadd.xlane.f32.xlu0 %v3168_v17 }
 0xf64   :  { %v3152_v12 = vmul.f32 0.03125, %v3140_v34  ;;  %v3155_v42 = vmul.f32 0.03125, %v3149_v47  ;;  %v3165_v22 = vmul.f32 %v10056_v7, %v10056_v7 }
 0xf66   :  { %v10062_v59 = vsub.f32 %v10028_v57, %v3152_v12  ;;  %v10065_v4 = vsub.f32 %v10033_v36, %v3155_v42  ;;  %v3177_v26 = vsel %vm339_vm2, %v3165_v22, 0.0 }
 0xf67   :  { %3178 = vadd.xlane.f32.xlu1 %v3177_v26  ;;  %v3146_v48 = vpop.xlane.xlu0 %3145 }
 0xf68   :  { %v3154_v29 = vmul.f32 0.03125, %v3146_v48  ;;  %v3167_v18 = vmul.f32 %v10065_v4, %v10065_v4  ;;  %v3164_v37 = vmul.f32 %v10062_v59, %v10062_v59 }
 0xf6a   :  { %v10073_v13 = vsub.f32 %v10036_v38, %v3154_v29  ;;  %v3183_v23 = vsel %vm339_vm2, %v3167_v18, 0.0  ;;  %v3174_v15 = vsel %vm339_vm2, %v3164_v37, 0.0 }
 0xf6b   :  { %3184 = vadd.xlane.f32.xlu1 %v3183_v23  ;;  %3175 = vadd.xlane.f32.xlu0 %v3174_v15  ;;  %v3413_v15 = vld [vmem:[%s10845_s29 + $0x8] sm:$0xff] }
 0xf6c   :  { %v3166_v39 = vmul.f32 %v10073_v13, %v10073_v13 }
 0xf6e   :  { %v3180_v25 = vsel %vm339_vm2, %v3166_v39, 0.0 }
 0xf6f   :  { %3181 = vadd.xlane.f32.xlu0 %v3180_v25  ;;  %v3414_v25 = vld [vmem:[%s10845_s29 + $0x10] sm:$0xff] }
 0xf70   :  { %v8489_v52 = vpack.c.bf16 %v3415_v45, %v3414_v25 }
 0xfef   :  { %v3173_v56 = vpop.xlane.xlu1 %3172 }
 0xff0   :  { %v3187_v19 = vmul.f32 0.03125, %v3173_v56  ;;  %v3170_v5 = vpop.xlane.xlu0 %3169  ;;  %v3419_v56 = vld [vmem:[%s10845_s29 + $0x38] sm:$0xff] }
 0xff1   :  { %v3186_v10 = vmul.f32 0.03125, %v3170_v5  ;;  %v7072_v5 = vld [vmem:[%s10846_s3] ss:$0 sm:$0xff] }
 0xff2   :  { %v3193_v33 = vadd.f32 1e-12, %v3187_v19  ;;  %v8497_v19 = vpack.c.bf16 %v3419_v56, %v3418_v16 }
 0xff3   :  { %v3192_v8 = vadd.f32 1e-12, %v3186_v10 }
 0xff4   :  { %8924 = vrsqrt.f32 %v3193_v33  ;;  %v3179_v20 = vpop.xlane.xlu1 %3178 }
 0xff5   :  { %8926 = vrsqrt.f32 %v3192_v8  ;;  %v3189_v51 = vmul.f32 0.03125, %v3179_v20 }
 0xff7   :  { %v3195_v50 = vadd.f32 1e-12, %v3189_v51 }
 0xff8   :  { %v3185_v14 = vpop.xlane.xlu1 %3184  ;;  %v3176_v32 = vpop.xlane.xlu0 %3175 }
 0xff9   :  { %8928 = vrsqrt.f32 %v3195_v50  ;;  %v3191_v30 = vmul.f32 0.03125, %v3185_v14  ;;  %v3188_v46 = vmul.f32 0.03125, %v3176_v32 }
 0xffb   :  { %v3197_v3 = vadd.f32 1e-12, %v3191_v30  ;;  %v3194_v24 = vadd.f32 1e-12, %v3188_v46 }
 0xffc   :  { %v3182_v41 = vpop.xlane.xlu0 %3181 }
 0xffd   :  { %8930 = vrsqrt.f32 %v3197_v3  ;;  %v3190_v35 = vmul.f32 0.03125, %v3182_v41 }
 0xffe   :  { %v8925_v40 = vpop.eup %8924  ;;  %8932 = vrsqrt.f32 %v3194_v24 }
 0xfff   :  { %v8927_v54 = vpop.eup %8926  ;;  %v3205_v58 = vmul.f32 %v8925_v40, %v10045_v61  ;;  %v3196_v43 = vadd.f32 1e-12, %v3190_v35 }
0x1000   :  { %v3204_v62 = vmul.f32 %v8927_v54, %v10048_v44 }
0x1001   :  { %v3217_v63 = vmul.f32 %v7070_v53, %v3205_v58  ;;  %8934 = vrsqrt.f32 %v3196_v43 }
0x1002   :  { %v3216_v2 = vmul.f32 %v7070_v53, %v3204_v62 }
0x1003   :  { %v8929_v1 = vpop.eup %8928  ;;  %v3229_v34 = vadd.f32 %v7071_v0, %v3217_v63 }
0x1004   :  { %v3228_v17 = vadd.f32 %v7071_v0, %v3216_v2  ;;  %v3207_v47 = vmul.f32 %v8929_v1, %v10056_v7 }
0x1006   :  { %7963 = vmatprep.mubr.msk.f32.mxu0 %vm339_vm2, %v3228_v17  ;;  %v3219_v22 = vmul.f32 %v7070_v53, %v3207_v47 }
0x1007   :  { %v8931_v12 = vpop.eup %8930  ;;  %7964 = vmatmul.mubr.msk.f32.vlgmr.msra.gmra.mrb[66].mxu0 %vm339_vm2, %v3229_v34 }
0x1008   :  { %v8933_v42 = vpop.eup %8932  ;;  %v3209_v44 = vmul.f32 %v8931_v12, %v10065_v4  ;;  %v3231_v37 = vadd.f32 %v7071_v0, %v3219_v22 }
0x1009   :  { %v3206_v61 = vmul.f32 %v8933_v42, %v10062_v59 }
0x100a   :  { %v3221_v23 = vmul.f32 %v7070_v53, %v3209_v44 }
0x100b   :  { %v8935_v26 = vpop.eup %8934  ;;  %v3218_v48 = vmul.f32 %v7070_v53, %v3206_v61 }
0x100c   :  { %v3208_v29 = vmul.f32 %v8935_v26, %v10073_v13  ;;  %v3233_v4 = vadd.f32 %v7071_v0, %v3221_v23  ;;  %v3412_v13 = vld [vmem:[%s10845_s29] sm:$0xff] }
0x100d   :  { %v3230_v18 = vadd.f32 %v7071_v0, %v3218_v48  ;;  %v8485_v39 = vpack.c.bf16 %v3413_v15, %v3412_v13 }
0x100e   :  { %v3220_v7 = vmul.f32 %v7070_v53, %v3208_v29 }
0x100f   :  { %7966 = vmatprep.mubr.msk.f32.mxu0 %vm339_vm2, %v3230_v18  ;;  %8486 = vmatprep.subr.bf16.mxu0 %v8485_v39 }
0x1010   :  { %7967 = vmatmul.mubr.msk.f32.gmra.mrb[68].mxu0 %vm339_vm2, %v3231_v37  ;;  %v3232_v59 = vadd.f32 %v7071_v0, %v3220_v7 }
0x1011   :  { %8488 = vmatpush3.bf16.msra.mxu0 %v8485_v39 }
0x1012   :  { %7969 = vmatprep.mubr.msk.f32.mxu0 %vm339_vm2, %v3232_v59  ;;  %8490 = vmatprep.subr.bf16.mxu0 %v8489_v52 }
0x1014   :  { %7970 = vmatmul.mubr.msk.f32.gmra.mrb[70].mxu0 %vm339_vm2, %v3233_v4 }
0x1015   :  { %8492 = vmatpush3.bf16.msra.mxu0 %v8489_v52 }
0x1016   :  { %8494 = vmatprep.subr.bf16.mxu0 %v8493_v6 }
0x1019   :  { %8496 = vmatpush3.bf16.msra.mxu0 %v8493_v6 }
0x101a   :  { %8498 = vmatprep.subr.bf16.mxu0 %v8497_v19 }
0x101d   :  { %8500 = vmatpush3.bf16.msra.mxu0 %v8497_v19 }
0x10da   :  { %v7965_v10 = vpop.f32.mrb[66].mxu0 }
0x10db   :  { %v3335_v33 = vadd.f32 %v7965_v10, %v7072_v5  ;;  %v3329_v8 = vpop.f32.mrb[67].mxu0 }
0x10dc   :  { %v3330_v20 = vadd.f32 %v7072_v5, %v3329_v8 }
0x10dd   :  { %v3359_v51 = vmul.f32 %v3335_v33, %v3335_v33 }
0x10de   :  { %v3358_v50 = vmul.f32 %v3330_v20, %v3330_v20 }
0x10df   :  { %v3365_v14 = vmul.f32 %v3359_v51, %v3335_v33 }
0x10e0   :  { %v3364_v32 = vmul.f32 %v3358_v50, %v3330_v20 }
0x10e1   :  { %v3371_v30 = vmul.f32 0.044715, %v3365_v14 }
0x10e2   :  { %v3370_v46 = vmul.f32 0.044715, %v3364_v32 }
0x10e3   :  { %v3377_v3 = vadd.f32 %v3371_v30, %v3335_v33  ;;  %v7968_v24 = vpop.f32.mrb[68].mxu0 }
0x10e4   :  { %v3376_v41 = vadd.f32 %v3370_v46, %v3330_v20  ;;  %v3345_v35 = vadd.f32 %v7968_v24, %v7072_v5  ;;  %v3339_v40 = vpop.f32.mrb[69].mxu0 }
0x10e5   :  { %v3383_v53 = vmul.f32 0.7978846, %v3377_v3  ;;  %v3340_v54 = vadd.f32 %v7072_v5, %v3339_v40 }
0x10e6   :  { %v3382_v58 = vmul.f32 0.7978846, %v3376_v41  ;;  %v3361_v43 = vmul.f32 %v3345_v35, %v3345_v35  ;;  %v7079_v41 = vld [vmem:[%s10847_s8] ss:$0 sm:$0xff] }
0x10e7   :  { %8936 = vtanh.f32 %v3383_v53  ;;  %v3360_v62 = vmul.f32 %v3340_v54, %v3340_v54  ;;  %v7971_v63 = vpop.f32.mrb[70].mxu0 }
0x10e8   :  { %8938 = vtanh.f32 %v3382_v58  ;;  %v3367_v0 = vmul.f32 %v3361_v43, %v3345_v35  ;;  %v3355_v2 = vadd.f32 %v7971_v63, %v7072_v5  ;;  %v3349_v1 = vpop.f32.mrb[71].mxu0 }
0x10e9   :  { %v3366_v17 = vmul.f32 %v3360_v62, %v3340_v54  ;;  %v3350_v34 = vadd.f32 %v7072_v5, %v3349_v1 }
0x10ea   :  { %v3373_v47 = vmul.f32 0.044715, %v3367_v0  ;;  %v3363_v12 = vmul.f32 %v3355_v2, %v3355_v2 }
0x10eb   :  { %v3372_v42 = vmul.f32 0.044715, %v3366_v17  ;;  %v3362_v61 = vmul.f32 %v3350_v34, %v3350_v34 }
0x10ec   :  { %v3379_v22 = vadd.f32 %v3373_v47, %v3345_v35  ;;  %v3369_v44 = vmul.f32 %v3363_v12, %v3355_v2 }
0x10ed   :  { %v3378_v26 = vadd.f32 %v3372_v42, %v3340_v54  ;;  %v3368_v48 = vmul.f32 %v3362_v61, %v3350_v34 }
0x10ee   :  { %v3385_v29 = vmul.f32 0.7978846, %v3379_v22  ;;  %v3375_v18 = vmul.f32 0.044715, %v3369_v44 }
0x10ef   :  { %v3384_v37 = vmul.f32 0.7978846, %v3378_v26  ;;  %v3374_v7 = vmul.f32 0.044715, %v3368_v48 }
0x10f0   :  { %8940 = vtanh.f32 %v3385_v29  ;;  %v3381_v23 = vadd.f32 %v3375_v18, %v3355_v2 }
0x10f1   :  { %v8937_v59 = vpop.eup %8936  ;;  %8942 = vtanh.f32 %v3384_v37  ;;  %v3380_v4 = vadd.f32 %v3374_v7, %v3350_v34 }
0x10f2   :  { %v8939_v13 = vpop.eup %8938  ;;  %v3395_v15 = vadd.f32 1.0, %v8937_v59  ;;  %v3387_v39 = vmul.f32 0.7978846, %v3381_v23 }
0x10f3   :  { %v3386_v25 = vmul.f32 0.7978846, %v3380_v4  ;;  %v3394_v45 = vadd.f32 1.0, %v8939_v13 }
0x10f4   :  { %v3401_v52 = vmul.f32 0.5, %v3395_v15  ;;  %8944 = vtanh.f32 %v3387_v39 }
0x10f5   :  { %8946 = vtanh.f32 %v3386_v25  ;;  %v3400_v60 = vmul.f32 0.5, %v3394_v45 }
0x10f6   :  { %v3407_v6 = vmul.f32 %v3401_v52, %v3335_v33 }
0x10f7   :  { %v3406_v49 = vmul.f32 %v3400_v60, %v3330_v20 }
0x10f9   :  { %7988 = vmatprep.mubr.msk.f32.mxu0 %vm3427_vm8, %v3406_v49 }
0x10fa   :  { %v8941_v16 = vpop.eup %8940  ;;  %7989 = vmatmul.mubr.msk.f32.vlgmr.msra.gmra.mrb[72].mxu0 %vm3427_vm8, %v3407_v6 }
0x10fb   :  { %v8943_v56 = vpop.eup %8942  ;;  %v3397_v19 = vadd.f32 1.0, %v8941_v16 }
0x10fc   :  { %v3396_v5 = vadd.f32 1.0, %v8943_v56 }
0x10fd   :  { %v3403_v10 = vmul.f32 0.5, %v3397_v19 }
0x10fe   :  { %v8945_v8 = vpop.eup %8944  ;;  %v3402_v51 = vmul.f32 0.5, %v3396_v5 }
0x10ff   :  { %v8947_v50 = vpop.eup %8946  ;;  %v3399_v14 = vadd.f32 1.0, %v8945_v8  ;;  %v3409_v46 = vmul.f32 %v3403_v10, %v3345_v35 }
0x1100   :  { %v3408_v32 = vmul.f32 %v3402_v51, %v3340_v54  ;;  %v3398_v30 = vadd.f32 1.0, %v8947_v50 }
0x1101   :  { %v3405_v3 = vmul.f32 0.5, %v3399_v14 }
0x1102   :  { %7991 = vmatprep.mubr.msk.f32.mxu0 %vm3427_vm8, %v3408_v32  ;;  %v3404_v33 = vmul.f32 0.5, %v3398_v30 }
0x1103   :  { %7992 = vmatmul.mubr.msk.f32.gmra.mrb[74].mxu0 %vm3427_vm8, %v3409_v46  ;;  %v3411_v24 = vmul.f32 %v3405_v3, %v3355_v2  ;;  %v3651_v46 = vld [vmem:[%s10848_s14] sm:$0xff]  ;;  %v3652_v3 = vld [vmem:[%s10848_s14 + $0x8] sm:$0xff] }
0x1104   :  { %v3410_v20 = vmul.f32 %v3404_v33, %v3350_v34  ;;  %v3781_v33 = vld [vmem:[%s10849_s19] sm:$0xff] }
0x1106   :  { %7994 = vmatprep.mubr.msk.f32.mxu0 %vm3427_vm8, %v3410_v20  ;;  %v8501_v20 = vpack.c.bf16 %v3652_v3, %v3651_v46 }
0x1107   :  { %7995 = vmatmul.mubr.msk.f32.gmra.mrb[76].mxu0 %vm3427_vm8, %v3411_v24  ;;  %v3782_v24 = vld [vmem:[%s10849_s19 + $0x8] sm:$0xff] }
0x1108   :  { %8502 = vmatprep.subr.bf16.mxu1 %v8501_v20 }
0x1109   :  { %8504 = vmatpush3.bf16.msra.mxu1 %v8501_v20 }
0x11cd   :  { %v7990_v40 = vpop.f32.mrb[72].mxu0 }
0x11ce   :  { %v3518_v53 = vadd.f32 %v7990_v40, %v7079_v41  ;;  %v3512_v58 = vpop.f32.mrb[73].mxu0  ;;  %v3653_v40 = vld [vmem:[%s10848_s14 + $0x10] sm:$0xff] }
0x11cf   :  { %v3513_v43 = vadd.f32 %v7079_v41, %v3512_v58  ;;  %v3783_v58 = vld [vmem:[%s10849_s19 + $0x10] sm:$0xff] }
0x11d0   :  { %v10115_v54 = vadd.f32 %v3518_v53, %v10015_v31  ;;  %v3654_v53 = vld [vmem:[%s10848_s14 + $0x18] sm:$0xff] }
0x11d1   :  { %v10118_v35 = vadd.f32 %v3513_v43, %v10018_v28  ;;  %v8505_v43 = vpack.c.bf16 %v3654_v53, %v3653_v40 }
0x11d2   :  { %v3552_v62 = vsel %vm339_vm2, %v10115_v54, 0.0 }
0x11d3   :  { %3553 = vadd.xlane.f32.xlu1 %v3552_v62  ;;  %v3549_v63 = vsel %vm339_vm2, %v10118_v35, 0.0  ;;  %v3784_v62 = vld [vmem:[%s10849_s19 + $0x18] sm:$0xff]  ;;  %8506 = vmatprep.subr.bf16.mxu1 %v8505_v43 }
0x11d4   :  { %3550 = vadd.xlane.f32.xlu0 %v3549_v63  ;;  %v8513_v63 = vpack.c.bf16 %v3784_v62, %v3783_v58  ;;  %8508 = vmatpush3.bf16.msra.mxu1 %v8505_v43 }
0x11d6   :  { %v7993_v0 = vpop.f32.mrb[74].mxu0 }
0x11d7   :  { %v3528_v2 = vadd.f32 %v7993_v0, %v7079_v41  ;;  %v3522_v1 = vpop.f32.mrb[75].mxu0  ;;  %v3887_v0 = vld [vmem:[%s10850_s24] sm:$0xff] }
0x11d8   :  { %v3523_v17 = vadd.f32 %v7079_v41, %v3522_v1 }
0x11d9   :  { %v10125_v34 = vadd.f32 %v3528_v2, %v10025_v11  ;;  %v3888_v2 = vld [vmem:[%s10850_s24 + $0x8] sm:$0xff] }
0x11da   :  { %v10128_v31 = vadd.f32 %v3523_v17, %v10028_v57  ;;  %v7996_v28 = vpop.f32.mrb[76].mxu0  ;;  %v8517_v1 = vpack.c.bf16 %v3888_v2, %v3887_v0 }
0x11db   :  { %v3538_v47 = vadd.f32 %v7996_v28, %v7079_v41  ;;  %v3532_v12 = vpop.f32.mrb[77].mxu0  ;;  %v3558_v42 = vsel %vm339_vm2, %v10125_v34, 0.0 }
0x11dc   :  { %v3533_v61 = vadd.f32 %v7079_v41, %v3532_v12  ;;  %3559 = vadd.xlane.f32.xlu1 %v3558_v42  ;;  %v3555_v22 = vsel %vm339_vm2, %v10128_v31, 0.0  ;;  %v8509_v41 = vpack.c.bf16 %v3782_v24, %v3781_v33  ;;  %8518 = vmatprep.subr.bf16.mxu1 %v8517_v1 }
0x11dd   :  { %v10135_v44 = vadd.f32 %v3538_v47, %v10033_v36  ;;  %3556 = vadd.xlane.f32.xlu0 %v3555_v22 }
0x11de   :  { %v10138_v11 = vadd.f32 %v3533_v61, %v10036_v38  ;;  %8510 = vmatprep.subr.bf16.mxu0 %v8509_v41 }
0x11df   :  { %v3564_v57 = vsel %vm339_vm2, %v10135_v44, 0.0  ;;  %8512 = vmatpush3.bf16.msra.mxu0 %v8509_v41 }
0x11e0   :  { %3565 = vadd.xlane.f32.xlu1 %v3564_v57  ;;  %v3561_v26 = vsel %vm339_vm2, %v10138_v11, 0.0  ;;  %8514 = vmatprep.subr.bf16.mxu0 %v8513_v63 }
0x11e1   :  { %3562 = vadd.xlane.f32.xlu0 %v3561_v26 }
0x11e3   :  { %8516 = vmatpush3.bf16.msra.mxu0 %v8513_v63 }
0x11e4   :  { %8525 = vmatprep.subr.bf16.mxu0 %v9147_v9 }
0x1260   :  { %v3554_v48 = vpop.xlane.xlu1 %3553 }
0x1261   :  { %v3568_v29 = vmul.f32 0.03125, %v3554_v48  ;;  %v3551_v18 = vpop.xlane.xlu0 %3550 }
0x1262   :  { %v3567_v37 = vmul.f32 0.03125, %v3551_v18 }
0x1263   :  { %v10145_v7 = vsub.f32 %v10115_v54, %v3568_v29 }
0x1264   :  { %v10148_v36 = vsub.f32 %v10118_v35, %v3567_v37 }
0x1265   :  { %v3580_v38 = vmul.f32 %v10145_v7, %v10145_v7 }
0x1266   :  { %v3579_v23 = vmul.f32 %v10148_v36, %v10148_v36 }
0x1267   :  { %v3588_v59 = vsel %vm339_vm2, %v3580_v38, 0.0 }
0x1268   :  { %3589 = vadd.xlane.f32.xlu1 %v3588_v59  ;;  %v3585_v4 = vsel %vm339_vm2, %v3579_v23, 0.0 }
0x1269   :  { %v3560_v13 = vpop.xlane.xlu1 %3559  ;;  %3586 = vadd.xlane.f32.xlu0 %v3585_v4  ;;  %v7086_v4 = vld [vmem:[%s10851_s30] ss:$0 sm:$0xff] }
0x126a   :  { %v3570_v15 = vmul.f32 0.03125, %v3560_v13  ;;  %v3557_v39 = vpop.xlane.xlu0 %3556 }
0x126b   :  { %v3569_v25 = vmul.f32 0.03125, %v3557_v39 }
0x126c   :  { %v10157_v45 = vsub.f32 %v10125_v34, %v3570_v15 }
0x126d   :  { %v10160_v52 = vsub.f32 %v10128_v31, %v3569_v25  ;;  %v3566_v60 = vpop.xlane.xlu1 %3565 }
0x126e   :  { %v3572_v49 = vmul.f32 0.03125, %v3566_v60  ;;  %v3563_v6 = vpop.xlane.xlu0 %3562  ;;  %v3582_v16 = vmul.f32 %v10157_v45, %v10157_v45 }
0x126f   :  { %v3571_v56 = vmul.f32 0.03125, %v3563_v6  ;;  %v3581_v19 = vmul.f32 %v10160_v52, %v10160_v52 }
0x1270   :  { %v10167_v5 = vsub.f32 %v10135_v44, %v3572_v49  ;;  %v3594_v10 = vsel %vm339_vm2, %v3582_v16, 0.0  ;;  %v7087_v16 = vld [vmem:[%s10852_s6] ss:$0 sm:$0xff] }
0x1271   :  { %v10171_v8 = vsub.f32 %v10138_v11, %v3571_v56  ;;  %3595 = vadd.xlane.f32.xlu1 %v3594_v10  ;;  %v3591_v51 = vsel %vm339_vm2, %v3581_v19, 0.0  ;;  %v3889_v19 = vld [vmem:[%s10850_s24 + $0x10] sm:$0xff]  ;;  %v3890_v10 = vld [vmem:[%s10850_s24 + $0x18] sm:$0xff] }
0x1272   :  { %3592 = vadd.xlane.f32.xlu0 %v3591_v51  ;;  %v3584_v50 = vmul.f32 %v10167_v5, %v10167_v5 }
0x1273   :  { %v3583_v14 = vmul.f32 %v10171_v8, %v10171_v8 }
0x1274   :  { %v3600_v32 = vsel %vm339_vm2, %v3584_v50, 0.0 }
0x1275   :  { %3601 = vadd.xlane.f32.xlu1 %v3600_v32  ;;  %v3597_v30 = vsel %vm339_vm2, %v3583_v14, 0.0  ;;  %v8521_v14 = vpack.c.bf16 %v3890_v10, %v3889_v19 }
0x1276   :  { %3598 = vadd.xlane.f32.xlu0 %v3597_v30 }
0x12f5   :  { %v3590_v17 = vpop.xlane.xlu1 %3589 }
0x12f6   :  { %v3604_v28 = vmul.f32 0.03125, %v3590_v17  ;;  %v3587_v47 = vpop.xlane.xlu0 %3586 }
0x12f7   :  { %v3603_v12 = vmul.f32 0.03125, %v3587_v47  ;;  %v7088_v47 = vld [vmem:[%s10854_s10] ss:$0 sm:$0xff] }
0x12f8   :  { %v3610_v42 = vadd.f32 1e-12, %v3604_v28 }
0x12f9   :  { %v3609_v61 = vadd.f32 1e-12, %v3603_v12 }
0x12fa   :  { %8948 = vrsqrt.f32 %v3610_v42 }
0x12fb   :  { %8950 = vrsqrt.f32 %v3609_v61 }
0x12fe   :  { %v3596_v22 = vpop.xlane.xlu1 %3595 }
0x12ff   :  { %v3606_v57 = vmul.f32 0.03125, %v3596_v22  ;;  %v3593_v26 = vpop.xlane.xlu0 %3592 }
0x1300   :  { %v3605_v48 = vmul.f32 0.03125, %v3593_v26 }
0x1301   :  { %v3612_v29 = vadd.f32 1e-12, %v3606_v57 }
0x1302   :  { %v3611_v18 = vadd.f32 1e-12, %v3605_v48  ;;  %v3602_v37 = vpop.xlane.xlu1 %3601 }
0x1303   :  { %8952 = vrsqrt.f32 %v3612_v29  ;;  %v3608_v38 = vmul.f32 0.03125, %v3602_v37  ;;  %v3599_v23 = vpop.xlane.xlu0 %3598 }
0x1304   :  { %v8949_v59 = vpop.eup %8948  ;;  %8954 = vrsqrt.f32 %v3611_v18  ;;  %v3607_v13 = vmul.f32 0.03125, %v3599_v23 }
0x1305   :  { %v8951_v15 = vpop.eup %8950  ;;  %v3622_v39 = vmul.f32 %v8949_v59, %v10145_v7  ;;  %v3614_v25 = vadd.f32 1e-12, %v3608_v38 }
0x1306   :  { %v3613_v60 = vadd.f32 1e-12, %v3607_v13  ;;  %v3621_v49 = vmul.f32 %v8951_v15, %v10148_v36  ;;  %v7102_v13 = vld [vmem:[%s10855_s11] ss:$0 sm:$0xff] }
0x1307   :  { %v3634_v6 = vmul.f32 %v7086_v4, %v3622_v39  ;;  %8956 = vrsqrt.f32 %v3614_v25 }
0x1308   :  { %8958 = vrsqrt.f32 %v3613_v60  ;;  %v3633_v56 = vmul.f32 %v7086_v4, %v3621_v49 }
0x1309   :  { %v3646_v50 = vadd.f32 %v7087_v16, %v3634_v6 }
0x130a   :  { %v3645_v51 = vadd.f32 %v7087_v16, %v3633_v56 }
0x130c   :  { %8005 = vmatprep.mubr.msk.f32.mxu1 %vm339_vm2, %v3645_v51  ;;  %8022 = vmatprep.mubr.msk.f32.mxu0 %vm339_vm2, %v3645_v51 }
0x130d   :  { %v8953_v32 = vpop.eup %8952  ;;  %8006 = vmatmul.mubr.msk.f32.vlgmr.msra.gmra.mrb[60].mxu1 %vm339_vm2, %v3646_v50  ;;  %8023 = vmatmul.mubr.msk.f32.vlgmr.msra.gmra.mrb[78].mxu0 %vm339_vm2, %v3646_v50 }
0x130e   :  { %v8955_v7 = vpop.eup %8954  ;;  %v3624_v36 = vmul.f32 %v8953_v32, %v10157_v45  ;;  %8520 = vmatpush3.bf16.msra.mxu1 %v8517_v1 }
0x130f   :  { %v3623_v30 = vmul.f32 %v8955_v7, %v10160_v52  ;;  %8522 = vmatprep.subr.bf16.mxu1 %v8521_v14 }
0x1310   :  { %v3636_v46 = vmul.f32 %v7086_v4, %v3624_v36 }
0x1311   :  { %v8957_v3 = vpop.eup %8956  ;;  %v3635_v33 = vmul.f32 %v7086_v4, %v3623_v30 }
0x1312   :  { %v8959_v20 = vpop.eup %8958  ;;  %v3626_v24 = vmul.f32 %v8957_v3, %v10167_v5  ;;  %8524 = vmatpush3.bf16.msra.mxu1 %v8521_v14  ;;  %v3648_v53 = vadd.f32 %v7087_v16, %v3636_v46 }
0x1313   :  { %v3647_v41 = vadd.f32 %v7087_v16, %v3635_v33  ;;  %v3625_v40 = vmul.f32 %v8959_v20, %v10171_v8  ;;  %8529 = vmatprep.subr.bf16.mxu1 %v9147_v9  ;;  %v7095_v8 = vld [vmem:[%s10853_s7] ss:$0 sm:$0xff] }
0x1314   :  { %v3638_v58 = vmul.f32 %v7086_v4, %v3626_v24 }
0x1315   :  { %8008 = vmatprep.mubr.msk.f32.mxu1 %vm339_vm2, %v3647_v41  ;;  %8025 = vmatprep.mubr.msk.f32.mxu0 %vm339_vm2, %v3647_v41  ;;  %v3637_v45 = vmul.f32 %v7086_v4, %v3625_v40 }
0x1316   :  { %8009 = vmatmul.mubr.msk.f32.gmra.mrb[62].mxu1 %vm339_vm2, %v3648_v53  ;;  %8026 = vmatmul.mubr.msk.f32.gmra.mrb[80].mxu0 %vm339_vm2, %v3648_v53  ;;  %v3650_v5 = vadd.f32 %v7087_v16, %v3638_v58 }
0x1317   :  { %v3649_v52 = vadd.f32 %v7087_v16, %v3637_v45 }
0x1319   :  { %8011 = vmatprep.mubr.msk.f32.mxu1 %vm339_vm2, %v3649_v52  ;;  %8028 = vmatprep.mubr.msk.f32.mxu0 %vm339_vm2, %v3649_v52 }
0x131a   :  { %8012 = vmatmul.mubr.msk.f32.gmra.mrb[64].mxu1 %vm339_vm2, %v3650_v5  ;;  %8029 = vmatmul.mubr.msk.f32.gmra.mrb[82].mxu0 %vm339_vm2, %v3650_v5 }
0x131b   :  { %8039 = vmatprep.mubr.msk.f32.mxu1 %vm339_vm2, %v3645_v51  ;;  %8054 = vmatprep.mubr.msk.f32.mxu0 %vm9148_vm3, %v9149_v21 }
0x131e   :  { %8040 = vmatmul.mubr.msk.f32.vlgmr.msra.gmra.mrb[66].mxu1 %vm339_vm2, %v3646_v50 }
0x131f   :  { %8042 = vmatprep.mubr.msk.f32.mxu1 %vm339_vm2, %v3647_v41 }
0x1322   :  { %8043 = vmatmul.mubr.msk.f32.gmra.mrb[68].mxu1 %vm339_vm2, %v3648_v53 }
0x1323   :  { %8045 = vmatprep.mubr.msk.f32.mxu1 %vm339_vm2, %v3649_v52 }
0x1326   :  { %8046 = vmatmul.mubr.msk.f32.gmra.mrb[70].mxu1 %vm339_vm2, %v3650_v5 }
0x1327   :  { %8069 = vmatprep.mubr.msk.f32.mxu1 %vm9148_vm3, %v9149_v21 }
0x13e0   :  { %v8007_v43 = vpop.f32.mrb[60].mxu1  ;;  %v8024_v62 = vpop.f32.mrb[78].mxu0 }
0x13e1   :  { %v3864_v63 = vadd.f32 %v8024_v62, %v7095_v8  ;;  %v3746_v0 = vpop.f32.mrb[61].mxu1  ;;  %v3858_v2 = vpop.f32.mrb[79].mxu0  ;;  %v3752_v38 = vadd.f32 %v8007_v43, %v7088_v47 }
0x13e2   :  { %v3859_v1 = vadd.f32 %v7095_v8, %v3858_v2  ;;  %v3747_v57 = vadd.f32 %v7088_v47, %v3746_v0 }
0x13e3   :  { %v10245_v6 = vmul.f32 0.35355338, %v3752_v38 }
0x13e4   :  { %v8526_v17 = vpack.c.bf16 %v3864_v63, %v3859_v1  ;;  %v10225_v28 = vpack.i.bf16 %v3864_v63, %v3859_v1  ;;  %v10235_v23 = vmul.f32 0.35355338, %v3747_v57 }
0x13e6   :  { %8528 = vmatpush3.bf16.xpose.msk.msra.mxu0 %vm9512_vm5, %v8526_v17 }
0x13e7   :  { %8052 = vmatprep.subr.mxu0 %v9149_v21 }
0x13e9   :  { %v8010_v12 = vpop.f32.mrb[62].mxu1  ;;  %v8027_v42 = vpop.f32.mrb[80].mxu0 }
0x13ea   :  { %v3756_v61 = vpop.f32.mrb[63].mxu1  ;;  %v3868_v22 = vpop.f32.mrb[81].mxu0  ;;  %v3874_v59 = vadd.f32 %v8027_v42, %v7095_v8  ;;  %v3762_v32 = vadd.f32 %v8010_v12, %v7088_v47 }
0x13eb   :  { %v10231_v26 = vadd.f32 %v7095_v8, %v3868_v22  ;;  %v3757_v16 = vadd.f32 %v7088_v47, %v3756_v61 }
0x13ec   :  { %v10270_v20 = vmul.f32 0.35355338, %v3762_v32 }
0x13ed   :  { %v8013_v48 = vpop.f32.mrb[64].mxu1  ;;  %v8030_v29 = vpop.f32.mrb[82].mxu0  ;;  %v10256_v14 = vmul.f32 0.35355338, %v3757_v16 }
0x13ee   :  { %v3766_v18 = vpop.f32.mrb[65].mxu1  ;;  %v3878_v37 = vpop.f32.mrb[83].mxu0  ;;  %8053 = vmatpush3.xpose.msk.msra.mxu0 %vm789_vm4, %v10231_v26  ;;  %v10259_v7 = vadd.f32 %v8030_v29, %v7095_v8  ;;  %v3772_v53 = vadd.f32 %v8013_v48, %v7088_v47 }
0x13ef   :  { %v3879_v4 = vadd.f32 %v7095_v8, %v3878_v37  ;;  %8533 = vmatprep.subr.bf16.mxu0 %v9147_v9  ;;  %v3767_v24 = vadd.f32 %v7088_v47, %v3766_v18 }
0x13f0   :  { %v10290_v52 = vmul.f32 0.35355338, %v3772_v53 }
0x13f1   :  { %v8530_v15 = vpack.c.bf16 %v3879_v4, %v3874_v59  ;;  %v8041_v39 = vpop.f32.mrb[66].mxu1  ;;  %8055 = vmatmul.mubr.msk.f32.vlgmr.msra.gmra.mrb[84].mxu0 %vm789_vm4, %v10235_v23  ;;  %v10241_v25 = vpack.i.bf16 %v3879_v4, %v3874_v59  ;;  %v10280_v58 = vmul.f32 0.35355338, %v3767_v24 }
0x13f2   :  { %v3970_v60 = vadd.f32 %v8041_v39, %v7102_v13  ;;  %v3964_v49 = vpop.f32.mrb[67].mxu1  ;;  %8057 = vmatprep.mubr.msk.f32.mxu0 %vm9148_vm3, %v9149_v21 }
0x13f3   :  { %v3965_v56 = vadd.f32 %v7102_v13, %v3964_v49  ;;  %8532 = vmatpush3.bf16.xpose.msk.msra.mxu1 %vm9512_vm5, %v8530_v15 }
0x13f4   :  { %8067 = vmatprep.subr.mxu1 %v9149_v21 }
0x13f5   :  { %v8044_v19 = vpop.f32.mrb[68].mxu1  ;;  %8058 = vmatmul.mubr.msk.f32.gmra.mrb[86].mxu0 %vm789_vm4, %v10245_v6  ;;  %v8534_v10 = vpack.c.bf16 %v3970_v60, %v3965_v56  ;;  %v10252_v51 = vpack.i.bf16 %v3970_v60, %v3965_v56 }
0x13f6   :  { %v3974_v50 = vpop.f32.mrb[69].mxu1  ;;  %8060 = vmatprep.mubr.msk.f32.mxu0 %vm9148_vm3, %v9149_v21  ;;  %v3980_v3 = vadd.f32 %v8044_v19, %v7102_v13 }
0x13f7   :  { %8535 = vmatpush3.bf16.msra.mxu0 %v8534_v10  ;;  %v10261_v36 = vadd.f32 %v7102_v13, %v3974_v50 }
0x13f8   :  { %8082 = vmatprep.subr.mxu0 %v9149_v21 }
0x13f9   :  { %v8047_v30 = vpop.f32.mrb[70].mxu1  ;;  %8061 = vmatmul.mubr.msk.f32.gmra.mrb[88].mxu0 %vm789_vm4, %v10256_v14 }
0x13fa   :  { %v3984_v46 = vpop.f32.mrb[71].mxu1  ;;  %8084 = vmatprep.mubr.msk.f32.mxu0 %vm9148_vm3, %v9149_v21  ;;  %v10283_v45 = vadd.f32 %v8047_v30, %v7102_v13 }
0x13fb   :  { %v3985_v33 = vadd.f32 %v7102_v13, %v3984_v46  ;;  %8068 = vmatpush3.xpose.msk.msra.mxu1 %vm789_vm4, %v10259_v7  ;;  %8083 = vmatpush3.msra.mxu0 %v10261_v36 }
0x13fc   :  { %8536 = vmatprep.subr.bf16.mxu1 %v9147_v9  ;;  %8539 = vmatprep.subr.bf16.mxu0 %v9147_v9 }
0x13fd   :  { %v8537_v41 = vpack.c.bf16 %v3985_v33, %v3980_v3  ;;  %v10274_v40 = vpack.i.bf16 %v3985_v33, %v3980_v3 }
0x13fe   :  { %8070 = vmatmul.mubr.msk.f32.vlgmr.msra.gmra.mrb[72].mxu1 %vm789_vm4, %v10270_v20 }
0x13ff   :  { %8538 = vmatpush3.bf16.msra.mxu1 %v8537_v41  ;;  %8072 = vmatprep.mubr.msk.f32.mxu1 %vm9148_vm3, %v9149_v21 }
0x1400   :  { %8097 = vmatprep.subr.mxu1 %v9149_v21 }
0x1402   :  { %8073 = vmatmul.mubr.msk.f32.gmra.mrb[74].mxu1 %vm789_vm4, %v10280_v58 }
0x1403   :  { %8098 = vmatpush3.msra.mxu1 %v10283_v45  ;;  %8075 = vmatprep.mubr.msk.f32.mxu1 %vm9148_vm3, %v9149_v21 }
0x1404   :  { %8543 = vmatprep.subr.bf16.mxu1 %v9147_v9 }
0x1406   :  { %8076 = vmatmul.mubr.msk.f32.gmra.mrb[76].mxu1 %vm789_vm4, %v10290_v52 }
0x1407   :  { %8099 = vmatprep.mubr.msk.f32.mxu1 %vm9148_vm3, %v9149_v21 }
0x14c4   :  { %v4081_v5 = vpop.f32.mrb[84].mxu0 }
0x14c5   :  { %v8056_v8 = vpop.f32.mrb[85].mxu0  ;;  %v4082_v24 = vadd.f32 %v4081_v5, %v9586_v27 }
0x14c7   :  { %v4193_v41 = vsel %vm986_vm7, %v4082_v24, -inf }
0x14c8   :  { %v4086_v43 = vpop.f32.mrb[86].mxu0 }
0x14c9   :  { %v8059_v62 = vpop.f32.mrb[87].mxu0  ;;  %v4087_v32 = vadd.f32 %v4086_v43, %v9586_v27 }
0x14cb   :  { %v4196_v3 = vsel %vm986_vm7, %v4087_v32, -inf }
0x14cc   :  { %v4091_v63 = vpop.f32.mrb[88].mxu0 }
0x14cd   :  { %v8062_v0 = vpop.f32.mrb[89].mxu0  ;;  %v4092_v46 = vadd.f32 %v4091_v63, %v9586_v27 }
0x14cf   :  { %v4199_v33 = vsel %vm986_vm7, %v4092_v46, -inf }
0x14d1   :  { %v4179_v2 = vpop.f32.mrb[72].mxu1 }
0x14d2   :  { %v4180_v1 = vadd.f32 %v4179_v2, %v9586_v27  ;;  %v8071_v17 = vpop.f32.mrb[73].mxu1 }
0x14d4   :  { %v4202_v47 = vsel %vm986_vm7, %v4180_v1, -inf }
0x14d5   :  { %4203 = vmax.xlane.f32.xlu0 %v4202_v47  ;;  %v4184_v12 = vpop.f32.mrb[74].mxu1 }
0x14d6   :  { %v4185_v42 = vadd.f32 %v4184_v12, %v9586_v27  ;;  %v8074_v61 = vpop.f32.mrb[75].mxu1 }
0x14d8   :  { %v4205_v22 = vsel %vm986_vm7, %v4185_v42, -inf }
0x14d9   :  { %4206 = vmax.xlane.f32.xlu1 %v4205_v22  ;;  %v4189_v57 = vpop.f32.mrb[76].mxu1 }
0x14da   :  { %v4190_v48 = vadd.f32 %v4189_v57, %v9586_v27  ;;  %v8077_v29 = vpop.f32.mrb[77].mxu1 }
0x14dc   :  { %v4208_v18 = vsel %vm986_vm7, %v4190_v48, -inf }
0x14dd   :  { %4209 = vmax.xlane.f32.xlu0 %v4208_v18 }
0x1562   :  { %v4204_v37 = vpop.xlane.xlu0 %4203 }
0x1563   :  { %v4214_v38 = vsub.f32 %v4180_v1, %v4204_v37 }
0x1565   :  { %v4223_v59 = vmul.f32 1.442695, %v4214_v38 }
0x1566   :  { %v4207_v4 = vpop.xlane.xlu1 %4206 }
0x1567   :  { %8960 = vpow2.f32 %v4223_v59  ;;  %v4215_v13 = vsub.f32 %v4185_v42, %v4207_v4 }
0x1569   :  { %v4225_v15 = vmul.f32 1.442695, %v4215_v13 }
0x156a   :  { %v4210_v56 = vpop.xlane.xlu0 %4209 }
0x156b   :  { %8962 = vpow2.f32 %v4225_v15  ;;  %v4216_v19 = vsub.f32 %v4190_v48, %v4210_v56 }
0x156d   :  { %v4227_v10 = vmul.f32 1.442695, %v4216_v19 }
0x156f   :  { %8964 = vpow2.f32 %v4227_v10 }
0x1571   :  { %v8961_v39 = vpop.eup %8960 }
0x1572   :  { %v4238_v60 = vsel %vm986_vm7, %v8961_v39, 0.0 }
0x1573   :  { %4239 = vadd.xlane.f32.xlu1 %v4238_v60 }
0x1575   :  { %v8963_v49 = vpop.eup %8962 }
0x1576   :  { %v4241_v16 = vsel %vm986_vm7, %v8963_v49, 0.0 }
0x1577   :  { %4242 = vadd.xlane.f32.xlu0 %v4241_v16 }
0x1579   :  { %v8965_v50 = vpop.eup %8964 }
0x157a   :  { %v4244_v30 = vsel %vm986_vm7, %v8965_v50, 0.0 }
0x1584   :  { %4551 = vrot.lane.b32.xlu1 %v10259_v7, %s9151_s0 }
0x1588   :  { %4541 = vrot.lane.b32.xlu1 %v10270_v20, %s9151_s0 }
0x158d   :  { %8757 = vrot.lane.b32.xlu0 %v10241_v25, %s9151_s0 }
0x1591   :  { %4545 = vrot.lane.b32.xlu0 %v10290_v52, %s9151_s0 }
0x15ac   :  { %4245 = vadd.xlane.f32.xlu1 %v4244_v30 }
0x15b0   :  { %4197 = vmax.xlane.f32.xlu0 %v4196_v3 }
0x15b4   :  { %4200 = vmax.xlane.f32.xlu0 %v4199_v33 }
0x15bd   :  { %4543 = vrot.lane.b32.xlu1 %v10280_v58, %s9151_s0 }
0x15e1   :  { %4194 = vmax.xlane.f32.xlu1 %v4193_v41 }
0x1600   :  { %v4240_v53 = vpop.xlane.xlu1 %4239 }
0x1601   :  { %8966 = vrcp.f32 %v4240_v53 }
0x1604   :  { %v4243_v8 = vpop.xlane.xlu0 %4242  ;;  %v4552_v47 = vpop.permute.xlu1 %4551 }
0x1605   :  { %8968 = vrcp.f32 %v4243_v8 }
0x1608   :  { %v8758_v43 = vpop.permute.xlu0 %8757  ;;  %v4542_v12 = vpop.permute.xlu1 %4541 }
0x1609   :  { %v8760_v62 = vunpack.i.h.bf16 %v8758_v43  ;;  %v8759_v63 = vunpack.i.l.bf16 %v8758_v43 }
0x160b   :  { %v8967_v0 = vpop.eup %8966  ;;  %v8544_v2 = vpack.c.bf16 %v8760_v62, %v8759_v63 }
0x160c   :  { %v4254_v1 = vmul.f32 %v8967_v0, %v8961_v39  ;;  %v4546_v42 = vpop.permute.xlu0 %4545 }
0x160e   :  { %8100 = vmatmul.mubr.msk.f32.vlgmr.msra.gmra.mrb[78].mxu1 %vm986_vm7, %v4254_v1 }
0x160f   :  { %v8969_v17 = vpop.eup %8968  ;;  %8546 = vmatpush3.bf16.xpose.msk.msra.mxu1 %vm9512_vm5, %v8544_v2  ;;  %8102 = vmatprep.mubr.msk.f32.mxu1 %vm9148_vm3, %v9149_v21 }
0x1610   :  { %v4256_v5 = vmul.f32 %v8969_v17, %v8963_v49  ;;  %8127 = vmatprep.subr.mxu1 %v9149_v21 }
0x1612   :  { %8103 = vmatmul.mubr.msk.f32.gmra.mrb[80].mxu1 %vm986_vm7, %v4256_v5 }
0x1613   :  { %8105 = vmatprep.mubr.msk.f32.mxu1 %vm9148_vm3, %v9149_v21 }
0x1617   :  { %8128 = vmatpush3.xpose.msk.msra.mxu1 %vm789_vm4, %v4552_v47 }
0x1618   :  { %8550 = vmatprep.subr.bf16.mxu1 %v9147_v9 }
0x1639   :  { %v4246_v61 = vpop.xlane.xlu1 %4245 }
0x163a   :  { %8970 = vrcp.f32 %v4246_v61 }
0x163d   :  { %v4198_v22 = vpop.xlane.xlu0 %4197  ;;  %v4544_v59 = vpop.permute.xlu1 %4543 }
0x163e   :  { %v4212_v57 = vsub.f32 %v4087_v32, %v4198_v22 }
0x1640   :  { %v4219_v48 = vmul.f32 1.442695, %v4212_v57 }
0x1641   :  { %v4201_v4 = vpop.xlane.xlu0 %4200 }
0x1642   :  { %8972 = vpow2.f32 %v4219_v48  ;;  %v4213_v13 = vsub.f32 %v4092_v46, %v4201_v4 }
0x1644   :  { %v8971_v29 = vpop.eup %8970  ;;  %v4221_v60 = vmul.f32 1.442695, %v4213_v13 }
0x1645   :  { %v4258_v18 = vmul.f32 %v8971_v29, %v8965_v50 }
0x1647   :  { %8106 = vmatmul.mubr.msk.f32.gmra.mrb[82].mxu1 %vm986_vm7, %v4258_v18 }
0x1648   :  { %8129 = vmatprep.mubr.msk.f32.mxu1 %vm9148_vm3, %v9149_v21 }
0x164b   :  { %8130 = vmatmul.mubr.msk.f32.vlgmr.msra.gmra.mrb[84].mxu1 %vm789_vm4, %v4542_v12 }
0x164c   :  { %v8973_v37 = vpop.eup %8972  ;;  %8132 = vmatprep.mubr.msk.f32.mxu1 %vm9148_vm3, %v9149_v21 }
0x164d   :  { %v4232_v38 = vsel %vm986_vm7, %v8973_v37, 0.0 }
0x164e   :  { %4233 = vadd.xlane.f32.xlu1 %v4232_v38 }
0x164f   :  { %8133 = vmatmul.mubr.msk.f32.gmra.mrb[86].mxu1 %vm789_vm4, %v4544_v59 }
0x1650   :  { %8135 = vmatprep.mubr.msk.f32.mxu1 %vm9148_vm3, %v9149_v21 }
0x1653   :  { %8136 = vmatmul.mubr.msk.f32.gmra.mrb[88].mxu1 %vm789_vm4, %v4546_v42 }
0x1654   :  { %8159 = vmatprep.mubr.msk.f32.mxu1 %vm9148_vm3, %v9149_v21 }
0x165f   :  { %8762 = vrot.lane.b32.xlu1 %v10225_v28, %s9151_s0 }
0x1663   :  { %4437 = vrot.lane.b32.xlu1 %v10235_v23, %s9151_s0 }
0x1667   :  { %4439 = vrot.lane.b32.xlu1 %v10245_v6, %s9151_s0 }
0x166b   :  { %4441 = vrot.lane.b32.xlu1 %v10256_v14, %s9151_s0 }
0x166e   :  { %v4195_v15 = vpop.xlane.xlu1 %4194 }
0x166f   :  { %v4211_v39 = vsub.f32 %v4082_v24, %v4195_v15 }
0x1671   :  { %v4217_v49 = vmul.f32 1.442695, %v4211_v39 }
0x1673   :  { %8974 = vpow2.f32 %v4217_v49 }
0x1674   :  { %8976 = vpow2.f32 %v4221_v60 }
0x167d   :  { %v8975_v16 = vpop.eup %8974 }
0x167e   :  { %v4229_v56 = vsel %vm986_vm7, %v8975_v16, 0.0  ;;  %v8977_v19 = vpop.eup %8976 }
0x167f   :  { %4230 = vadd.xlane.f32.xlu0 %v4229_v56  ;;  %v4235_v10 = vsel %vm986_vm7, %v8977_v19, 0.0 }
0x1683   :  { %4236 = vadd.xlane.f32.xlu0 %v4235_v10 }
0x1699   :  { %4447 = vrot.lane.b32.xlu0 %v10231_v26, %s9151_s0 }
0x16db   :  { %v4234_v3 = vpop.xlane.xlu1 %4233 }
0x16df   :  { %v8763_v41 = vpop.permute.xlu1 %8762 }
0x16e0   :  { %v8765_v53 = vunpack.i.h.bf16 %v8763_v41  ;;  %v8764_v8 = vunpack.i.l.bf16 %v8763_v41 }
0x16e1   :  { %v10358_v50 = vpop.f32.mrb[78].mxu1 }
0x16e2   :  { %v8101_v32 = vpop.f32.mrb[79].mxu1  ;;  %v8540_v0 = vpack.c.bf16 %v8765_v53, %v8764_v8 }
0x16e3   :  { %v4438_v22 = vpop.permute.xlu1 %4437 }
0x16e5   :  { %v10360_v30 = vpop.f32.mrb[80].mxu1 }
0x16e6   :  { %v8104_v46 = vpop.f32.mrb[81].mxu1 }
0x16e7   :  { %v4440_v4 = vpop.permute.xlu1 %4439 }
0x16eb   :  { %v4442_v60 = vpop.permute.xlu1 %4441 }
0x170c   :  { %v4231_v33 = vpop.xlane.xlu0 %4230 }
0x170d   :  { %8978 = vrcp.f32 %v4231_v33 }
0x170e   :  { %8980 = vrcp.f32 %v4234_v3 }
0x1710   :  { %v4237_v24 = vpop.xlane.xlu0 %4236 }
0x1711   :  { %8982 = vrcp.f32 %v4237_v24 }
0x1714   :  { %v4448_v48 = vpop.permute.xlu0 %4447 }
0x1717   :  { %v8979_v43 = vpop.eup %8978 }
0x1718   :  { %v4248_v62 = vmul.f32 %v8979_v43, %v8975_v16  ;;  %v8981_v63 = vpop.eup %8980 }
0x1719   :  { %v4250_v17 = vmul.f32 %v8981_v63, %v8973_v37 }
0x171a   :  { %8085 = vmatmul.mubr.msk.f32.vlgmr.msra.gmra.mrb[90].mxu0 %vm986_vm7, %v4248_v62  ;;  %v10363_v2 = vpop.f32.mrb[82].mxu1 }
0x171b   :  { %8542 = vmatpush3.bf16.xpose.msk.msra.mxu0 %vm9512_vm5, %v8540_v0  ;;  %v8107_v1 = vpop.f32.mrb[83].mxu1  ;;  %8087 = vmatprep.mubr.msk.f32.mxu0 %vm9148_vm3, %v9149_v21  ;;  %v8983_v5 = vpop.eup %8982 }
0x171c   :  { %8112 = vmatprep.subr.mxu0 %v9149_v21  ;;  %v4252_v61 = vmul.f32 %v8983_v5, %v8977_v19 }
0x171e   :  { %8088 = vmatmul.mubr.msk.f32.gmra.mrb[92].mxu0 %vm986_vm7, %v4250_v17  ;;  %v4631_v47 = vpop.f32.mrb[84].mxu1 }
0x171f   :  { %v4632_v12 = vadd.f32 %v4631_v47, %v9586_v27  ;;  %v8131_v42 = vpop.f32.mrb[85].mxu1  ;;  %8090 = vmatprep.mubr.msk.f32.mxu0 %vm9148_vm3, %v9149_v21 }
0x1721   :  { %v4654_v57 = vsel %vm986_vm7, %v4632_v12, -inf }
0x1722   :  { %8091 = vmatmul.mubr.msk.f32.gmra.mrb[94].mxu0 %vm986_vm7, %v4252_v61  ;;  %4655 = vmax.xlane.f32.xlu0 %v4654_v57  ;;  %v4636_v29 = vpop.f32.mrb[86].mxu1 }
0x1723   :  { %8113 = vmatpush3.xpose.msk.msra.mxu0 %vm789_vm4, %v4448_v48  ;;  %v4637_v18 = vadd.f32 %v4636_v29, %v9586_v27  ;;  %v8134_v37 = vpop.f32.mrb[87].mxu1  ;;  %8114 = vmatprep.mubr.msk.f32.mxu0 %vm9148_vm3, %v9149_v21 }
0x1724   :  { %8547 = vmatprep.subr.bf16.mxu0 %v9147_v9 }
0x1725   :  { %v4657_v38 = vsel %vm986_vm7, %v4637_v18, -inf }
0x1726   :  { %8115 = vmatmul.mubr.msk.f32.vlgmr.msra.gmra.mrb[96].mxu0 %vm789_vm4, %v4438_v22  ;;  %4658 = vmax.xlane.f32.xlu1 %v4657_v38  ;;  %v4641_v59 = vpop.f32.mrb[88].mxu1 }
0x1727   :  { %v4642_v13 = vadd.f32 %v4641_v59, %v9586_v27  ;;  %v8137_v15 = vpop.f32.mrb[89].mxu1  ;;  %8117 = vmatprep.mubr.msk.f32.mxu0 %vm9148_vm3, %v9149_v21 }
0x1729   :  { %v4660_v39 = vsel %vm986_vm7, %v4642_v13, -inf }
0x172a   :  { %8118 = vmatmul.mubr.msk.f32.gmra.mrb[98].mxu0 %vm789_vm4, %v4440_v4  ;;  %4661 = vmax.xlane.f32.xlu0 %v4660_v39 }
0x172b   :  { %8120 = vmatprep.mubr.msk.f32.mxu0 %vm9148_vm3, %v9149_v21 }
0x172e   :  { %8121 = vmatmul.mubr.msk.f32.gmra.mrb[100].mxu0 %vm789_vm4, %v4442_v60 }
0x172f   :  { %8144 = vmatprep.mubr.msk.f32.mxu0 %vm9148_vm3, %v9149_v21 }
0x1737   :  { %4819 = vrot.lane.b32.xlu1 %v10283_v45, %s9151_s0 }
0x173b   :  { %8772 = vrot.lane.b32.xlu1 %v10225_v28, %s9152_s5 }
0x173f   :  { %5149 = vrot.lane.b32.xlu1 %v10231_v26, %s9152_s5 }
0x17af   :  { %v4656_v49 = vpop.xlane.xlu0 %4655 }
0x17b0   :  { %v4666_v16 = vsub.f32 %v4632_v12, %v4656_v49 }
0x17b2   :  { %v4675_v56 = vmul.f32 1.442695, %v4666_v16 }
0x17b3   :  { %v4659_v19 = vpop.xlane.xlu1 %4658 }
0x17b4   :  { %8984 = vpow2.f32 %v4675_v56  ;;  %v4667_v10 = vsub.f32 %v4637_v18, %v4659_v19 }
0x17b6   :  { %v4677_v32 = vmul.f32 1.442695, %v4667_v10 }
0x17b7   :  { %v4662_v46 = vpop.xlane.xlu0 %4661 }
0x17b8   :  { %8986 = vpow2.f32 %v4677_v32  ;;  %v4668_v3 = vsub.f32 %v4642_v13, %v4662_v46  ;;  %v4820_v13 = vpop.permute.xlu1 %4819 }
0x17ba   :  { %v4679_v33 = vmul.f32 1.442695, %v4668_v3 }
0x17bc   :  { %8988 = vpow2.f32 %v4679_v33  ;;  %v8773_v15 = vpop.permute.xlu1 %8772 }
0x17be   :  { %v8985_v24 = vpop.eup %8984 }
0x17bf   :  { %v4690_v41 = vsel %vm986_vm7, %v8985_v24, 0.0 }
0x17c0   :  { %4691 = vadd.xlane.f32.xlu0 %v4690_v41  ;;  %v5150_v60 = vpop.permute.xlu1 %5149  ;;  %v8775_v41 = vunpack.i.h.bf16 %v8773_v15 }
0x17c2   :  { %v8987_v53 = vpop.eup %8986 }
0x17c3   :  { %v4693_v8 = vsel %vm986_vm7, %v8987_v53, 0.0 }
0x17c4   :  { %4694 = vadd.xlane.f32.xlu0 %v4693_v8  ;;  %v8774_v8 = vunpack.i.l.bf16 %v8773_v15 }
0x17c6   :  { %v10401_v43 = vpop.eup %8988 }
0x17c7   :  { %v4696_v62 = vsel %vm986_vm7, %v10401_v43, 0.0 }
0x17c8   :  { %4697 = vadd.xlane.f32.xlu1 %v4696_v62 }
0x17d9   :  { %5139 = vrot.lane.b32.xlu1 %v10235_v23, %s9152_s5 }
0x17da   :  { %8767 = vrot.lane.b32.xlu0 %v10274_v40, %s9151_s0 }
0x17dd   :  { %5143 = vrot.lane.b32.xlu1 %v10256_v14, %s9152_s5 }
0x17de   :  { %8777 = vrot.lane.b32.xlu0 %v10241_v25, %s9152_s5 }
0x17e1   :  { %5243 = vrot.lane.b32.xlu1 %v10270_v20, %s9152_s5 }
0x17e2   :  { %5141 = vrot.lane.b32.xlu0 %v10245_v6, %s9152_s5 }
0x17e5   :  { %5247 = vrot.lane.b32.xlu1 %v10290_v52, %s9152_s5 }
0x17e6   :  { %5253 = vrot.lane.b32.xlu0 %v10259_v7, %s9152_s5 }
0x17ea   :  { %5245 = vrot.lane.b32.xlu0 %v10280_v58, %s9152_s5 }
0x17ed   :  { %v10423_v63 = vpop.f32.mrb[90].mxu0 }
0x17ee   :  { %v8086_v0 = vpop.f32.mrb[91].mxu0 }
0x17f1   :  { %v10425_v1 = vpop.f32.mrb[92].mxu0 }
0x17f2   :  { %v8089_v17 = vpop.f32.mrb[93].mxu0 }
0x17f3   :  { %v8554_v17 = vpack.c.bf16 %v8775_v41, %v8774_v8 }
0x17f5   :  { %v10427_v5 = vpop.f32.mrb[94].mxu0 }
0x17f6   :  { %v8092_v47 = vpop.f32.mrb[95].mxu0 }
0x17f9   :  { %v4527_v12 = vpop.f32.mrb[96].mxu0 }
0x17fa   :  { %v8116_v42 = vpop.f32.mrb[97].mxu0  ;;  %v10430_v29 = vadd.f32 %v4527_v12, %v9586_v27 }
0x17fc   :  { %v4645_v38 = vsel %vm986_vm7, %v10430_v29, -inf }
0x17fd   :  { %v4532_v61 = vpop.f32.mrb[98].mxu0 }
0x17fe   :  { %v8119_v22 = vpop.f32.mrb[99].mxu0  ;;  %v10433_v18 = vadd.f32 %v4532_v61, %v9586_v27 }
0x1800   :  { %v4648_v59 = vsel %vm986_vm7, %v10433_v18, -inf }
0x1801   :  { %v4537_v57 = vpop.f32.mrb[100].mxu0 }
0x1802   :  { %v8122_v48 = vpop.f32.mrb[101].mxu0  ;;  %v10436_v37 = vadd.f32 %v4537_v57, %v9586_v27 }
0x1804   :  { %v4651_v4 = vsel %vm986_vm7, %v10436_v37, -inf }
0x1809   :  { %4646 = vmax.xlane.f32.xlu0 %v4645_v38  ;;  %4649 = vmax.xlane.f32.xlu1 %v4648_v59 }
0x180d   :  { %4652 = vmax.xlane.f32.xlu0 %v4651_v4 }
0x184d   :  { %v4692_v39 = vpop.xlane.xlu0 %4691 }
0x184e   :  { %8990 = vrcp.f32 %v4692_v39 }
0x1851   :  { %v4695_v49 = vpop.xlane.xlu0 %4694 }
0x1852   :  { %8992 = vrcp.f32 %v4695_v49 }
0x1855   :  { %v4698_v16 = vpop.xlane.xlu1 %4697  ;;  %v8768_v56 = vpop.permute.xlu0 %8767 }
0x1856   :  { %v8770_v19 = vunpack.i.h.bf16 %v8768_v56  ;;  %v8769_v10 = vunpack.i.l.bf16 %v8768_v56  ;;  %8994 = vrcp.f32 %v4698_v16 }
0x1858   :  { %v8551_v32 = vpack.c.bf16 %v8770_v19, %v8769_v10  ;;  %v8991_v46 = vpop.eup %8990 }
0x1859   :  { %v4706_v3 = vmul.f32 %v8991_v46, %v8985_v24  ;;  %v8778_v47 = vpop.permute.xlu0 %8777  ;;  %v5140_v42 = vpop.permute.xlu1 %5139 }
0x185a   :  { %8552 = vmatpush3.bf16.msra.mxu1 %v8551_v32  ;;  %v8779_v12 = vunpack.i.l.bf16 %v8778_v47 }
0x185b   :  { %8157 = vmatprep.subr.mxu1 %v9149_v21 }
0x185c   :  { %v8993_v33 = vpop.eup %8992 }
0x185d   :  { %v4708_v62 = vmul.f32 %v8993_v33, %v8987_v53  ;;  %v8780_v53 = vunpack.i.h.bf16 %v8778_v47  ;;  %v5144_v22 = vpop.permute.xlu1 %5143 }
0x185e   :  { %8158 = vmatpush3.msra.mxu1 %v4820_v13 }
0x185f   :  { %8160 = vmatmul.mubr.msk.f32.vlgmr.msra.gmra.mrb[90].mxu1 %vm986_vm7, %v4706_v3  ;;  %8553 = vmatprep.subr.bf16.mxu1 %v9147_v9  ;;  %v8558_v61 = vpack.c.bf16 %v8780_v53, %v8779_v12 }
0x1860   :  { %8162 = vmatprep.mubr.msk.f32.mxu1 %vm9148_vm3, %v9149_v21  ;;  %v8995_v0 = vpop.eup %8994 }
0x1861   :  { %v4710_v24 = vmul.f32 %v8995_v0, %v10401_v43  ;;  %v5142_v43 = vpop.permute.xlu0 %5141  ;;  %v5244_v48 = vpop.permute.xlu1 %5243 }
0x1863   :  { %8163 = vmatmul.mubr.msk.f32.gmra.mrb[92].mxu1 %vm986_vm7, %v4708_v62 }
0x1864   :  { %8165 = vmatprep.mubr.msk.f32.mxu1 %vm9148_vm3, %v9149_v21 }
0x1865   :  { %8556 = vmatpush3.bf16.xpose.msk.msra.mxu1 %vm9512_vm5, %v8554_v17  ;;  %v5254_v57 = vpop.permute.xlu0 %5253  ;;  %v5248_v59 = vpop.permute.xlu1 %5247 }
0x1866   :  { %8194 = vmatprep.subr.mxu1 %v9149_v21 }
0x1867   :  { %8166 = vmatmul.mubr.msk.f32.gmra.mrb[94].mxu1 %vm986_vm7, %v4710_v24 }
0x1868   :  { %8196 = vmatprep.mubr.msk.f32.mxu1 %vm9148_vm3, %v9149_v21 }
0x1869   :  { %v5246_v38 = vpop.permute.xlu0 %5245 }
0x186d   :  { %8195 = vmatpush3.xpose.msk.msra.mxu1 %vm789_vm4, %v5150_v60 }
0x186e   :  { %8557 = vmatprep.subr.bf16.mxu1 %v9147_v9 }
0x1870   :  { %8197 = vmatmul.mubr.msk.f32.vlgmr.msra.gmra.mrb[96].mxu1 %vm789_vm4, %v5140_v42 }
0x1871   :  { %8560 = vmatpush3.bf16.xpose.msk.msra.mxu1 %vm9512_vm5, %v8558_v61  ;;  %8199 = vmatprep.mubr.msk.f32.mxu1 %vm9148_vm3, %v9149_v21 }
0x1872   :  { %8209 = vmatprep.subr.mxu1 %v9149_v21 }
0x1874   :  { %8200 = vmatmul.mubr.msk.f32.gmra.mrb[98].mxu1 %vm789_vm4, %v5142_v43 }
0x1875   :  { %8202 = vmatprep.mubr.msk.f32.mxu1 %vm9148_vm3, %v9149_v21 }
0x1878   :  { %8203 = vmatmul.mubr.msk.f32.gmra.mrb[100].mxu1 %vm789_vm4, %v5144_v22 }
0x1879   :  { %8210 = vmatpush3.xpose.msk.msra.mxu1 %vm789_vm4, %v5254_v57  ;;  %8211 = vmatprep.mubr.msk.f32.mxu1 %vm9148_vm3, %v9149_v21 }
0x187a   :  { %8564 = vmatprep.subr.bf16.mxu1 %v9147_v9 }
0x187c   :  { %8212 = vmatmul.mubr.msk.f32.vlgmr.msra.gmra.mrb[102].mxu1 %vm789_vm4, %v5244_v48 }
0x187d   :  { %8214 = vmatprep.mubr.msk.f32.mxu1 %vm9148_vm3, %v9149_v21 }
0x1880   :  { %8215 = vmatmul.mubr.msk.f32.gmra.mrb[104].mxu1 %vm789_vm4, %v5246_v38 }
0x1881   :  { %8217 = vmatprep.mubr.msk.f32.mxu1 %vm9148_vm3, %v9149_v21 }
0x1884   :  { %8218 = vmatmul.mubr.msk.f32.gmra.mrb[106].mxu1 %vm789_vm4, %v5248_v59 }
0x1885   :  { %8241 = vmatprep.mubr.msk.f32.mxu1 %vm9148_vm3, %v9149_v21 }
0x1896   :  { %v4650_v4 = vpop.xlane.xlu1 %4649  ;;  %v4647_v13 = vpop.xlane.xlu0 %4646 }
0x1897   :  { %v4664_v15 = vsub.f32 %v10433_v18, %v4650_v4  ;;  %v4663_v39 = vsub.f32 %v10430_v29, %v4647_v13 }
0x1899   :  { %v4669_v60 = vmul.f32 1.442695, %v4663_v39  ;;  %v4671_v49 = vmul.f32 1.442695, %v4664_v15 }
0x189a   :  { %v4653_v16 = vpop.xlane.xlu0 %4652 }
0x189b   :  { %v4665_v56 = vsub.f32 %v10436_v37, %v4653_v16  ;;  %8996 = vpow2.f32 %v4669_v60 }
0x189c   :  { %8998 = vpow2.f32 %v4671_v49 }
0x189d   :  { %v4673_v19 = vmul.f32 1.442695, %v4665_v56 }
0x189f   :  { %9000 = vpow2.f32 %v4673_v19 }
0x18a5   :  { %v8997_v10 = vpop.eup %8996 }
0x18a6   :  { %v4681_v32 = vsel %vm986_vm7, %v8997_v10, 0.0  ;;  %v8999_v46 = vpop.eup %8998 }
0x18a7   :  { %4682 = vadd.xlane.f32.xlu0 %v4681_v32  ;;  %v4684_v18 = vsel %vm986_vm7, %v8999_v46, 0.0 }
0x18a9   :  { %v9001_v3 = vpop.eup %9000 }
0x18aa   :  { %v4687_v33 = vsel %vm986_vm7, %v9001_v3, 0.0 }
0x18ab   :  { %4688 = vadd.xlane.f32.xlu1 %v4687_v33  ;;  %4685 = vadd.xlane.f32.xlu0 %v4684_v18 }
0x18bc   :  { %4718 = vrot.lane.b32.xlu1 %v10261_v36, %s9151_s0 }
0x18c1   :  { %8782 = vrot.lane.b32.xlu0 %v10252_v51, %s9151_s0 }
0x1932   :  { %v10494_v29 = vpop.f32.mrb[90].mxu1 }
0x1933   :  { %v8161_v37 = vpop.f32.mrb[91].mxu1 }
0x1934   :  { %v4683_v41 = vpop.xlane.xlu0 %4682 }
0x1935   :  { %9002 = vrcp.f32 %v4683_v41 }
0x1936   :  { %v10496_v8 = vpop.f32.mrb[92].mxu1 }
0x1937   :  { %v8164_v62 = vpop.f32.mrb[93].mxu1 }
0x1938   :  { %v4686_v0 = vpop.xlane.xlu0 %4685  ;;  %v4689_v47 = vpop.xlane.xlu1 %4688 }
0x1939   :  { %9004 = vrcp.f32 %v4686_v0 }
0x193a   :  { %v10498_v17 = vpop.f32.mrb[94].mxu1  ;;  %9006 = vrcp.f32 %v4689_v47 }
0x193b   :  { %v8167_v24 = vpop.f32.mrb[95].mxu1 }
0x193c   :  { %v8783_v53 = vpop.permute.xlu0 %8782  ;;  %v4719_v59 = vpop.permute.xlu1 %4718 }
0x193d   :  { %v8785_v12 = vunpack.i.h.bf16 %v8783_v53  ;;  %v8784_v42 = vunpack.i.l.bf16 %v8783_v53 }
0x193f   :  { %v8548_v61 = vpack.c.bf16 %v8785_v12, %v8784_v42  ;;  %v9003_v43 = vpop.eup %9002 }
0x1940   :  { %v4700_v38 = vmul.f32 %v9003_v43, %v8997_v10  ;;  %v3994_v43 = vld [vmem:[%s10856_s15 + $0x8] sm:$0xff] }
0x1941   :  { %8549 = vmatpush3.bf16.msra.mxu0 %v8548_v61 }
0x1942   :  { %8142 = vmatprep.subr.mxu0 %v9149_v21 }
0x1943   :  { %v5229_v22 = vpop.f32.mrb[96].mxu1  ;;  %v9005_v4 = vpop.eup %9004 }
0x1944   :  { %v5230_v57 = vadd.f32 %v5229_v22, %v9586_v27  ;;  %v8198_v48 = vpop.f32.mrb[97].mxu1  ;;  %v4702_v49 = vmul.f32 %v9005_v4, %v8999_v46  ;;  %v9007_v16 = vpop.eup %9006  ;;  %v3993_v22 = vld [vmem:[%s10856_s15] sm:$0xff] }
0x1945   :  { %8143 = vmatpush3.msra.mxu0 %v4719_v59  ;;  %v4704_v33 = vmul.f32 %v9007_v16, %v9001_v3 }
0x1946   :  { %v5347_v13 = vsel %vm986_vm7, %v5230_v57, -inf  ;;  %8145 = vmatmul.mubr.msk.f32.vlgmr.msra.gmra.mrb[102].mxu0 %vm986_vm7, %v4700_v38  ;;  %8168 = vmatprep.subr.mxu0 %v3994_v43 }
0x1947   :  { %5348 = vmax.xlane.f32.xlu1 %v5347_v13  ;;  %v5234_v15 = vpop.f32.mrb[98].mxu1  ;;  %8147 = vmatprep.mubr.msk.f32.mxu0 %vm9148_vm3, %v9149_v21 }
0x1948   :  { %v5235_v39 = vadd.f32 %v5234_v15, %v9586_v27  ;;  %v8201_v60 = vpop.f32.mrb[99].mxu1  ;;  %8169 = vmatpush3.msra.mxu0 %v3994_v43 }
0x1949   :  { %8179 = vmatprep.subr.mxu0 %v3993_v22 }
0x194a   :  { %v5350_v56 = vsel %vm986_vm7, %v5235_v39, -inf  ;;  %8148 = vmatmul.mubr.msk.f32.gmra.mrb[104].mxu0 %vm986_vm7, %v4702_v49 }
0x194b   :  { %5351 = vmax.xlane.f32.xlu0 %v5350_v56  ;;  %v5239_v19 = vpop.f32.mrb[100].mxu1  ;;  %8150 = vmatprep.mubr.msk.f32.mxu0 %vm9148_vm3, %v9149_v21 }
0x194c   :  { %v5240_v10 = vadd.f32 %v5239_v19, %v9586_v27  ;;  %v8204_v32 = vpop.f32.mrb[101].mxu1 }
0x194e   :  { %v5353_v18 = vsel %vm986_vm7, %v5240_v10, -inf  ;;  %8151 = vmatmul.mubr.msk.f32.gmra.mrb[106].mxu0 %vm986_vm7, %v4704_v33 }
0x194f   :  { %5354 = vmax.xlane.f32.xlu1 %v5353_v18  ;;  %v5333_v46 = vpop.f32.mrb[102].mxu1 }
0x1950   :  { %v5334_v37 = vadd.f32 %v5333_v46, %v9586_v27  ;;  %v8213_v41 = vpop.f32.mrb[103].mxu1 }
0x1952   :  { %v5356_v62 = vsel %vm986_vm7, %v5334_v37, -inf }
0x1953   :  { %5357 = vmax.xlane.f32.xlu0 %v5356_v62  ;;  %v5338_v0 = vpop.f32.mrb[104].mxu1 }
0x1954   :  { %v5339_v24 = vadd.f32 %v5338_v0, %v9586_v27  ;;  %v8216_v47 = vpop.f32.mrb[105].mxu1 }
0x1956   :  { %v5359_v3 = vsel %vm986_vm7, %v5339_v24, -inf }
0x1957   :  { %5360 = vmax.xlane.f32.xlu0 %v5359_v3  ;;  %v5343_v53 = vpop.f32.mrb[106].mxu1 }
0x1958   :  { %v5344_v12 = vadd.f32 %v5343_v53, %v9586_v27  ;;  %v8219_v42 = vpop.f32.mrb[107].mxu1 }
0x195a   :  { %v5362_v61 = vsel %vm986_vm7, %v5344_v12, -inf }
0x195b   :  { %5363 = vmax.xlane.f32.xlu1 %v5362_v61 }
0x19d4   :  { %v5349_v48 = vpop.xlane.xlu1 %5348 }
0x19d5   :  { %v5365_v38 = vsub.f32 %v5230_v57, %v5349_v48 }
0x19d7   :  { %v5371_v59 = vmul.f32 1.442695, %v5365_v38 }
0x19d8   :  { %v5352_v4 = vpop.xlane.xlu0 %5351 }
0x19d9   :  { %9008 = vpow2.f32 %v5371_v59  ;;  %v5366_v13 = vsub.f32 %v5235_v39, %v5352_v4 }
0x19db   :  { %v5373_v15 = vmul.f32 1.442695, %v5366_v13 }
0x19dc   :  { %v5355_v60 = vpop.xlane.xlu1 %5354 }
0x19dd   :  { %9010 = vpow2.f32 %v5373_v15  ;;  %v5367_v49 = vsub.f32 %v5240_v10, %v5355_v60 }
0x19df   :  { %v5375_v16 = vmul.f32 1.442695, %v5367_v49 }
0x19e0   :  { %v5358_v56 = vpop.xlane.xlu0 %5357 }
0x19e1   :  { %9012 = vpow2.f32 %v5375_v16  ;;  %v5368_v19 = vsub.f32 %v5334_v37, %v5358_v56 }
0x19e3   :  { %v10522_v32 = vpop.eup %9008  ;;  %v5377_v33 = vmul.f32 1.442695, %v5368_v19 }
0x19e4   :  { %v5361_v18 = vpop.xlane.xlu0 %5360  ;;  %v5383_v46 = vsel %vm986_vm7, %v10522_v32, 0.0 }
0x19e5   :  { %9014 = vpow2.f32 %v5377_v33  ;;  %v5369_v57 = vsub.f32 %v5339_v24, %v5361_v18  ;;  %5384 = vadd.xlane.f32.xlu0 %v5383_v46 }
0x19e7   :  { %v10526_v41 = vpop.eup %9010  ;;  %v5379_v39 = vmul.f32 1.442695, %v5369_v57 }
0x19e8   :  { %v5386_v10 = vsel %vm986_vm7, %v10526_v41, 0.0  ;;  %v5364_v53 = vpop.xlane.xlu1 %5363 }
0x19e9   :  { %9016 = vpow2.f32 %v5379_v39  ;;  %5387 = vadd.xlane.f32.xlu1 %v5386_v10  ;;  %v5370_v42 = vsub.f32 %v5344_v12, %v5364_v53 }
0x19eb   :  { %v10530_v62 = vpop.eup %9012  ;;  %v5381_v61 = vmul.f32 1.442695, %v5370_v42 }
0x19ec   :  { %v5389_v37 = vsel %vm986_vm7, %v10530_v62, 0.0 }
0x19ed   :  { %5390 = vadd.xlane.f32.xlu1 %v5389_v37  ;;  %9018 = vpow2.f32 %v5381_v61 }
0x19ef   :  { %v10534_v0 = vpop.eup %9014 }
0x19f0   :  { %v5392_v24 = vsel %vm986_vm7, %v10534_v0, 0.0 }
0x19f1   :  { %5393 = vadd.xlane.f32.xlu0 %v5392_v24 }
0x19f3   :  { %v10538_v47 = vpop.eup %9016 }
0x19f4   :  { %v5395_v3 = vsel %vm986_vm7, %v10538_v47, 0.0 }
0x19f5   :  { %5396 = vadd.xlane.f32.xlu0 %v5395_v3 }
0x19fe   :  { %8792 = vrot.lane.b32.xlu1 %v10274_v40, %s9152_s5 }
0x1a02   :  { %5417 = vrot.lane.b32.xlu1 %v10261_v36, %s9152_s5 }
0x1a0b   :  { %8787 = vrot.lane.b32.xlu0 %v10252_v51, %s9152_s5 }
0x1a0f   :  { %8797 = vrot.lane.b32.xlu0 %v10225_v28, %s9153_s9  ;;  %v10561_v28 = vpop.eup %9018 }
0x1a13   :  { %5738 = vrot.lane.b32.xlu0 %v10231_v26, %s9153_s9 }
0x1a17   :  { %5730 = vrot.lane.b32.xlu0 %v10245_v6, %s9153_s9 }
0x1a19   :  { %v4798_v43 = vpop.f32.mrb[102].mxu0 }
0x1a1a   :  { %v8146_v48 = vpop.f32.mrb[103].mxu0  ;;  %8170 = vmatprep.mubr.msk.f32.mxu0 %vm789_vm4, %v4798_v43 }
0x1a1b   :  { %5732 = vrot.lane.b32.xlu0 %v10256_v14, %s9153_s9  ;;  %v5398_v14 = vsel %vm986_vm7, %v10561_v28, 0.0 }
0x1a1d   :  { %v4803_v38 = vpop.f32.mrb[104].mxu0 }
0x1a1e   :  { %v8149_v59 = vpop.f32.mrb[105].mxu0  ;;  %8171 = vmatmul.mubr.msk.f32.vlgmr.msra.gmra.mrb[108].mxu0 %vm789_vm4, %v4803_v38 }
0x1a1f   :  { %5834 = vrot.lane.b32.xlu0 %v10280_v58, %s9153_s9  ;;  %8180 = vmatpush3.msra.mxu0 %v3993_v22 }
0x1a20   :  { %8561 = vmatprep.subr.bf16.mxu0 %v9147_v9 }
0x1a21   :  { %v4808_v26 = vpop.f32.mrb[106].mxu0 }
0x1a22   :  { %v8152_v6 = vpop.f32.mrb[107].mxu0  ;;  %8173 = vmatprep.mubr.msk.f32.mxu0 %vm789_vm4, %v4808_v26 }
0x1a23   :  { %8174 = vmatmul.mubr.msk.f32.gmra.mrb[110].mxu0 %vm789_vm4, %v10494_v29 }
0x1a24   :  { %8176 = vmatprep.mubr.msk.f32.mxu0 %vm789_vm4, %v10496_v8 }
0x1a26   :  { %5399 = vadd.xlane.f32.xlu1 %v5398_v14 }
0x1a27   :  { %8177 = vmatmul.mubr.msk.f32.gmra.mrb[112].mxu0 %vm789_vm4, %v10498_v17  ;;  %v3995_v17 = vld [vmem:[%s10856_s15 + $0x10] sm:$0xff] }
0x1a28   :  { %8181 = vmatprep.mubr.msk.f32.mxu0 %vm789_vm4, %v10423_v63 }
0x1a2b   :  { %8182 = vmatmul.mubr.msk.f32.vlgmr.msra.gmra.mrb[108].mxu0 %vm789_vm4, %v10425_v1 }
0x1a2c   :  { %8184 = vmatprep.mubr.msk.f32.mxu0 %vm789_vm4, %v10427_v5 }
0x1a2f   :  { %8185 = vmatmul.mubr.msk.f32.gmra.mrb[110].mxu0 %vm789_vm4, %v10358_v50 }
0x1a30   :  { %8187 = vmatprep.mubr.msk.f32.mxu0 %vm789_vm4, %v10360_v30 }
0x1a33   :  { %8188 = vmatmul.mubr.msk.f32.gmra.mrb[112].mxu0 %vm789_vm4, %v10363_v2 }
0x1a34   :  { %8226 = vmatprep.mubr.msk.f32.mxu0 %vm9148_vm3, %v9149_v21 }
0x1a37   :  { %5515 = vrot.lane.b32.xlu1 %v10283_v45, %s9152_s5 }
0x1a3b   :  { %8802 = vrot.lane.b32.xlu1 %v10241_v25, %s9153_s9 }
0x1a3f   :  { %5728 = vrot.lane.b32.xlu1 %v10235_v23, %s9153_s9 }
0x1a43   :  { %5842 = vrot.lane.b32.xlu1 %v10259_v7, %s9153_s9 }
0x1a47   :  { %5832 = vrot.lane.b32.xlu1 %v10270_v20, %s9153_s9 }
0x1a4b   :  { %5836 = vrot.lane.b32.xlu1 %v10290_v52, %s9153_s9 }
0x1a72   :  { %v5385_v50 = vpop.xlane.xlu0 %5384 }
0x1a73   :  { %9020 = vrcp.f32 %v5385_v50 }
0x1a76   :  { %v5388_v58 = vpop.xlane.xlu1 %5387 }
0x1a77   :  { %9022 = vrcp.f32 %v5388_v58 }
0x1a7a   :  { %v5391_v30 = vpop.xlane.xlu1 %5390 }
0x1a7b   :  { %9024 = vrcp.f32 %v5391_v30 }
0x1a7d   :  { %v9021_v8 = vpop.eup %9020 }
0x1a7e   :  { %v5394_v2 = vpop.xlane.xlu0 %5393  ;;  %v8793_v63 = vpop.permute.xlu1 %8792  ;;  %v5402_v12 = vmul.f32 %v9021_v8, %v10522_v32 }
0x1a7f   :  { %v8795_v1 = vunpack.i.h.bf16 %v8793_v63  ;;  %v8794_v25 = vunpack.i.l.bf16 %v8793_v63  ;;  %9026 = vrcp.f32 %v5394_v2 }
0x1a81   :  { %v8565_v5 = vpack.c.bf16 %v8795_v1, %v8794_v25  ;;  %v9023_v4 = vpop.eup %9022 }
0x1a82   :  { %v5397_v23 = vpop.xlane.xlu0 %5396  ;;  %v5418_v22 = vpop.permute.xlu1 %5417  ;;  %v5404_v13 = vmul.f32 %v9023_v4, %v10526_v41 }
0x1a83   :  { %8566 = vmatpush3.bf16.msra.mxu1 %v8565_v5  ;;  %9028 = vrcp.f32 %v5397_v23 }
0x1a84   :  { %8239 = vmatprep.subr.mxu1 %v9149_v21 }
0x1a85   :  { %v9025_v15 = vpop.eup %9024 }
0x1a86   :  { %v8788_v7 = vpop.permute.xlu0 %8787  ;;  %v5406_v60 = vmul.f32 %v9025_v15, %v10530_v62 }
0x1a87   :  { %v8790_v20 = vunpack.i.h.bf16 %v8788_v7  ;;  %v8789_v29 = vunpack.i.l.bf16 %v8788_v7 }
0x1a89   :  { %v8562_v52 = vpack.c.bf16 %v8790_v20, %v8789_v29  ;;  %v9027_v16 = vpop.eup %9026 }
0x1a8a   :  { %v8798_v56 = vpop.permute.xlu0 %8797  ;;  %v5408_v19 = vmul.f32 %v9027_v16, %v10534_v0 }
0x1a8b   :  { %8563 = vmatpush3.bf16.msra.mxu0 %v8562_v52  ;;  %v8800_v18 = vunpack.i.h.bf16 %v8798_v56  ;;  %v8799_v46 = vunpack.i.l.bf16 %v8798_v56 }
0x1a8c   :  { %8224 = vmatprep.subr.mxu0 %v9149_v21 }
0x1a8d   :  { %v9029_v33 = vpop.eup %9028  ;;  %v8568_v41 = vpack.c.bf16 %v8800_v18, %v8799_v46 }
0x1a8e   :  { %v5410_v57 = vmul.f32 %v9029_v33, %v10538_v47  ;;  %v5739_v37 = vpop.permute.xlu0 %5738 }
0x1a8f   :  { %8225 = vmatpush3.msra.mxu0 %v5418_v22 }
0x1a90   :  { %8227 = vmatmul.mubr.msk.f32.vlgmr.msra.gmra.mrb[114].mxu0 %vm986_vm7, %v5402_v12  ;;  %8250 = vmatprep.subr.mxu0 %v3995_v17 }
0x1a91   :  { %8229 = vmatprep.mubr.msk.f32.mxu0 %vm9148_vm3, %v9149_v21  ;;  %8251 = vmatpush3.msra.mxu0 %v3995_v17 }
0x1a92   :  { %8571 = vmatprep.subr.bf16.mxu0 %v9147_v9  ;;  %v5731_v24 = vpop.permute.xlu0 %5730 }
0x1a94   :  { %8230 = vmatmul.mubr.msk.f32.gmra.mrb[116].mxu0 %vm986_vm7, %v5404_v13 }
0x1a95   :  { %8232 = vmatprep.mubr.msk.f32.mxu0 %vm9148_vm3, %v9149_v21 }
0x1a96   :  { %v5733_v47 = vpop.permute.xlu0 %5732 }
0x1a98   :  { %8233 = vmatmul.mubr.msk.f32.gmra.mrb[118].mxu0 %vm986_vm7, %v5406_v60 }
0x1a9a   :  { %v5835_v63 = vpop.permute.xlu0 %5834 }
0x1ab3   :  { %v5400_v49 = vpop.xlane.xlu1 %5399 }
0x1ab4   :  { %9030 = vrcp.f32 %v5400_v49 }
0x1ab7   :  { %v5516_v32 = vpop.permute.xlu1 %5515 }
0x1ab8   :  { %8240 = vmatpush3.msra.mxu1 %v5516_v32 }
0x1ab9   :  { %8242 = vmatmul.mubr.msk.f32.vlgmr.msra.gmra.mrb[108].mxu1 %vm986_vm7, %v5408_v19  ;;  %8567 = vmatprep.subr.bf16.mxu1 %v9147_v9 }
0x1aba   :  { %8244 = vmatprep.mubr.msk.f32.mxu1 %vm9148_vm3, %v9149_v21 }
0x1abb   :  { %v8803_v62 = vpop.permute.xlu1 %8802 }
0x1abc   :  { %v8805_v3 = vunpack.i.h.bf16 %v8803_v62  ;;  %v8804_v53 = vunpack.i.l.bf16 %v8803_v62 }
0x1abd   :  { %8245 = vmatmul.mubr.msk.f32.gmra.mrb[110].mxu1 %vm986_vm7, %v5410_v57 }
0x1abe   :  { %v9031_v39 = vpop.eup %9030  ;;  %8247 = vmatprep.mubr.msk.f32.mxu1 %vm9148_vm3, %v9149_v21  ;;  %v8572_v43 = vpack.c.bf16 %v8805_v3, %v8804_v53 }
0x1abf   :  { %8570 = vmatpush3.bf16.xpose.msk.msra.mxu1 %vm9512_vm5, %v8568_v41  ;;  %v5412_v10 = vmul.f32 %v9031_v39, %v10561_v28  ;;  %v5729_v0 = vpop.permute.xlu1 %5728 }
0x1ac0   :  { %8265 = vmatprep.subr.mxu1 %v9149_v21 }
0x1ac1   :  { %8248 = vmatmul.mubr.msk.f32.gmra.mrb[112].mxu1 %vm986_vm7, %v5412_v10 }
0x1ac2   :  { %8267 = vmatprep.mubr.msk.f32.mxu1 %vm9148_vm3, %v9149_v21 }
0x1ac3   :  { %v5843_v26 = vpop.permute.xlu1 %5842 }
0x1ac7   :  { %8266 = vmatpush3.xpose.msk.msra.mxu1 %vm789_vm4, %v5739_v37  ;;  %v5833_v2 = vpop.permute.xlu1 %5832 }
0x1ac8   :  { %8575 = vmatprep.subr.bf16.mxu1 %v9147_v9 }
0x1aca   :  { %8268 = vmatmul.mubr.msk.f32.vlgmr.msra.gmra.mrb[114].mxu1 %vm789_vm4, %v5729_v0 }
0x1acb   :  { %8270 = vmatprep.mubr.msk.f32.mxu1 %vm9148_vm3, %v9149_v21  ;;  %v5837_v23 = vpop.permute.xlu1 %5836 }
0x1ace   :  { %8271 = vmatmul.mubr.msk.f32.gmra.mrb[116].mxu1 %vm789_vm4, %v5731_v24 }
0x1acf   :  { %8273 = vmatprep.mubr.msk.f32.mxu1 %vm9148_vm3, %v9149_v21 }
0x1ad2   :  { %8274 = vmatmul.mubr.msk.f32.gmra.mrb[118].mxu1 %vm789_vm4, %v5733_v47 }
0x1ad3   :  { %8297 = vmatprep.mubr.msk.f32.mxu1 %vm9148_vm3, %v9149_v21 }
0x1b63   :  { %v5497_v42 = vpop.f32.mrb[114].mxu0 }
0x1b64   :  { %v8228_v61 = vpop.f32.mrb[115].mxu0  ;;  %8252 = vmatprep.mubr.msk.f32.mxu0 %vm789_vm4, %v5497_v42 }
0x1b67   :  { %v5502_v48 = vpop.f32.mrb[116].mxu0 }
0x1b68   :  { %v8231_v38 = vpop.f32.mrb[117].mxu0  ;;  %8253 = vmatmul.mubr.msk.f32.vlgmr.msra.gmra.mrb[108].mxu0 %vm789_vm4, %v5502_v48 }
0x1b69   :  { %8574 = vmatpush3.bf16.xpose.msk.msra.mxu0 %vm9512_vm5, %v8572_v43 }
0x1b6a   :  { %8280 = vmatprep.subr.mxu0 %v9149_v21 }
0x1b6b   :  { %v5507_v59 = vpop.f32.mrb[118].mxu0 }
0x1b6c   :  { %v8234_v28 = vpop.f32.mrb[119].mxu0  ;;  %8255 = vmatprep.mubr.msk.f32.mxu0 %vm789_vm4, %v5507_v59 }
0x1b71   :  { %8281 = vmatpush3.xpose.msk.msra.mxu0 %vm789_vm4, %v5843_v26 }
0x1b72   :  { %8578 = vmatprep.subr.bf16.mxu0 %v9147_v9 }
0x1b8c   :  { %v5595_v6 = vpop.f32.mrb[108].mxu1 }
0x1b8d   :  { %v8243_v14 = vpop.f32.mrb[109].mxu1  ;;  %8256 = vmatmul.mubr.msk.f32.gmra.mrb[110].mxu0 %vm789_vm4, %v5595_v6 }
0x1b90   :  { %v5600_v58 = vpop.f32.mrb[110].mxu1 }
0x1b91   :  { %v8246_v50 = vpop.f32.mrb[111].mxu1  ;;  %8258 = vmatprep.mubr.msk.f32.mxu0 %vm789_vm4, %v5600_v58 }
0x1b94   :  { %v5605_v55 = vpop.f32.mrb[112].mxu1 }
0x1b95   :  { %v8249_v30 = vpop.f32.mrb[113].mxu1  ;;  %8259 = vmatmul.mubr.msk.f32.gmra.mrb[112].mxu0 %vm789_vm4, %v5605_v55 }
0x1b96   :  { %8282 = vmatprep.mubr.msk.f32.mxu0 %vm9148_vm3, %v9149_v21 }
0x1b99   :  { %8283 = vmatmul.mubr.msk.f32.vlgmr.msra.gmra.mrb[120].mxu0 %vm789_vm4, %v5833_v2 }
0x1b9a   :  { %8285 = vmatprep.mubr.msk.f32.mxu0 %vm9148_vm3, %v9149_v21 }
0x1b9d   :  { %v5818_v1 = vpop.f32.mrb[114].mxu1  ;;  %8286 = vmatmul.mubr.msk.f32.gmra.mrb[122].mxu0 %vm789_vm4, %v5835_v63 }
0x1b9e   :  { %v5819_v25 = vadd.f32 %v5818_v1, %v9586_v27  ;;  %v8269_v5 = vpop.f32.mrb[115].mxu1  ;;  %8288 = vmatprep.mubr.msk.f32.mxu0 %vm9148_vm3, %v9149_v21 }
0x1ba0   :  { %v5936_v7 = vsel %vm986_vm7, %v5819_v25, -inf }
0x1ba1   :  { %8289 = vmatmul.mubr.msk.f32.gmra.mrb[124].mxu0 %vm789_vm4, %v5837_v23  ;;  %5937 = vmax.xlane.f32.xlu0 %v5936_v7  ;;  %v5823_v20 = vpop.f32.mrb[116].mxu1 }
0x1ba2   :  { %v5824_v29 = vadd.f32 %v5823_v20, %v9586_v27  ;;  %v8272_v52 = vpop.f32.mrb[117].mxu1  ;;  %8312 = vmatprep.mubr.msk.f32.mxu0 %vm9148_vm3, %v9149_v21 }
0x1ba4   :  { %v5939_v8 = vsel %vm986_vm7, %v5824_v29, -inf }
0x1ba5   :  { %5940 = vmax.xlane.f32.xlu1 %v5939_v8  ;;  %v5828_v17 = vpop.f32.mrb[118].mxu1 }
0x1ba6   :  { %v5829_v12 = vadd.f32 %v5828_v17, %v9586_v27  ;;  %v8275_v22 = vpop.f32.mrb[119].mxu1 }
0x1ba8   :  { %v5942_v4 = vsel %vm986_vm7, %v5829_v12, -inf }
0x1ba9   :  { %5943 = vmax.xlane.f32.xlu0 %v5942_v4 }
0x1c2e   :  { %v5938_v56 = vpop.xlane.xlu0 %5937 }
0x1c2f   :  { %v5954_v19 = vsub.f32 %v5819_v25, %v5938_v56 }
0x1c31   :  { %v5960_v33 = vmul.f32 1.442695, %v5954_v19 }
0x1c32   :  { %v5941_v13 = vpop.xlane.xlu1 %5940 }
0x1c33   :  { %v5955_v15 = vsub.f32 %v5824_v29, %v5941_v13 }
0x1c35   :  { %v5962_v60 = vmul.f32 1.442695, %v5955_v15 }
0x1c36   :  { %v5944_v32 = vpop.xlane.xlu0 %5943 }
0x1c37   :  { %9032 = vpow2.f32 %v5962_v60  ;;  %v5956_v18 = vsub.f32 %v5829_v12, %v5944_v32 }
0x1c38   :  { %9034 = vpow2.f32 %v5960_v33 }
0x1c39   :  { %v5964_v46 = vmul.f32 1.442695, %v5956_v18 }
0x1c3b   :  { %9036 = vpow2.f32 %v5964_v46 }
0x1c41   :  { %v10667_v49 = vpop.eup %9032 }
0x1c42   :  { %v5975_v16 = vsel %vm986_vm7, %v10667_v49, 0.0  ;;  %v9035_v62 = vpop.eup %9034 }
0x1c43   :  { %5976 = vadd.xlane.f32.xlu1 %v5975_v16 }
0x1c45   :  { %v9037_v0 = vpop.eup %9036 }
0x1c46   :  { %v5978_v3 = vsel %vm986_vm7, %v9037_v0, 0.0 }
0x1c54   :  { %6006 = vrot.lane.b32.xlu1 %v10261_v36, %s9153_s9 }
0x1c58   :  { %8812 = vrot.lane.b32.xlu1 %v10274_v40, %s9153_s9  ;;  %v5972_v40 = vsel %vm986_vm7, %v9035_v62, 0.0 }
0x1c6c   :  { %v5922_v57 = vpop.f32.mrb[120].mxu0 }
0x1c6d   :  { %v5923_v41 = vadd.f32 %v5922_v57, %v9586_v27  ;;  %v8284_v39 = vpop.f32.mrb[121].mxu0 }
0x1c6f   :  { %v5945_v10 = vsel %vm986_vm7, %v5923_v41, -inf }
0x1c70   :  { %v5927_v37 = vpop.f32.mrb[122].mxu0  ;;  %5946 = vmax.xlane.f32.xlu0 %v5945_v10 }
0x1c71   :  { %v8287_v36 = vpop.f32.mrb[123].mxu0  ;;  %v5928_v53 = vadd.f32 %v5927_v37, %v9586_v27 }
0x1c72   :  { %v3996_v36 = vld [vmem:[%s10856_s15 + $0x18] sm:$0xff] }
0x1c73   :  { %v5948_v42 = vsel %vm986_vm7, %v5928_v53, -inf }
0x1c74   :  { %v5932_v24 = vpop.f32.mrb[124].mxu0  ;;  %5973 = vadd.xlane.f32.xlu0 %v5972_v40 }
0x1c75   :  { %v8290_v47 = vpop.f32.mrb[125].mxu0  ;;  %v5933_v12 = vadd.f32 %v5932_v24, %v9586_v27 }
0x1c77   :  { %v5951_v22 = vsel %vm986_vm7, %v5933_v12, -inf }
0x1c78   :  { %5979 = vadd.xlane.f32.xlu0 %v5978_v3 }
0x1c8e   :  { %8807 = vrot.lane.b32.xlu0 %v10252_v51, %s9153_s9 }
0x1cad   :  { %5949 = vmax.xlane.f32.xlu0 %v5948_v42 }
0x1cd0   :  { %v5977_v61 = vpop.xlane.xlu1 %5976 }
0x1cd4   :  { %v6007_v43 = vpop.permute.xlu1 %6006 }
0x1cd8   :  { %v8813_v48 = vpop.permute.xlu1 %8812 }
0x1cd9   :  { %v8815_v38 = vunpack.i.h.bf16 %v8813_v48  ;;  %v8814_v59 = vunpack.i.l.bf16 %v8813_v48  ;;  %v7205_v48 = vld [vmem:[%s10857_s16] ss:$0 sm:$0xff] }
0x1cdb   :  { %v8579_v28 = vpack.c.bf16 %v8815_v38, %v8814_v59 }
0x1cdd   :  { %8580 = vmatpush3.bf16.msra.mxu0 %v8579_v28 }
0x1cde   :  { %8310 = vmatprep.subr.mxu0 %v9149_v21 }
0x1cfd   :  { %v5947_v26 = vpop.xlane.xlu0 %5946 }
0x1cfe   :  { %v5957_v6 = vsub.f32 %v5923_v41, %v5947_v26 }
0x1d00   :  { %v5966_v14 = vmul.f32 1.442695, %v5957_v6 }
0x1d01   :  { %v5974_v58 = vpop.xlane.xlu0 %5973 }
0x1d02   :  { %9038 = vpow2.f32 %v5966_v14 }
0x1d03   :  { %9040 = vrcp.f32 %v5974_v58 }
0x1d04   :  { %9042 = vrcp.f32 %v5977_v61 }
0x1d05   :  { %v5980_v51 = vpop.xlane.xlu0 %5979 }
0x1d06   :  { %9044 = vrcp.f32 %v5980_v51 }
0x1d09   :  { %v8808_v50 = vpop.permute.xlu0 %8807 }
0x1d0a   :  { %v8810_v55 = vunpack.i.h.bf16 %v8808_v50  ;;  %v8809_v30 = vunpack.i.l.bf16 %v8808_v50 }
0x1d0c   :  { %v9039_v2 = vpop.eup %9038  ;;  %v8576_v63 = vpack.c.bf16 %v8810_v55, %v8809_v30 }
0x1d0d   :  { %v5981_v1 = vsel %vm986_vm7, %v9039_v2, 0.0  ;;  %v9041_v25 = vpop.eup %9040 }
0x1d0e   :  { %5982 = vadd.xlane.f32.xlu1 %v5981_v1  ;;  %8577 = vmatpush3.bf16.msra.mxu1 %v8576_v63  ;;  %v5991_v5 = vmul.f32 %v9041_v25, %v9035_v62  ;;  %v9043_v23 = vpop.eup %9042 }
0x1d0f   :  { %8295 = vmatprep.subr.mxu1 %v9149_v21  ;;  %v5993_v7 = vmul.f32 %v9043_v23, %v10667_v49 }
0x1d10   :  { %v9045_v20 = vpop.eup %9044 }
0x1d11   :  { %v5995_v29 = vmul.f32 %v9045_v20, %v9037_v0 }
0x1d12   :  { %8296 = vmatpush3.msra.mxu1 %v6007_v43 }
0x1d13   :  { %8298 = vmatmul.mubr.msk.f32.vlgmr.msra.gmra.mrb[120].mxu1 %vm986_vm7, %v5991_v5 }
0x1d14   :  { %8300 = vmatprep.mubr.msk.f32.mxu1 %vm9148_vm3, %v9149_v21 }
0x1d17   :  { %8301 = vmatmul.mubr.msk.f32.gmra.mrb[122].mxu1 %vm986_vm7, %v5993_v7 }
0x1d18   :  { %8303 = vmatprep.mubr.msk.f32.mxu1 %vm9148_vm3, %v9149_v21 }
0x1d1b   :  { %8304 = vmatmul.mubr.msk.f32.gmra.mrb[124].mxu1 %vm986_vm7, %v5995_v29 }
0x1d1f   :  { %6104 = vrot.lane.b32.xlu1 %v10283_v45, %s9153_s9 }
0x1d3a   :  { %v5950_v52 = vpop.xlane.xlu0 %5949 }
0x1d3b   :  { %v5958_v8 = vsub.f32 %v5928_v53, %v5950_v52 }
0x1d3d   :  { %v5968_v17 = vmul.f32 1.442695, %v5958_v8 }
0x1d3f   :  { %9046 = vpow2.f32 %v5968_v17 }
0x1d43   :  { %5952 = vmax.xlane.f32.xlu1 %v5951_v22 }
0x1d49   :  { %v9047_v4 = vpop.eup %9046 }
0x1d4a   :  { %v5984_v13 = vsel %vm986_vm7, %v9047_v4, 0.0 }
0x1d4b   :  { %5985 = vadd.xlane.f32.xlu0 %v5984_v13 }
0x1d9b   :  { %v5983_v15 = vpop.xlane.xlu1 %5982 }
0x1d9c   :  { %9048 = vrcp.f32 %v5983_v15 }
0x1d9f   :  { %v6105_v60 = vpop.permute.xlu1 %6104 }
0x1da0   :  { %8311 = vmatpush3.msra.mxu0 %v6105_v60 }
0x1da1   :  { %8321 = vmatprep.subr.mxu0 %v3996_v36 }
0x1da6   :  { %v9049_v49 = vpop.eup %9048 }
0x1da7   :  { %v5997_v16 = vmul.f32 %v9049_v49, %v9039_v2 }
0x1da9   :  { %8313 = vmatmul.mubr.msk.f32.vlgmr.msra.gmra.mrb[126].mxu0 %vm986_vm7, %v5997_v16 }
0x1daa   :  { %8315 = vmatprep.mubr.msk.f32.mxu0 %vm9148_vm3, %v9149_v21  ;;  %8322 = vmatpush3.msra.mxu0 %v3996_v36 }
0x1dab   :  { %8605 = vmatprep.subr.bf16.mxu0 %v9147_v9 }
0x1dd0   :  { %v5953_v27 = vpop.xlane.xlu1 %5952 }
0x1dd1   :  { %v5959_v45 = vsub.f32 %v5933_v12, %v5953_v27  ;;  %v6440_v27 = vld [vmem:[%s10858_s18] sm:$0xff] }
0x1dd3   :  { %v5970_v56 = vmul.f32 1.442695, %v5959_v45  ;;  %v6441_v45 = vld [vmem:[%s10858_s18 + $0x8] sm:$0xff] }
0x1dd5   :  { %9050 = vpow2.f32 %v5970_v56  ;;  %v8581_v56 = vpack.c.bf16 %v6441_v45, %v6440_v27  ;;  %v6623_v27 = vld [vmem:[%s10861_s26 + $0x28] sm:$0xff] }
0x1dd7   :  { %8582 = vmatprep.subr.bf16.mxu1 %v8581_v56 }
0x1dd8   :  { %v5986_v19 = vpop.xlane.xlu0 %5985  ;;  %8584 = vmatpush3.bf16.msra.mxu1 %v8581_v56  ;;  %v6624_v56 = vld [vmem:[%s10861_s26 + $0x30] sm:$0xff] }
0x1dd9   :  { %9052 = vrcp.f32 %v5986_v19  ;;  %v6442_v19 = vld [vmem:[%s10858_s18 + $0x10] sm:$0xff] }
0x1ddf   :  { %v9051_v32 = vpop.eup %9050 }
0x1de0   :  { %v5987_v33 = vsel %vm986_vm7, %v9051_v32, 0.0 }
0x1de1   :  { %5988 = vadd.xlane.f32.xlu0 %v5987_v33 }
0x1de3   :  { %v9053_v18 = vpop.eup %9052 }
0x1de4   :  { %v5999_v46 = vmul.f32 %v9053_v18, %v9047_v4 }
0x1de6   :  { %v6086_v57 = vpop.f32.mrb[120].mxu1  ;;  %8316 = vmatmul.mubr.msk.f32.gmra.mrb[128].mxu0 %vm986_vm7, %v5999_v46 }
0x1de7   :  { %v8299_v41 = vpop.f32.mrb[121].mxu1  ;;  %8318 = vmatprep.mubr.msk.f32.mxu0 %vm9148_vm3, %v9149_v21 }
0x1dea   :  { %v6091_v39 = vpop.f32.mrb[122].mxu1 }
0x1deb   :  { %v8302_v10 = vpop.f32.mrb[123].mxu1 }
0x1dee   :  { %v6096_v62 = vpop.f32.mrb[124].mxu1 }
0x1def   :  { %v8305_v37 = vpop.f32.mrb[125].mxu1 }
0x1e6e   :  { %v5989_v40 = vpop.xlane.xlu0 %5988 }
0x1e6f   :  { %9054 = vrcp.f32 %v5989_v40 }
0x1e79   :  { %v9055_v0 = vpop.eup %9054 }
0x1e7a   :  { %v6001_v24 = vmul.f32 %v9055_v0, %v9051_v32  ;;  %v6443_v32 = vld [vmem:[%s10858_s18 + $0x18] sm:$0xff] }
0x1e7b   :  { %v8585_v33 = vpack.c.bf16 %v6443_v32, %v6442_v19  ;;  %v6625_v19 = vld [vmem:[%s10861_s26 + $0x38] sm:$0xff] }
0x1e7c   :  { %v6184_v47 = vpop.f32.mrb[126].mxu0  ;;  %8319 = vmatmul.mubr.msk.f32.gmra.mrb[130].mxu0 %vm986_vm7, %v6001_v24  ;;  %v8601_v32 = vpack.c.bf16 %v6625_v19, %v6624_v56 }
0x1e7d   :  { %v8314_v3 = vpop.f32.mrb[127].mxu0  ;;  %8323 = vmatprep.mubr.msk.f32.mxu0 %vm789_vm4, %v6086_v57  ;;  %8586 = vmatprep.subr.bf16.mxu1 %v8585_v33 }
0x1e7e   :  { %8588 = vmatpush3.bf16.msra.mxu1 %v8585_v33 }
0x1e80   :  { %8324 = vmatmul.mubr.msk.f32.vlgmr.msra.gmra.mrb[108].mxu0 %vm789_vm4, %v6091_v39 }
0x1e81   :  { %8326 = vmatprep.mubr.msk.f32.mxu0 %vm789_vm4, %v6096_v62 }
0x1e84   :  { %8327 = vmatmul.mubr.msk.f32.gmra.mrb[110].mxu0 %vm789_vm4, %v6184_v47 }
0x1eb9   :  { %v6189_v53 = vpop.f32.mrb[128].mxu0 }
0x1eba   :  { %v8317_v42 = vpop.f32.mrb[129].mxu0  ;;  %8329 = vmatprep.mubr.msk.f32.mxu0 %vm789_vm4, %v6189_v53 }
0x1f4f   :  { %v6194_v61 = vpop.f32.mrb[130].mxu0 }
0x1f50   :  { %v8320_v43 = vpop.f32.mrb[131].mxu0  ;;  %8330 = vmatmul.mubr.msk.f32.gmra.mrb[112].mxu0 %vm789_vm4, %v6194_v61 }
0x1f51   :  { %8382 = vmatprep.mubr.msk.f32.mxu0 %vm9148_vm3, %v9149_v21 }
0x1f53   :  { %v8325_v38 = vpop.f32.mrb[108].mxu0 }
0x1f54   :  { %v6325_v59 = vadd.f32 %v8325_v38, %v7205_v48  ;;  %v6282_v28 = vpop.f32.mrb[109].mxu0  ;;  %v10747_v38 = vld [vmem:[%s10859_s22] ss:$0 sm:$0xff] }
0x1f55   :  { %v6324_v26 = vadd.f32 %v7205_v48, %v6282_v28 }
0x1f56   :  { %v6331_v6 = vadd.f32 %v6325_v59, %v10115_v54 }
0x1f57   :  { %v10720_v14 = vadd.f32 %v6324_v26, %v10118_v35  ;;  %v8328_v58 = vpop.f32.mrb[110].mxu0 }
0x1f58   :  { %v6327_v51 = vadd.f32 %v8328_v58, %v7205_v48  ;;  %v6292_v50 = vpop.f32.mrb[111].mxu0  ;;  %v6341_v55 = vsel %vm339_vm2, %v6331_v6, 0.0 }
0x1f59   :  { %v6326_v30 = vadd.f32 %v7205_v48, %v6292_v50  ;;  %6342 = vadd.xlane.f32.xlu1 %v6341_v55  ;;  %v6338_v2 = vsel %vm339_vm2, %v10720_v14, 0.0 }
0x1f5a   :  { %v10726_v21 = vadd.f32 %v6327_v51, %v10125_v34  ;;  %6339 = vadd.xlane.f32.xlu0 %v6338_v2 }
0x1f5b   :  { %v6332_v63 = vadd.f32 %v6326_v30, %v10128_v31 }
0x1f5c   :  { %v6347_v54 = vsel %vm339_vm2, %v10726_v21, 0.0 }
0x1f5d   :  { %6348 = vadd.xlane.f32.xlu1 %v6347_v54  ;;  %v6344_v35 = vsel %vm339_vm2, %v6332_v63, 0.0 }
0x1f5e   :  { %6345 = vadd.xlane.f32.xlu0 %v6344_v35 }
0x1fe6   :  { %v6343_v1 = vpop.xlane.xlu1 %6342 }
0x1fe7   :  { %v6357_v25 = vmul.f32 0.03125, %v6343_v1  ;;  %v6340_v5 = vpop.xlane.xlu0 %6339 }
0x1fe8   :  { %v6356_v23 = vmul.f32 0.03125, %v6340_v5 }
0x1fe9   :  { %v6363_v7 = vsub.f32 %v6331_v6, %v6357_v25  ;;  %v10750_v6 = vld [vmem:[%s10860_s23] ss:$0 sm:$0xff] }
0x1fea   :  { %v6362_v20 = vsub.f32 %v10720_v14, %v6356_v23  ;;  %v6349_v29 = vpop.xlane.xlu1 %6348 }
0x1feb   :  { %v6359_v34 = vmul.f32 0.03125, %v6349_v29  ;;  %v6346_v52 = vpop.xlane.xlu0 %6345  ;;  %v6369_v8 = vmul.f32 %v6363_v7, %v6363_v7 }
0x1fec   :  { %v6358_v31 = vmul.f32 0.03125, %v6346_v52  ;;  %v6368_v17 = vmul.f32 %v6362_v20, %v6362_v20 }
0x1fed   :  { %v6365_v12 = vsub.f32 %v10726_v21, %v6359_v34  ;;  %v6377_v22 = vsel %vm339_vm2, %v6369_v8, 0.0 }
0x1fee   :  { %v6364_v4 = vsub.f32 %v6332_v63, %v6358_v31  ;;  %6378 = vadd.xlane.f32.xlu1 %v6377_v22  ;;  %v6374_v13 = vsel %vm339_vm2, %v6368_v17, 0.0  ;;  %v6618_v22 = vld [vmem:[%s10861_s26] sm:$0xff] }
0x1fef   :  { %6375 = vadd.xlane.f32.xlu0 %v6374_v13  ;;  %v6371_v15 = vmul.f32 %v6365_v12, %v6365_v12 }
0x1ff0   :  { %v6370_v60 = vmul.f32 %v6364_v4, %v6364_v4 }
0x1ff1   :  { %v6383_v49 = vsel %vm339_vm2, %v6371_v15, 0.0  ;;  %v6620_v15 = vld [vmem:[%s10861_s26 + $0x10] sm:$0xff] }
0x1ff2   :  { %6384 = vadd.xlane.f32.xlu1 %v6383_v49  ;;  %v6380_v16 = vsel %vm339_vm2, %v6370_v60, 0.0  ;;  %v6621_v60 = vld [vmem:[%s10861_s26 + $0x18] sm:$0xff] }
0x1ff3   :  { %6381 = vadd.xlane.f32.xlu0 %v6380_v16  ;;  %v8593_v49 = vpack.c.bf16 %v6621_v60, %v6620_v15  ;;  %v6622_v16 = vld [vmem:[%s10861_s26 + $0x20] sm:$0xff] }
0x1ff4   :  { %v8597_v45 = vpack.c.bf16 %v6623_v27, %v6622_v16 }
0x2023   :  { %v8331_v18 = vpop.f32.mrb[112].mxu0 }
0x2024   :  { %v6329_v46 = vadd.f32 %v8331_v18, %v7205_v48  ;;  %v6302_v57 = vpop.f32.mrb[113].mxu0 }
0x2025   :  { %v6328_v41 = vadd.f32 %v7205_v48, %v6302_v57 }
0x2026   :  { %v6335_v39 = vadd.f32 %v6329_v46, %v10135_v44 }
0x2027   :  { %v6334_v10 = vadd.f32 %v6328_v41, %v10138_v11 }
0x2028   :  { %v6353_v62 = vsel %vm339_vm2, %v6335_v39, 0.0 }
0x2029   :  { %6354 = vadd.xlane.f32.xlu1 %v6353_v62  ;;  %v6350_v37 = vsel %vm339_vm2, %v6334_v10, 0.0 }
0x202a   :  { %6351 = vadd.xlane.f32.xlu0 %v6350_v37 }
0x207b   :  { %v6379_v36 = vpop.xlane.xlu1 %6378 }
0x207c   :  { %v6393_v40 = vmul.f32 0.03125, %v6379_v36  ;;  %v6376_v0 = vpop.xlane.xlu0 %6375 }
0x207d   :  { %v6392_v24 = vmul.f32 0.03125, %v6376_v0 }
0x207e   :  { %v6399_v47 = vadd.f32 1e-12, %v6393_v40 }
0x207f   :  { %v6398_v3 = vadd.f32 1e-12, %v6392_v24  ;;  %v6385_v53 = vpop.xlane.xlu1 %6384 }
0x2080   :  { %9056 = vrsqrt.f32 %v6399_v47  ;;  %v6395_v42 = vmul.f32 0.03125, %v6385_v53  ;;  %v6382_v44 = vpop.xlane.xlu0 %6381 }
0x2081   :  { %9058 = vrsqrt.f32 %v6398_v3  ;;  %v6394_v11 = vmul.f32 0.03125, %v6382_v44  ;;  %v7208_v3 = vld [vmem:[%s10862_s28] ss:$0 sm:$0xff] }
0x2082   :  { %v6401_v61 = vadd.f32 1e-12, %v6395_v42 }
0x2083   :  { %v6400_v43 = vadd.f32 1e-12, %v6394_v11 }
0x2084   :  { %9060 = vrsqrt.f32 %v6401_v61 }
0x2085   :  { %9062 = vrsqrt.f32 %v6400_v43 }
0x208a   :  { %v9057_v48 = vpop.eup %9056 }
0x208b   :  { %v9059_v59 = vpop.eup %9058  ;;  %v6411_v28 = vmul.f32 %v9057_v48, %v6363_v7 }
0x208c   :  { %v6410_v26 = vmul.f32 %v9059_v59, %v6362_v20 }
0x208d   :  { %v6423_v58 = vmul.f32 %v10747_v38, %v6411_v28 }
0x208e   :  { %v9061_v51 = vpop.eup %9060  ;;  %v6422_v50 = vmul.f32 %v10747_v38, %v6410_v26 }
0x208f   :  { %v9063_v55 = vpop.eup %9062  ;;  %v6413_v30 = vmul.f32 %v9061_v51, %v6365_v12  ;;  %v6435_v54 = vadd.f32 %v10750_v6, %v6423_v58 }
0x2090   :  { %v6434_v2 = vadd.f32 %v10750_v6, %v6422_v50  ;;  %v6412_v63 = vmul.f32 %v9063_v55, %v6364_v4  ;;  %v6619_v4 = vld [vmem:[%s10861_s26 + $0x8] sm:$0xff] }
0x2091   :  { %v6425_v35 = vmul.f32 %v10747_v38, %v6413_v30  ;;  %v8589_v13 = vpack.c.bf16 %v6619_v4, %v6618_v22 }
0x2092   :  { %8340 = vmatprep.mubr.msk.f32.mxu1 %vm339_vm2, %v6434_v2  ;;  %v6424_v1 = vmul.f32 %v10747_v38, %v6412_v63 }
0x2093   :  { %8341 = vmatmul.mubr.msk.f32.vlgmr.msra.gmra.mrb[126].mxu1 %vm339_vm2, %v6435_v54  ;;  %v6437_v5 = vadd.f32 %v10750_v6, %v6425_v35  ;;  %8590 = vmatprep.subr.bf16.mxu1 %v8589_v13 }
0x2094   :  { %v6436_v25 = vadd.f32 %v10750_v6, %v6424_v1  ;;  %8592 = vmatpush3.bf16.msra.mxu1 %v8589_v13 }
0x2095   :  { %8594 = vmatprep.subr.bf16.mxu1 %v8593_v49 }
0x2096   :  { %8343 = vmatprep.mubr.msk.f32.mxu1 %vm339_vm2, %v6436_v25 }
0x2097   :  { %8344 = vmatmul.mubr.msk.f32.gmra.mrb[128].mxu1 %vm339_vm2, %v6437_v5 }
0x2098   :  { %8596 = vmatpush3.bf16.msra.mxu1 %v8593_v49 }
0x2099   :  { %8598 = vmatprep.subr.bf16.mxu1 %v8597_v45 }
0x209c   :  { %8600 = vmatpush3.bf16.msra.mxu1 %v8597_v45 }
0x209d   :  { %8602 = vmatprep.subr.bf16.mxu1 %v8601_v32 }
0x20a0   :  { %8604 = vmatpush3.bf16.msra.mxu1 %v8601_v32 }
0x20b6   :  { %v6355_v23 = vpop.xlane.xlu1 %6354 }
0x20b7   :  { %v6361_v7 = vmul.f32 0.03125, %v6355_v23  ;;  %v6352_v20 = vpop.xlane.xlu0 %6351 }
0x20b8   :  { %v6360_v29 = vmul.f32 0.03125, %v6352_v20 }
0x20b9   :  { %v6367_v34 = vsub.f32 %v6335_v39, %v6361_v7 }
0x20ba   :  { %v6366_v52 = vsub.f32 %v6334_v10, %v6360_v29 }
0x20bb   :  { %v6373_v8 = vmul.f32 %v6367_v34, %v6367_v34 }
0x20bc   :  { %v6372_v31 = vmul.f32 %v6366_v52, %v6366_v52 }
0x20bd   :  { %v6389_v17 = vsel %vm339_vm2, %v6373_v8, 0.0 }
0x20be   :  { %6390 = vadd.xlane.f32.xlu1 %v6389_v17  ;;  %v6386_v12 = vsel %vm339_vm2, %v6372_v31, 0.0 }
0x20bf   :  { %6387 = vadd.xlane.f32.xlu0 %v6386_v12 }
0x214b   :  { %v6391_v33 = vpop.xlane.xlu1 %6390 }
0x214c   :  { %v6397_v18 = vmul.f32 0.03125, %v6391_v33  ;;  %v6388_v46 = vpop.xlane.xlu0 %6387 }
0x214d   :  { %v6396_v57 = vmul.f32 0.03125, %v6388_v46 }
0x214e   :  { %v6403_v41 = vadd.f32 1e-12, %v6397_v18 }
0x214f   :  { %v6402_v39 = vadd.f32 1e-12, %v6396_v57 }
0x2150   :  { %9064 = vrsqrt.f32 %v6403_v41 }
0x2151   :  { %9066 = vrsqrt.f32 %v6402_v39 }
0x215a   :  { %v9065_v10 = vpop.eup %9064 }
0x215b   :  { %v9067_v62 = vpop.eup %9066  ;;  %v6415_v37 = vmul.f32 %v9065_v10, %v6367_v34 }
0x215c   :  { %v6414_v36 = vmul.f32 %v9067_v62, %v6366_v52 }
0x215d   :  { %v6427_v40 = vmul.f32 %v10747_v38, %v6415_v37 }
0x215e   :  { %v6426_v0 = vmul.f32 %v10747_v38, %v6414_v36 }
0x215f   :  { %v6439_v47 = vadd.f32 %v10750_v6, %v6427_v40 }
0x2160   :  { %v6438_v24 = vadd.f32 %v10750_v6, %v6426_v0 }
0x2162   :  { %8346 = vmatprep.mubr.msk.f32.mxu1 %vm339_vm2, %v6438_v24 }
0x2163   :  { %8347 = vmatmul.mubr.msk.f32.gmra.mrb[130].mxu1 %vm339_vm2, %v6439_v47 }
0x2166   :  { %v8342_v53 = vpop.f32.mrb[126].mxu1 }
0x2167   :  { %v6541_v42 = vadd.f32 %v8342_v53, %v7208_v3  ;;  %v6535_v44 = vpop.f32.mrb[127].mxu1 }
0x2168   :  { %v6536_v11 = vadd.f32 %v7208_v3, %v6535_v44 }
0x2169   :  { %v6565_v61 = vmul.f32 %v6541_v42, %v6541_v42 }
0x216a   :  { %v6564_v43 = vmul.f32 %v6536_v11, %v6536_v11  ;;  %v8345_v48 = vpop.f32.mrb[128].mxu1 }
0x216b   :  { %v6571_v59 = vmul.f32 %v6565_v61, %v6541_v42  ;;  %v6551_v28 = vadd.f32 %v8345_v48, %v7208_v3  ;;  %v6545_v26 = vpop.f32.mrb[129].mxu1 }
0x216c   :  { %v6570_v38 = vmul.f32 %v6564_v43, %v6536_v11  ;;  %v6546_v58 = vadd.f32 %v7208_v3, %v6545_v26 }
0x216d   :  { %v6577_v51 = vmul.f32 0.044715, %v6571_v59  ;;  %v6567_v50 = vmul.f32 %v6551_v28, %v6551_v28  ;;  %v7215_v59 = vld [vmem:[%s10863_s1] ss:$0 sm:$0xff] }
0x216e   :  { %v6576_v6 = vmul.f32 0.044715, %v6570_v38  ;;  %v6566_v55 = vmul.f32 %v6546_v58, %v6546_v58 }
0x216f   :  { %v6583_v30 = vadd.f32 %v6577_v51, %v6541_v42  ;;  %v6573_v2 = vmul.f32 %v6567_v50, %v6551_v28 }
0x2170   :  { %v6582_v63 = vadd.f32 %v6576_v6, %v6536_v11  ;;  %v6572_v54 = vmul.f32 %v6566_v55, %v6546_v58 }
0x2171   :  { %v6589_v35 = vmul.f32 0.7978846, %v6583_v30  ;;  %v6579_v1 = vmul.f32 0.044715, %v6573_v2 }
0x2172   :  { %v6588_v25 = vmul.f32 0.7978846, %v6582_v63  ;;  %v6578_v5 = vmul.f32 0.044715, %v6572_v54 }
0x2173   :  { %9068 = vtanh.f32 %v6589_v35  ;;  %v6585_v23 = vadd.f32 %v6579_v1, %v6551_v28 }
0x2174   :  { %9070 = vtanh.f32 %v6588_v25  ;;  %v6584_v7 = vadd.f32 %v6578_v5, %v6546_v58 }
0x2175   :  { %v6591_v20 = vmul.f32 0.7978846, %v6585_v23 }
0x2176   :  { %v6590_v29 = vmul.f32 0.7978846, %v6584_v7  ;;  %v6798_v7 = vld [vmem:[%s9358_s20] sm:$0xff] }
0x2177   :  { %9072 = vtanh.f32 %v6591_v20  ;;  %v6799_v20 = vld [vmem:[%s9358_s20 + $0x8] sm:$0xff] }
0x2178   :  { %9074 = vtanh.f32 %v6590_v29  ;;  %v6800_v29 = vld [vmem:[%s9358_s20 + $0x10] sm:$0xff] }
0x217d   :  { %v9069_v34 = vpop.eup %9068 }
0x217e   :  { %v9071_v52 = vpop.eup %9070  ;;  %v6601_v8 = vadd.f32 1.0, %v9069_v34  ;;  %v8606_v34 = vpack.c.bf16 %v6799_v20, %v6798_v7 }
0x217f   :  { %v6600_v31 = vadd.f32 1.0, %v9071_v52  ;;  %v6801_v52 = vld [vmem:[%s9358_s20 + $0x18] sm:$0xff]  ;;  %s9154_s20 = smov [#allocation2]  }
0x2180   :  { %v6607_v17 = vmul.f32 0.5, %v6601_v8  ;;  %8607 = vmatpush3.bf16.msra.mxu0 %v8606_v34  ;;  %v8609_v8 = vpack.c.bf16 %v6801_v52, %v6800_v29  ;;  %s6893_s0 = sshll.u32 %s9154_s20, 4  ;;  %s6894_s0 = int_to_ptr.vmem [resolvable:$true] %s6893_s0 }
0x2181   :  { %v9073_v12 = vpop.eup %9072  ;;  %v6606_v22 = vmul.f32 0.5, %v6600_v31  ;;  %8608 = vmatprep.subr.bf16.mxu0 %v9147_v9  ;;  %s9082_s5 = scalar_lea.vmem %s6894_s0, 32  ;;  %p9087_p1 = scmp.lt.s32.totalorder %s6894_s0, %s6894_s0 }
0x2182   :  { %v9075_v4 = vpop.eup %9074  ;;  %v6603_v13 = vadd.f32 1.0, %v9073_v12  ;;  %v6613_v49 = vmul.f32 %v6607_v17, %v6541_v42  ;;  %p9083_p0 = scmp.ne.s32.totalorder %s6894_s0, %s9082_s5  ;;  %p9088_p2 = scmp.lt.s32.totalorder %s9082_s5, %s9082_s5 }
0x2183   :  { %v6612_v15 = vmul.f32 %v6606_v22, %v6536_v11  ;;  %v6602_v60 = vadd.f32 1.0, %v9075_v4 }
0x2184   :  { %v6609_v16 = vmul.f32 0.5, %v6603_v13  ;;  %8610 = vmatpush3.bf16.msra.mxu0 %v8609_v8  ;;  %p9089_p3 = por %p9088_p2, %p9087_p1 }
0x2185   :  { %8365 = vmatprep.mubr.msk.f32.mxu1 %vm3427_vm8, %v6612_v15  ;;  %v6608_v27 = vmul.f32 0.5, %v6602_v60 }
0x2186   :  { %8366 = vmatmul.mubr.msk.f32.vlgmr.msra.gmra.mrb[132].mxu1 %vm3427_vm8, %v6613_v49  ;;  %v6615_v56 = vmul.f32 %v6609_v16, %v6551_v28  ;;  %v7222_v49 = vld [vmem:[%s10864_s2] ss:$0 sm:$0xff]  ;;  %p9090_p4 = pnand %p9089_p3, %p9083_p0 }
0x2187   :  { %v6614_v45 = vmul.f32 %v6608_v27, %v6546_v58 }
0x2189   :  { %8368 = vmatprep.mubr.msk.f32.mxu1 %vm3427_vm8, %v6614_v45 }
0x218a   :  { %8369 = vmatmul.mubr.msk.f32.gmra.mrb[134].mxu1 %vm3427_vm8, %v6615_v56  ;;  %v7223_v56 = vld [vmem:[%s9353_s12] ss:$0 sm:$0xff] }
0x2236   :  { %v8348_v19 = vpop.f32.mrb[130].mxu1 }
0x2237   :  { %v6561_v32 = vadd.f32 %v8348_v19, %v7208_v3  ;;  %v6555_v33 = vpop.f32.mrb[131].mxu1 }
0x2238   :  { %v6556_v18 = vadd.f32 %v7208_v3, %v6555_v33 }
0x2239   :  { %v6569_v46 = vmul.f32 %v6561_v32, %v6561_v32 }
0x223a   :  { %v6568_v57 = vmul.f32 %v6556_v18, %v6556_v18 }
0x223b   :  { %v6575_v41 = vmul.f32 %v6569_v46, %v6561_v32 }
0x223c   :  { %v6574_v39 = vmul.f32 %v6568_v57, %v6556_v18 }
0x223d   :  { %v6581_v10 = vmul.f32 0.044715, %v6575_v41 }
0x223e   :  { %v6580_v62 = vmul.f32 0.044715, %v6574_v39 }
0x223f   :  { %v6587_v37 = vadd.f32 %v6581_v10, %v6561_v32 }
0x2240   :  { %v6586_v36 = vadd.f32 %v6580_v62, %v6556_v18 }
0x2241   :  { %v6593_v40 = vmul.f32 0.7978846, %v6587_v37 }
0x2242   :  { %v6592_v0 = vmul.f32 0.7978846, %v6586_v36 }
0x2243   :  { %9076 = vtanh.f32 %v6593_v40 }
0x2244   :  { %9078 = vtanh.f32 %v6592_v0 }
0x224d   :  { %v9077_v24 = vpop.eup %9076 }
0x224e   :  { %v9079_v47 = vpop.eup %9078  ;;  %v6605_v53 = vadd.f32 1.0, %v9077_v24 }
0x224f   :  { %v6604_v42 = vadd.f32 1.0, %v9079_v47 }
0x2250   :  { %v6611_v44 = vmul.f32 0.5, %v6605_v53 }
0x2251   :  { %v6610_v11 = vmul.f32 0.5, %v6604_v42 }
0x2252   :  { %v6617_v61 = vmul.f32 %v6611_v44, %v6561_v32 }
0x2253   :  { %v6616_v3 = vmul.f32 %v6610_v11, %v6556_v18  ;;  %v7224_v18 = vld [vmem:[%s9363_s27] ss:$0 sm:$0xff] }
0x2255   :  { %8371 = vmatprep.mubr.msk.f32.mxu1 %vm3427_vm8, %v6616_v3 }
0x2256   :  { %8372 = vmatmul.mubr.msk.f32.gmra.mrb[136].mxu1 %vm3427_vm8, %v6617_v61 }
0x2259   :  { %v8367_v43 = vpop.f32.mrb[132].mxu1 }
0x225a   :  { %v6717_v48 = vpop.f32.mrb[133].mxu1 }
0x225b   :  { %v6718_v26 = vadd.f32 %v7215_v59, %v6717_v48 }
0x225d   :  { %v8370_v28 = vpop.f32.mrb[134].mxu1  ;;  %v6742_v50 = vadd.f32 %v6718_v26, %v10720_v14 }
0x225e   :  { %v6731_v38 = vadd.f32 %v8370_v28, %v7215_v59  ;;  %v6726_v58 = vpop.f32.mrb[135].mxu1 }
0x2260   :  { %v6743_v51 = vadd.f32 %v6731_v38, %v10726_v21 }
0x2262   :  { %v6748_v6 = vrot.slane %v6743_v51, 7 }
0x2264   :  { %v6750_v55 = vsel %vm6749_vm9, %v6748_v6, %v6742_v50 }
0x2265   :  { %v6753_v30 = vsel %vm6752_vm10, %v6750_v55, 0.0 }
0x2266   :  { %6754 = vadd.xlane.f32.xlu0 %v6753_v30 }
0x22f3   :  { %v6755_v2 = vpop.xlane.xlu0 %6754 }
0x22f4   :  { %v6756_v63 = vmul.f32 0.03125, %v6755_v2 }
0x22f6   :  { %v6758_v54 = vrot.slane %v6756_v63, 1  ;;  %v6761_v35 = vsub.f32 %v6742_v50, %v6756_v63 }
0x22f8   :  { %v6762_v1 = vsub.f32 %v6743_v51, %v6758_v54  ;;  %v6763_v21 = vmul.f32 %v6761_v35, %v6761_v35 }
0x22fa   :  { %v6764_v25 = vmul.f32 %v6762_v1, %v6762_v1 }
0x22fc   :  { %v6767_v5 = vrot.slane %v6764_v25, 7 }
0x22fe   :  { %v6768_v14 = vsel %vm6749_vm9, %v6767_v5, %v6763_v21 }
0x22ff   :  { %v6770_v23 = vsel %vm6752_vm10, %v6768_v14, 0.0 }
0x2300   :  { %6771 = vadd.xlane.f32.xlu1 %v6770_v23 }
0x2329   :  { %v8373_v31 = vpop.f32.mrb[136].mxu1 }
0x232a   :  { %v6735_v17 = vpop.f32.mrb[137].mxu1 }
0x238d   :  { %v6772_v12 = vpop.xlane.xlu1 %6771 }
0x238e   :  { %v6773_v22 = vmul.f32 0.03125, %v6772_v12 }
0x2390   :  { %v6774_v4 = vadd.f32 1e-12, %v6773_v22 }
0x2392   :  { %9080 = vrsqrt.f32 %v6774_v4 }
0x239c   :  { %v9081_v13 = vpop.eup %9080 }
0x239d   :  { %v6777_v15 = vrot.slane %v9081_v13, 1  ;;  %v6780_v60 = vmul.f32 %v9081_v13, %v6761_v35 }
0x239f   :  { %v6781_v16 = vmul.f32 %v6777_v15, %v6762_v1  ;;  %v6788_v27 = vmul.f32 %v7222_v49, %v6780_v60 }
0x23a1   :  { %v6789_v45 = vmul.f32 %v7222_v49, %v6781_v16  ;;  %v6796_v32 = vadd.f32 %v7223_v56, %v6788_v27 }
0x23a3   :  { %v6797_v19 = vadd.f32 %v7223_v56, %v6789_v45 }
0x23a5   :  { %v6811_v33 = vrot.slane %v6797_v19, 7 }
0x23a7   :  { %v6812_v9 = vsel %vm6749_vm9, %v6811_v33, %v6796_v32 }
0x23a8   :  { %8383 = vmatmul.mubr.msk.f32.vlgmr.msra.gmra.mrb[132].mxu0 %vm339_vm2, %v6812_v9 }
0x247b   :  { %v6881_v46 = vpop.f32.mrb[132].mxu0 }
0x247c   :  { %v6882_v57 = vadd.f32 %v7224_v18, %v6881_v46  ;;  %v8384_v41 = vpop.f32.mrb[133].mxu0 }
0x247e   :  { %6886 = vst.msk [vmem:[#allocation2] sm:$0x3] %vm6885_vm11, %v6882_v57 }
0x247f   :  { %9093 = shalt.err (!%p9090_p4)
}
0x2480   :  { %s9094_s12 = scalar_lea.hbm %s9368_s4, 32 }
0x2481   :  { %p9095_p5 = scmp.ne.s32.totalorder %s9368_s4, %s9094_s12  ;;  %p9098_p6 = scmp.lt.u32.totalorder %s9094_s12, %s9368_s4 }
0x2483   :  { %p9100_p7 = pnand %p9098_p6, %p9095_p5 }
0x2485   :  { %9103 = shalt.err (!%p9100_p7)
}
0x2486   :  { %6896 = dma.vmem_to_hbm [thread:$0]  %s6894_s0, 32, %s9368_s4, [#allocation3]  }
0x2487   :  { %9104 = dma.done.wait [#allocation3], 32  }
0x2488   :  { %9105 = vsyncadd [#allocation3], 4294967264 }
0x2489   :  { %6900 = vsyncpa [#allocation3], 1 }

</bundles_post_ra>
